<compile_context>
chip_gen: v6e
topology: v6e:2x2x1
jax: 0.10.0
libtpu: 0.0.40
codegen_flags: <defaults>
</compile_context>

<pallas_src>
import math
from functools import partial

import numpy as np
import jax
import jax.numpy as jnp
from jax.experimental import pallas as pl
from jax.experimental.pallas import tpu as pltpu


# ----------------------------- in-kernel helpers -----------------------------

def _layer_norm(x, gamma, beta, eps=1e-5):
    mu = jnp.mean(x, axis=-1, keepdims=True)
    var = jnp.mean((x - mu) ** 2, axis=-1, keepdims=True)
    return (x - mu) * jax.lax.rsqrt(var + eps) * gamma + beta


def _gelu(x):
    # tanh-approximate GELU (EUP-friendly).
    c = math.sqrt(2.0 / math.pi)
    return 0.5 * x * (1.0 + jnp.tanh(c * (x + 0.044715 * x * x * x)))


# ------------------------------ fused forward kernel --------------------------

def _fused_kernel(x_ref, y_ref,
                  eeg_w, eeg_b, eog_w, eog_b, cls_ref, pos_ref,
                  ln1_g, ln1_b,
                  wq, bq, wk, bk, wv, bv, wo, bo,
                  ln2_g, ln2_b, w1, b1, w2, b2,
                  lnf_g, lnf_b, head_w, head_b,
                  o_ref, *, depth, num_heads):
    f32, bf16 = jnp.float32, jnp.bfloat16
    head_dim = wq.shape[-1]
    scale = 1.0 / math.sqrt(head_dim)

    # --- patch embeddings (folded Conv1d == per-patch linear) ---
    eeg = jnp.dot(x_ref[0].astype(bf16), eeg_w[...],
                  preferred_element_type=f32) + eeg_b[...]          # (N, D)
    eog = jnp.dot(y_ref[0].astype(bf16), eog_w[...],
                  preferred_element_type=f32) + eog_b[...]          # (N, D)

    # tokens = [cls, eeg patches, eog patches] + pos_embed
    x = jnp.concatenate([cls_ref[...], eeg, eog], axis=0) + pos_ref[...]   # (S, D)

    # --- transformer blocks (pre-LN) ---
    for l in range(depth):
        # multi-head self-attention; each head's output is folded directly
        # through its slice of W_o (no lane slicing / head concatenation).
        hb = _layer_norm(x, ln1_g[l], ln1_b[l]).astype(bf16)        # (S, D)
        attn = None
        for hh in range(num_heads):
            idx = l * num_heads + hh
            q = jnp.dot(hb, wq[idx], preferred_element_type=f32) + bq[idx]
            k = jnp.dot(hb, wk[idx], preferred_element_type=f32) + bk[idx]
            v = jnp.dot(hb, wv[idx], preferred_element_type=f32) + bv[idx]
            s = jax.lax.dot_general(q.astype(bf16), k.astype(bf16),
                                    (((1,), (1,)), ((), ())),
                                    preferred_element_type=f32) * scale   # (S, S)
            s = s - jnp.max(s, axis=-1, keepdims=True)
            p = jnp.exp(s)
            p = p * pl.reciprocal(jnp.sum(p, axis=-1, keepdims=True),
                                  approx=True)
            o = jnp.dot(p.astype(bf16), v.astype(bf16),
                        preferred_element_type=f32)                 # (S, hd)
            contrib = jnp.dot(o.astype(bf16), wo[idx],
                              preferred_element_type=f32)           # (S, D)
            attn = contrib if attn is None else attn + contrib
        x = x + attn + bo[l]

        # MLP
        h2 = _layer_norm(x, ln2_g[l], ln2_b[l]).astype(bf16)
        m = _gelu(jnp.dot(h2, w1[l], preferred_element_type=f32) + b1[l])
        x = x + jnp.dot(m.astype(bf16), w2[l],
                        preferred_element_type=f32) + b2[l]

    # --- final LN (on cls token only — LN is per-token) + classifier head ---
    cls_tok = _layer_norm(x[0:1, :], lnf_g[...], lnf_b[...])        # (1, D)
    o_ref[0] = (jnp.dot(cls_tok.astype(bf16), head_w[...],
                        preferred_element_type=f32) + head_b[...])  # (1, C)


def exp2_forward(params, x, y, patch_size, num_heads, depth):
    # x, y: (B, 1, L) float32, PyTorch Conv1d layout (NCL)
    B, C_in, L = x.shape
    assert C_in == 1
    N = L // patch_size
    P = patch_size * C_in
    P_pad = params["eeg_w"].shape[0]
    num_classes = params["head_w"].shape[1]

    xp = x.reshape(B, N, P)
    yp = y.reshape(B, N, P)
    if P_pad != P:  # sublane-align the contraction dim (padded weight rows are zero)
        pad = ((0, 0), (0, 0), (0, P_pad - P))
        xp = jnp.pad(xp, pad)
        yp = jnp.pad(yp, pad)

    weights = [
        params["eeg_w"], params["eeg_b"], params["eog_w"], params["eog_b"],
        params["cls_token"], params["pos_embed"],
        params["ln1_g"], params["ln1_b"],
        params["wq"], params["bq"], params["wk"], params["bk"],
        params["wv"], params["bv"], params["wo"], params["bo"],
        params["ln2_g"], params["ln2_b"],
        params["w1"], params["b1"], params["w2"], params["b2"],
        params["lnf_g"], params["lnf_b"], params["head_w"], params["head_b"],
    ]

    def _full(a):  # full-array block, constant index => loaded into VMEM once
        return pl.BlockSpec(a.shape, lambda b, _n=a.ndim: (0,) * _n)

    out = pl.pallas_call(
        partial(_fused_kernel, depth=depth, num_heads=num_heads),
        out_shape=jax.ShapeDtypeStruct((B, 1, num_classes), jnp.float32),
        grid=(B,),
        in_specs=[pl.BlockSpec((1, N, P_pad), lambda b: (b, 0, 0)),
                  pl.BlockSpec((1, N, P_pad), lambda b: (b, 0, 0))]
                 + [_full(a) for a in weights],
        out_specs=pl.BlockSpec((1, 1, num_classes), lambda b: (b, 0, 0)),
        compiler_params=pltpu.CompilerParams(
            dimension_semantics=("parallel",)),
    )(xp, yp, *weights)
    return out.reshape(B, num_classes)


# ------------------------------- params / init --------------------------------

def get_1d_sincos_pos_embed(embed_dim, length, cls_token=False):
    pos = np.arange(length, dtype=np.float32)
    omega = np.arange(embed_dim // 2, dtype=np.float32) / (embed_dim / 2.0)
    omega = 1.0 / (10000.0 ** omega)
    out = np.einsum("m,d->md", pos, omega)
    emb = np.concatenate([np.sin(out), np.cos(out)], axis=1)
    if cls_token:
        emb = np.concatenate([np.zeros((1, embed_dim), np.float32), emb], axis=0)
    return emb.astype(np.float32)


def init_params(key, patch_size, in_chans, embed_dim, depth, num_heads,
                mlp_ratio, num_classes, num_patches):
    # Note: to load real PyTorch weights, the Conv1d weight (D, C=1, P) must be
    # transposed to (P, D) (then zero-padded), and the fused in_proj (3D, D)
    # must be split per head into (depth*H, D, hd) q/k/v matrices; wo (D, D)
    # reshapes to (depth*H, hd, D).  Random init here uses that layout directly.
    hd = embed_dim // num_heads
    hidden = embed_dim * mlp_ratio
    P = patch_size * in_chans
    P_pad = ((P + 7) // 8) * 8
    f32, bf16 = jnp.float32, jnp.bfloat16

    keys = iter(jax.random.split(key, 16 + 8 * depth))

    def nrm(shape, dtype=bf16):
        return (jax.random.normal(next(keys), shape, f32) * 0.02).astype(dtype)

    zeros = lambda s, d=f32: jnp.zeros(s, d)
    ones = lambda s, d=f32: jnp.ones(s, d)

    def patch_w():
        w = jax.random.normal(next(keys), (P_pad, embed_dim), f32) * 0.02
        w = w * (jnp.arange(P_pad) < P)[:, None].astype(f32)  # zero padded rows
        return w.astype(bf16)

    params = {
        "eeg_w": patch_w(), "eeg_b": zeros((1, embed_dim)),
        "eog_w": patch_w(), "eog_b": zeros((1, embed_dim)),
        "cls_token": zeros((1, embed_dim)),
        "pos_embed": jnp.asarray(
            get_1d_sincos_pos_embed(embed_dim, num_patches, cls_token=True)),
        # transformer blocks, stacked over depth (and depth*heads for attention)
        "ln1_g": ones((depth, 1, embed_dim)),
        "ln1_b": zeros((depth, 1, embed_dim)),
        "wq": nrm((depth * num_heads, embed_dim, hd)),
        "bq": zeros((depth * num_heads, 1, hd)),
        "wk": nrm((depth * num_heads, embed_dim, hd)),
        "bk": zeros((depth * num_heads, 1, hd)),
        "wv": nrm((depth * num_heads, embed_dim, hd)),
        "bv": zeros((depth * num_heads, 1, hd)),
        "wo": nrm((depth * num_heads, hd, embed_dim)),
        "bo": zeros((depth, 1, embed_dim)),
        "ln2_g": ones((depth, 1, embed_dim)),
        "ln2_b": zeros((depth, 1, embed_dim)),
        "w1": nrm((depth, embed_dim, hidden)),
        "b1": zeros((depth, 1, hidden)),
        "w2": nrm((depth, hidden, embed_dim)),
        "b2": zeros((depth, 1, embed_dim)),
        # final norm + classifier
        "lnf_g": ones((1, embed_dim)), "lnf_b": zeros((1, embed_dim)),
        "head_w": nrm((embed_dim, num_classes)),
        "head_b": zeros((1, num_classes)),
    }
    return params


# ------------------------------------ main --------------------------------------

if __name__ == "__main__":
    # Small, consistent shapes: signal_length=240, patch_size=30 -> 8 patches
    # per modality, seq = 16 + 1 (cls) = 17 tokens.
    signal_length, patch_size, in_chans = 240, 30, 1
    embed_dim, depth, num_heads, mlp_ratio, num_classes = 32, 2, 4, 4, 5
    num_patches = signal_length // patch_size * 2  # 16
    batch = 2

    key = jax.random.PRNGKey(0)
    kp, kx, ky = jax.random.split(key, 3)
    params = init_params(kp, patch_size, in_chans, embed_dim, depth,
                         num_heads, mlp_ratio, num_classes, num_patches)

    x = jax.random.normal(kx, (batch, in_chans, signal_length), jnp.float32)
    y = jax.random.normal(ky, (batch, in_chans, signal_length), jnp.float32)

    pred = exp2_forward(params, x, y, patch_size, num_heads, depth)
    pred = jax.block_until_ready(pred)
    assert pred.shape == (batch, num_classes), pred.shape
    assert bool(jnp.all(jnp.isfinite(pred)))
    print("KERNEL_OK")
</pallas_src>

<mosaic_0001>
module attributes {stable_mosaic.version = 11 : i64} {
  func.func @_fused_kernel(%arg0: i32, %arg1: memref<1x8x32xf32, #tpu.memory_space<vmem>>, %arg2: memref<1x8x32xf32, #tpu.memory_space<vmem>>, %arg3: memref<32x32xbf16, #tpu.memory_space<vmem>>, %arg4: memref<1x32xf32, #tpu.memory_space<vmem>>, %arg5: memref<32x32xbf16, #tpu.memory_space<vmem>>, %arg6: memref<1x32xf32, #tpu.memory_space<vmem>>, %arg7: memref<1x32xf32, #tpu.memory_space<vmem>>, %arg8: memref<17x32xf32, #tpu.memory_space<vmem>>, %arg9: memref<2x1x32xf32, #tpu.memory_space<vmem>>, %arg10: memref<2x1x32xf32, #tpu.memory_space<vmem>>, %arg11: memref<8x32x8xbf16, #tpu.memory_space<vmem>>, %arg12: memref<8x1x8xf32, #tpu.memory_space<vmem>>, %arg13: memref<8x32x8xbf16, #tpu.memory_space<vmem>>, %arg14: memref<8x1x8xf32, #tpu.memory_space<vmem>>, %arg15: memref<8x32x8xbf16, #tpu.memory_space<vmem>>, %arg16: memref<8x1x8xf32, #tpu.memory_space<vmem>>, %arg17: memref<8x8x32xbf16, #tpu.memory_space<vmem>>, %arg18: memref<2x1x32xf32, #tpu.memory_space<vmem>>, %arg19: memref<2x1x32xf32, #tpu.memory_space<vmem>>, %arg20: memref<2x1x32xf32, #tpu.memory_space<vmem>>, %arg21: memref<2x32x128xbf16, #tpu.memory_space<vmem>>, %arg22: memref<2x1x128xf32, #tpu.memory_space<vmem>>, %arg23: memref<2x128x32xbf16, #tpu.memory_space<vmem>>, %arg24: memref<2x1x32xf32, #tpu.memory_space<vmem>>, %arg25: memref<1x32xf32, #tpu.memory_space<vmem>>, %arg26: memref<1x32xf32, #tpu.memory_space<vmem>>, %arg27: memref<32x5xbf16, #tpu.memory_space<vmem>>, %arg28: memref<1x5xf32, #tpu.memory_space<vmem>>, %arg29: memref<1x1x5xf32, #tpu.memory_space<vmem>>) attributes {dimension_semantics = [#tpu.dimension_semantics<parallel>], iteration_bounds = array<i64: 2>, scalar_prefetch = 0 : i64, scratch_operands = 0 : i64, tpu.core_type = #tpu.core_type<tc>, window_params = [{transform_indices = @transform_0, window_bounds = array<i64: 1, 8, 32>}, {transform_indices = @transform_1, window_bounds = array<i64: 1, 8, 32>}, {pipeline_mode = #tpu.pipeline_mode<synchronous>, transform_indices = @transform_2, window_bounds = array<i64: 32, 32>}, {pipeline_mode = #tpu.pipeline_mode<synchronous>, transform_indices = @transform_3, window_bounds = array<i64: 1, 32>}, {pipeline_mode = #tpu.pipeline_mode<synchronous>, transform_indices = @transform_4, window_bounds = array<i64: 32, 32>}, {pipeline_mode = #tpu.pipeline_mode<synchronous>, transform_indices = @transform_5, window_bounds = array<i64: 1, 32>}, {pipeline_mode = #tpu.pipeline_mode<synchronous>, transform_indices = @transform_6, window_bounds = array<i64: 1, 32>}, {pipeline_mode = #tpu.pipeline_mode<synchronous>, transform_indices = @transform_7, window_bounds = array<i64: 17, 32>}, {pipeline_mode = #tpu.pipeline_mode<synchronous>, transform_indices = @transform_8, window_bounds = array<i64: 2, 1, 32>}, {pipeline_mode = #tpu.pipeline_mode<synchronous>, transform_indices = @transform_9, window_bounds = array<i64: 2, 1, 32>}, {pipeline_mode = #tpu.pipeline_mode<synchronous>, transform_indices = @transform_10, window_bounds = array<i64: 8, 32, 8>}, {pipeline_mode = #tpu.pipeline_mode<synchronous>, transform_indices = @transform_11, window_bounds = array<i64: 8, 1, 8>}, {pipeline_mode = #tpu.pipeline_mode<synchronous>, transform_indices = @transform_12, window_bounds = array<i64: 8, 32, 8>}, {pipeline_mode = #tpu.pipeline_mode<synchronous>, transform_indices = @transform_13, window_bounds = array<i64: 8, 1, 8>}, {pipeline_mode = #tpu.pipeline_mode<synchronous>, transform_indices = @transform_14, window_bounds = array<i64: 8, 32, 8>}, {pipeline_mode = #tpu.pipeline_mode<synchronous>, transform_indices = @transform_15, window_bounds = array<i64: 8, 1, 8>}, {pipeline_mode = #tpu.pipeline_mode<synchronous>, transform_indices = @transform_16, window_bounds = array<i64: 8, 8, 32>}, {pipeline_mode = #tpu.pipeline_mode<synchronous>, transform_indices = @transform_17, window_bounds = array<i64: 2, 1, 32>}, {pipeline_mode = #tpu.pipeline_mode<synchronous>, transform_indices = @transform_18, window_bounds = array<i64: 2, 1, 32>}, {pipeline_mode = #tpu.pipeline_mode<synchronous>, transform_indices = @transform_19, window_bounds = array<i64: 2, 1, 32>}, {pipeline_mode = #tpu.pipeline_mode<synchronous>, transform_indices = @transform_20, window_bounds = array<i64: 2, 32, 128>}, {pipeline_mode = #tpu.pipeline_mode<synchronous>, transform_indices = @transform_21, window_bounds = array<i64: 2, 1, 128>}, {pipeline_mode = #tpu.pipeline_mode<synchronous>, transform_indices = @transform_22, window_bounds = array<i64: 2, 128, 32>}, {pipeline_mode = #tpu.pipeline_mode<synchronous>, transform_indices = @transform_23, window_bounds = array<i64: 2, 1, 32>}, {pipeline_mode = #tpu.pipeline_mode<synchronous>, transform_indices = @transform_24, window_bounds = array<i64: 1, 32>}, {pipeline_mode = #tpu.pipeline_mode<synchronous>, transform_indices = @transform_25, window_bounds = array<i64: 1, 32>}, {pipeline_mode = #tpu.pipeline_mode<synchronous>, transform_indices = @transform_26, window_bounds = array<i64: 32, 5>}, {pipeline_mode = #tpu.pipeline_mode<synchronous>, transform_indices = @transform_27, window_bounds = array<i64: 1, 5>}, {transform_indices = @transform_28, window_bounds = array<i64: 1, 1, 5>}]} {
    %c0 = arith.constant 0 : index
    %c0_0 = arith.constant 0 : index
    %c0_1 = arith.constant 0 : index
    %0 = vector.load %arg1[%c0, %c0_0, %c0_1] : memref<1x8x32xf32, #tpu.memory_space<vmem>>, vector<1x8x32xf32>
    %1 = vector.shape_cast %0 : vector<1x8x32xf32> to vector<8x32xf32>
    %2 = arith.truncf %1 : vector<8x32xf32> to vector<8x32xbf16>
    %c0_2 = arith.constant 0 : index
    %c0_3 = arith.constant 0 : index
    %3 = vector.load %arg3[%c0_2, %c0_3] : memref<32x32xbf16, #tpu.memory_space<vmem>>, vector<32x32xbf16>
    %cst = arith.constant dense<0.000000e+00> : vector<8x32xf32>
    %4 = tpu.matmul %2, %3, %cst {dimension_numbers = #tpu.dot_dimension_numbers<[1], [0], [0], [1], [0, 0, 1, 1], [], []>} : vector<8x32xbf16>, vector<32x32xbf16>, vector<8x32xf32> -> vector<8x32xf32>
    %c0_4 = arith.constant 0 : index
    %c0_5 = arith.constant 0 : index
    %5 = vector.load %arg4[%c0_4, %c0_5] : memref<1x32xf32, #tpu.memory_space<vmem>>, vector<1x32xf32>
    %6 = vector.broadcast %5 : vector<1x32xf32> to vector<8x32xf32>
    %7 = arith.addf %4, %6 : vector<8x32xf32>
    %c0_6 = arith.constant 0 : index
    %c0_7 = arith.constant 0 : index
    %c0_8 = arith.constant 0 : index
    %8 = vector.load %arg2[%c0_6, %c0_7, %c0_8] : memref<1x8x32xf32, #tpu.memory_space<vmem>>, vector<1x8x32xf32>
    %9 = vector.shape_cast %8 : vector<1x8x32xf32> to vector<8x32xf32>
    %10 = arith.truncf %9 : vector<8x32xf32> to vector<8x32xbf16>
    %c0_9 = arith.constant 0 : index
    %c0_10 = arith.constant 0 : index
    %11 = vector.load %arg5[%c0_9, %c0_10] : memref<32x32xbf16, #tpu.memory_space<vmem>>, vector<32x32xbf16>
    %cst_11 = arith.constant dense<0.000000e+00> : vector<8x32xf32>
    %12 = tpu.matmul %10, %11, %cst_11 {dimension_numbers = #tpu.dot_dimension_numbers<[1], [0], [0], [1], [0, 0, 1, 1], [], []>} : vector<8x32xbf16>, vector<32x32xbf16>, vector<8x32xf32> -> vector<8x32xf32>
    %c0_12 = arith.constant 0 : index
    %c0_13 = arith.constant 0 : index
    %13 = vector.load %arg6[%c0_12, %c0_13] : memref<1x32xf32, #tpu.memory_space<vmem>>, vector<1x32xf32>
    %14 = vector.broadcast %13 : vector<1x32xf32> to vector<8x32xf32>
    %15 = arith.addf %12, %14 : vector<8x32xf32>
    %c0_14 = arith.constant 0 : index
    %c0_15 = arith.constant 0 : index
    %16 = vector.load %arg7[%c0_14, %c0_15] : memref<1x32xf32, #tpu.memory_space<vmem>>, vector<1x32xf32>
    %17 = tpu.concatenate %16, %7, %15 in 0 : vector<1x32xf32>, vector<8x32xf32>, vector<8x32xf32> -> vector<17x32xf32>
    %c0_16 = arith.constant 0 : index
    %c0_17 = arith.constant 0 : index
    %18 = vector.load %arg8[%c0_16, %c0_17] : memref<17x32xf32, #tpu.memory_space<vmem>>, vector<17x32xf32>
    %19 = arith.addf %17, %18 : vector<17x32xf32>
    %c0_18 = arith.constant 0 : index
    %c0_19 = arith.constant 0 : index
    %c0_20 = arith.constant 0 : index
    %20 = vector.load %arg9[%c0_18, %c0_19, %c0_20] : memref<2x1x32xf32, #tpu.memory_space<vmem>>, vector<1x1x32xf32>
    %21 = vector.shape_cast %20 : vector<1x1x32xf32> to vector<1x32xf32>
    %c0_21 = arith.constant 0 : index
    %c0_22 = arith.constant 0 : index
    %c0_23 = arith.constant 0 : index
    %22 = vector.load %arg10[%c0_21, %c0_22, %c0_23] : memref<2x1x32xf32, #tpu.memory_space<vmem>>, vector<1x1x32xf32>
    %23 = vector.shape_cast %22 : vector<1x1x32xf32> to vector<1x32xf32>
    %cst_24 = arith.constant dense<0.000000e+00> : vector<17xf32>
    %24 = vector.multi_reduction <add>, %19, %cst_24 [1] : vector<17x32xf32> to vector<17xf32>
    %25 = vector.shape_cast %24 : vector<17xf32> to vector<17x1xf32>
    %cst_25 = arith.constant 3.200000e+01 : f32
    %26 = vector.broadcast %cst_25 : f32 to vector<17x1xf32>
    %27 = arith.divf %25, %26 : vector<17x1xf32>
    %28 = vector.broadcast %27 : vector<17x1xf32> to vector<17x32xf32>
    %29 = arith.subf %19, %28 : vector<17x32xf32>
    %30 = arith.mulf %29, %29 : vector<17x32xf32>
    %cst_26 = arith.constant dense<0.000000e+00> : vector<17xf32>
    %31 = vector.multi_reduction <add>, %30, %cst_26 [1] : vector<17x32xf32> to vector<17xf32>
    %32 = vector.shape_cast %31 : vector<17xf32> to vector<17x1xf32>
    %cst_27 = arith.constant 3.200000e+01 : f32
    %33 = vector.broadcast %cst_27 : f32 to vector<17x1xf32>
    %34 = arith.divf %32, %33 : vector<17x1xf32>
    %35 = vector.broadcast %27 : vector<17x1xf32> to vector<17x32xf32>
    %36 = arith.subf %19, %35 : vector<17x32xf32>
    %cst_28 = arith.constant 9.99999974E-6 : f32
    %37 = vector.broadcast %cst_28 : f32 to vector<17x1xf32>
    %38 = arith.addf %34, %37 : vector<17x1xf32>
    %39 = math.rsqrt %38 : vector<17x1xf32>
    %40 = vector.broadcast %39 : vector<17x1xf32> to vector<17x32xf32>
    %41 = arith.mulf %36, %40 : vector<17x32xf32>
    %42 = vector.broadcast %21 : vector<1x32xf32> to vector<17x32xf32>
    %43 = arith.mulf %41, %42 : vector<17x32xf32>
    %44 = vector.broadcast %23 : vector<1x32xf32> to vector<17x32xf32>
    %45 = arith.addf %43, %44 : vector<17x32xf32>
    %46 = arith.truncf %45 : vector<17x32xf32> to vector<17x32xbf16>
    %c0_29 = arith.constant 0 : index
    %c0_30 = arith.constant 0 : index
    %c0_31 = arith.constant 0 : index
    %47 = vector.load %arg11[%c0_29, %c0_30, %c0_31] : memref<8x32x8xbf16, #tpu.memory_space<vmem>>, vector<1x32x8xbf16>
    %48 = vector.shape_cast %47 : vector<1x32x8xbf16> to vector<32x8xbf16>
    %cst_32 = arith.constant dense<0.000000e+00> : vector<17x8xf32>
    %49 = tpu.matmul %46, %48, %cst_32 {dimension_numbers = #tpu.dot_dimension_numbers<[1], [0], [0], [1], [0, 0, 1, 1], [], []>} : vector<17x32xbf16>, vector<32x8xbf16>, vector<17x8xf32> -> vector<17x8xf32>
    %c0_33 = arith.constant 0 : index
    %c0_34 = arith.constant 0 : index
    %c0_35 = arith.constant 0 : index
    %50 = vector.load %arg12[%c0_33, %c0_34, %c0_35] : memref<8x1x8xf32, #tpu.memory_space<vmem>>, vector<1x1x8xf32>
    %51 = vector.shape_cast %50 : vector<1x1x8xf32> to vector<1x8xf32>
    %52 = vector.broadcast %51 : vector<1x8xf32> to vector<17x8xf32>
    %53 = arith.addf %49, %52 : vector<17x8xf32>
    %c0_36 = arith.constant 0 : index
    %c0_37 = arith.constant 0 : index
    %c0_38 = arith.constant 0 : index
    %54 = vector.load %arg13[%c0_36, %c0_37, %c0_38] : memref<8x32x8xbf16, #tpu.memory_space<vmem>>, vector<1x32x8xbf16>
    %55 = vector.shape_cast %54 : vector<1x32x8xbf16> to vector<32x8xbf16>
    %cst_39 = arith.constant dense<0.000000e+00> : vector<17x8xf32>
    %56 = tpu.matmul %46, %55, %cst_39 {dimension_numbers = #tpu.dot_dimension_numbers<[1], [0], [0], [1], [0, 0, 1, 1], [], []>} : vector<17x32xbf16>, vector<32x8xbf16>, vector<17x8xf32> -> vector<17x8xf32>
    %c0_40 = arith.constant 0 : index
    %c0_41 = arith.constant 0 : index
    %c0_42 = arith.constant 0 : index
    %57 = vector.load %arg14[%c0_40, %c0_41, %c0_42] : memref<8x1x8xf32, #tpu.memory_space<vmem>>, vector<1x1x8xf32>
    %58 = vector.shape_cast %57 : vector<1x1x8xf32> to vector<1x8xf32>
    %59 = vector.broadcast %58 : vector<1x8xf32> to vector<17x8xf32>
    %60 = arith.addf %56, %59 : vector<17x8xf32>
    %c0_43 = arith.constant 0 : index
    %c0_44 = arith.constant 0 : index
    %c0_45 = arith.constant 0 : index
    %61 = vector.load %arg15[%c0_43, %c0_44, %c0_45] : memref<8x32x8xbf16, #tpu.memory_space<vmem>>, vector<1x32x8xbf16>
    %62 = vector.shape_cast %61 : vector<1x32x8xbf16> to vector<32x8xbf16>
    %cst_46 = arith.constant dense<0.000000e+00> : vector<17x8xf32>
    %63 = tpu.matmul %46, %62, %cst_46 {dimension_numbers = #tpu.dot_dimension_numbers<[1], [0], [0], [1], [0, 0, 1, 1], [], []>} : vector<17x32xbf16>, vector<32x8xbf16>, vector<17x8xf32> -> vector<17x8xf32>
    %c0_47 = arith.constant 0 : index
    %c0_48 = arith.constant 0 : index
    %c0_49 = arith.constant 0 : index
    %64 = vector.load %arg16[%c0_47, %c0_48, %c0_49] : memref<8x1x8xf32, #tpu.memory_space<vmem>>, vector<1x1x8xf32>
    %65 = vector.shape_cast %64 : vector<1x1x8xf32> to vector<1x8xf32>
    %66 = vector.broadcast %65 : vector<1x8xf32> to vector<17x8xf32>
    %67 = arith.addf %63, %66 : vector<17x8xf32>
    %68 = arith.truncf %53 : vector<17x8xf32> to vector<17x8xbf16>
    %69 = arith.truncf %60 : vector<17x8xf32> to vector<17x8xbf16>
    %cst_50 = arith.constant dense<0.000000e+00> : vector<17x17xf32>
    %70 = tpu.matmul %68, %69, %cst_50 {dimension_numbers = #tpu.dot_dimension_numbers<[1], [1], [0], [0], [0, 0, 1, 0], [], []>} : vector<17x8xbf16>, vector<17x8xbf16>, vector<17x17xf32> -> vector<17x17xf32>
    %cst_51 = arith.constant 0.353553385 : f32
    %71 = vector.broadcast %cst_51 : f32 to vector<17x17xf32>
    %72 = arith.mulf %70, %71 : vector<17x17xf32>
    %cst_52 = arith.constant dense<0xFF800000> : vector<17xf32>
    %73 = vector.multi_reduction <maximumf>, %72, %cst_52 [1] : vector<17x17xf32> to vector<17xf32>
    %74 = vector.shape_cast %73 : vector<17xf32> to vector<17x1xf32>
    %75 = vector.broadcast %74 : vector<17x1xf32> to vector<17x17xf32>
    %76 = arith.subf %72, %75 : vector<17x17xf32>
    %77 = math.exp %76 : vector<17x17xf32>
    %cst_53 = arith.constant dense<0.000000e+00> : vector<17xf32>
    %78 = vector.multi_reduction <add>, %77, %cst_53 [1] : vector<17x17xf32> to vector<17xf32>
    %79 = vector.shape_cast %78 : vector<17xf32> to vector<17x1xf32>
    %80 = tpu.reciprocal %79 {approx = true} : vector<17x1xf32> -> vector<17x1xf32>
    %81 = vector.broadcast %80 : vector<17x1xf32> to vector<17x17xf32>
    %82 = arith.mulf %77, %81 : vector<17x17xf32>
    %83 = arith.truncf %82 : vector<17x17xf32> to vector<17x17xbf16>
    %84 = arith.truncf %67 : vector<17x8xf32> to vector<17x8xbf16>
    %cst_54 = arith.constant dense<0.000000e+00> : vector<17x8xf32>
    %85 = tpu.matmul %83, %84, %cst_54 {dimension_numbers = #tpu.dot_dimension_numbers<[1], [0], [0], [1], [0, 0, 1, 1], [], []>} : vector<17x17xbf16>, vector<17x8xbf16>, vector<17x8xf32> -> vector<17x8xf32>
    %86 = arith.truncf %85 : vector<17x8xf32> to vector<17x8xbf16>
    %c0_55 = arith.constant 0 : index
    %c0_56 = arith.constant 0 : index
    %c0_57 = arith.constant 0 : index
    %87 = vector.load %arg17[%c0_55, %c0_56, %c0_57] : memref<8x8x32xbf16, #tpu.memory_space<vmem>>, vector<1x8x32xbf16>
    %88 = vector.shape_cast %87 : vector<1x8x32xbf16> to vector<8x32xbf16>
    %cst_58 = arith.constant dense<0.000000e+00> : vector<17x32xf32>
    %89 = tpu.matmul %86, %88, %cst_58 {dimension_numbers = #tpu.dot_dimension_numbers<[1], [0], [0], [1], [0, 0, 1, 1], [], []>} : vector<17x8xbf16>, vector<8x32xbf16>, vector<17x32xf32> -> vector<17x32xf32>
    %c1 = arith.constant 1 : index
    %c0_59 = arith.constant 0 : index
    %c0_60 = arith.constant 0 : index
    %90 = vector.load %arg11[%c1, %c0_59, %c0_60] : memref<8x32x8xbf16, #tpu.memory_space<vmem>>, vector<1x32x8xbf16>
    %91 = vector.shape_cast %90 : vector<1x32x8xbf16> to vector<32x8xbf16>
    %cst_61 = arith.constant dense<0.000000e+00> : vector<17x8xf32>
    %92 = tpu.matmul %46, %91, %cst_61 {dimension_numbers = #tpu.dot_dimension_numbers<[1], [0], [0], [1], [0, 0, 1, 1], [], []>} : vector<17x32xbf16>, vector<32x8xbf16>, vector<17x8xf32> -> vector<17x8xf32>
    %c1_62 = arith.constant 1 : index
    %c0_63 = arith.constant 0 : index
    %c0_64 = arith.constant 0 : index
    %93 = vector.load %arg12[%c1_62, %c0_63, %c0_64] : memref<8x1x8xf32, #tpu.memory_space<vmem>>, vector<1x1x8xf32>
    %94 = vector.shape_cast %93 : vector<1x1x8xf32> to vector<1x8xf32>
    %95 = vector.broadcast %94 : vector<1x8xf32> to vector<17x8xf32>
    %96 = arith.addf %92, %95 : vector<17x8xf32>
    %c1_65 = arith.constant 1 : index
    %c0_66 = arith.constant 0 : index
    %c0_67 = arith.constant 0 : index
    %97 = vector.load %arg13[%c1_65, %c0_66, %c0_67] : memref<8x32x8xbf16, #tpu.memory_space<vmem>>, vector<1x32x8xbf16>
    %98 = vector.shape_cast %97 : vector<1x32x8xbf16> to vector<32x8xbf16>
    %cst_68 = arith.constant dense<0.000000e+00> : vector<17x8xf32>
    %99 = tpu.matmul %46, %98, %cst_68 {dimension_numbers = #tpu.dot_dimension_numbers<[1], [0], [0], [1], [0, 0, 1, 1], [], []>} : vector<17x32xbf16>, vector<32x8xbf16>, vector<17x8xf32> -> vector<17x8xf32>
    %c1_69 = arith.constant 1 : index
    %c0_70 = arith.constant 0 : index
    %c0_71 = arith.constant 0 : index
    %100 = vector.load %arg14[%c1_69, %c0_70, %c0_71] : memref<8x1x8xf32, #tpu.memory_space<vmem>>, vector<1x1x8xf32>
    %101 = vector.shape_cast %100 : vector<1x1x8xf32> to vector<1x8xf32>
    %102 = vector.broadcast %101 : vector<1x8xf32> to vector<17x8xf32>
    %103 = arith.addf %99, %102 : vector<17x8xf32>
    %c1_72 = arith.constant 1 : index
    %c0_73 = arith.constant 0 : index
    %c0_74 = arith.constant 0 : index
    %104 = vector.load %arg15[%c1_72, %c0_73, %c0_74] : memref<8x32x8xbf16, #tpu.memory_space<vmem>>, vector<1x32x8xbf16>
    %105 = vector.shape_cast %104 : vector<1x32x8xbf16> to vector<32x8xbf16>
    %cst_75 = arith.constant dense<0.000000e+00> : vector<17x8xf32>
    %106 = tpu.matmul %46, %105, %cst_75 {dimension_numbers = #tpu.dot_dimension_numbers<[1], [0], [0], [1], [0, 0, 1, 1], [], []>} : vector<17x32xbf16>, vector<32x8xbf16>, vector<17x8xf32> -> vector<17x8xf32>
    %c1_76 = arith.constant 1 : index
    %c0_77 = arith.constant 0 : index
    %c0_78 = arith.constant 0 : index
    %107 = vector.load %arg16[%c1_76, %c0_77, %c0_78] : memref<8x1x8xf32, #tpu.memory_space<vmem>>, vector<1x1x8xf32>
    %108 = vector.shape_cast %107 : vector<1x1x8xf32> to vector<1x8xf32>
    %109 = vector.broadcast %108 : vector<1x8xf32> to vector<17x8xf32>
    %110 = arith.addf %106, %109 : vector<17x8xf32>
    %111 = arith.truncf %96 : vector<17x8xf32> to vector<17x8xbf16>
    %112 = arith.truncf %103 : vector<17x8xf32> to vector<17x8xbf16>
    %cst_79 = arith.constant dense<0.000000e+00> : vector<17x17xf32>
    %113 = tpu.matmul %111, %112, %cst_79 {dimension_numbers = #tpu.dot_dimension_numbers<[1], [1], [0], [0], [0, 0, 1, 0], [], []>} : vector<17x8xbf16>, vector<17x8xbf16>, vector<17x17xf32> -> vector<17x17xf32>
    %cst_80 = arith.constant 0.353553385 : f32
    %114 = vector.broadcast %cst_80 : f32 to vector<17x17xf32>
    %115 = arith.mulf %113, %114 : vector<17x17xf32>
    %cst_81 = arith.constant dense<0xFF800000> : vector<17xf32>
    %116 = vector.multi_reduction <maximumf>, %115, %cst_81 [1] : vector<17x17xf32> to vector<17xf32>
    %117 = vector.shape_cast %116 : vector<17xf32> to vector<17x1xf32>
    %118 = vector.broadcast %117 : vector<17x1xf32> to vector<17x17xf32>
    %119 = arith.subf %115, %118 : vector<17x17xf32>
    %120 = math.exp %119 : vector<17x17xf32>
    %cst_82 = arith.constant dense<0.000000e+00> : vector<17xf32>
    %121 = vector.multi_reduction <add>, %120, %cst_82 [1] : vector<17x17xf32> to vector<17xf32>
    %122 = vector.shape_cast %121 : vector<17xf32> to vector<17x1xf32>
    %123 = tpu.reciprocal %122 {approx = true} : vector<17x1xf32> -> vector<17x1xf32>
    %124 = vector.broadcast %123 : vector<17x1xf32> to vector<17x17xf32>
    %125 = arith.mulf %120, %124 : vector<17x17xf32>
    %126 = arith.truncf %125 : vector<17x17xf32> to vector<17x17xbf16>
    %127 = arith.truncf %110 : vector<17x8xf32> to vector<17x8xbf16>
    %cst_83 = arith.constant dense<0.000000e+00> : vector<17x8xf32>
    %128 = tpu.matmul %126, %127, %cst_83 {dimension_numbers = #tpu.dot_dimension_numbers<[1], [0], [0], [1], [0, 0, 1, 1], [], []>} : vector<17x17xbf16>, vector<17x8xbf16>, vector<17x8xf32> -> vector<17x8xf32>
    %129 = arith.truncf %128 : vector<17x8xf32> to vector<17x8xbf16>
    %c1_84 = arith.constant 1 : index
    %c0_85 = arith.constant 0 : index
    %c0_86 = arith.constant 0 : index
    %130 = vector.load %arg17[%c1_84, %c0_85, %c0_86] : memref<8x8x32xbf16, #tpu.memory_space<vmem>>, vector<1x8x32xbf16>
    %131 = vector.shape_cast %130 : vector<1x8x32xbf16> to vector<8x32xbf16>
    %cst_87 = arith.constant dense<0.000000e+00> : vector<17x32xf32>
    %132 = tpu.matmul %129, %131, %cst_87 {dimension_numbers = #tpu.dot_dimension_numbers<[1], [0], [0], [1], [0, 0, 1, 1], [], []>} : vector<17x8xbf16>, vector<8x32xbf16>, vector<17x32xf32> -> vector<17x32xf32>
    %133 = arith.addf %89, %132 : vector<17x32xf32>
    %c2 = arith.constant 2 : index
    %c0_88 = arith.constant 0 : index
    %c0_89 = arith.constant 0 : index
    %134 = vector.load %arg11[%c2, %c0_88, %c0_89] : memref<8x32x8xbf16, #tpu.memory_space<vmem>>, vector<1x32x8xbf16>
    %135 = vector.shape_cast %134 : vector<1x32x8xbf16> to vector<32x8xbf16>
    %cst_90 = arith.constant dense<0.000000e+00> : vector<17x8xf32>
    %136 = tpu.matmul %46, %135, %cst_90 {dimension_numbers = #tpu.dot_dimension_numbers<[1], [0], [0], [1], [0, 0, 1, 1], [], []>} : vector<17x32xbf16>, vector<32x8xbf16>, vector<17x8xf32> -> vector<17x8xf32>
    %c2_91 = arith.constant 2 : index
    %c0_92 = arith.constant 0 : index
    %c0_93 = arith.constant 0 : index
    %137 = vector.load %arg12[%c2_91, %c0_92, %c0_93] : memref<8x1x8xf32, #tpu.memory_space<vmem>>, vector<1x1x8xf32>
    %138 = vector.shape_cast %137 : vector<1x1x8xf32> to vector<1x8xf32>
    %139 = vector.broadcast %138 : vector<1x8xf32> to vector<17x8xf32>
    %140 = arith.addf %136, %139 : vector<17x8xf32>
    %c2_94 = arith.constant 2 : index
    %c0_95 = arith.constant 0 : index
    %c0_96 = arith.constant 0 : index
    %141 = vector.load %arg13[%c2_94, %c0_95, %c0_96] : memref<8x32x8xbf16, #tpu.memory_space<vmem>>, vector<1x32x8xbf16>
    %142 = vector.shape_cast %141 : vector<1x32x8xbf16> to vector<32x8xbf16>
    %cst_97 = arith.constant dense<0.000000e+00> : vector<17x8xf32>
    %143 = tpu.matmul %46, %142, %cst_97 {dimension_numbers = #tpu.dot_dimension_numbers<[1], [0], [0], [1], [0, 0, 1, 1], [], []>} : vector<17x32xbf16>, vector<32x8xbf16>, vector<17x8xf32> -> vector<17x8xf32>
    %c2_98 = arith.constant 2 : index
    %c0_99 = arith.constant 0 : index
    %c0_100 = arith.constant 0 : index
    %144 = vector.load %arg14[%c2_98, %c0_99, %c0_100] : memref<8x1x8xf32, #tpu.memory_space<vmem>>, vector<1x1x8xf32>
    %145 = vector.shape_cast %144 : vector<1x1x8xf32> to vector<1x8xf32>
    %146 = vector.broadcast %145 : vector<1x8xf32> to vector<17x8xf32>
    %147 = arith.addf %143, %146 : vector<17x8xf32>
    %c2_101 = arith.constant 2 : index
    %c0_102 = arith.constant 0 : index
    %c0_103 = arith.constant 0 : index
    %148 = vector.load %arg15[%c2_101, %c0_102, %c0_103] : memref<8x32x8xbf16, #tpu.memory_space<vmem>>, vector<1x32x8xbf16>
    %149 = vector.shape_cast %148 : vector<1x32x8xbf16> to vector<32x8xbf16>
    %cst_104 = arith.constant dense<0.000000e+00> : vector<17x8xf32>
    %150 = tpu.matmul %46, %149, %cst_104 {dimension_numbers = #tpu.dot_dimension_numbers<[1], [0], [0], [1], [0, 0, 1, 1], [], []>} : vector<17x32xbf16>, vector<32x8xbf16>, vector<17x8xf32> -> vector<17x8xf32>
    %c2_105 = arith.constant 2 : index
    %c0_106 = arith.constant 0 : index
    %c0_107 = arith.constant 0 : index
    %151 = vector.load %arg16[%c2_105, %c0_106, %c0_107] : memref<8x1x8xf32, #tpu.memory_space<vmem>>, vector<1x1x8xf32>
    %152 = vector.shape_cast %151 : vector<1x1x8xf32> to vector<1x8xf32>
    %153 = vector.broadcast %152 : vector<1x8xf32> to vector<17x8xf32>
    %154 = arith.addf %150, %153 : vector<17x8xf32>
    %155 = arith.truncf %140 : vector<17x8xf32> to vector<17x8xbf16>
    %156 = arith.truncf %147 : vector<17x8xf32> to vector<17x8xbf16>
    %cst_108 = arith.constant dense<0.000000e+00> : vector<17x17xf32>
    %157 = tpu.matmul %155, %156, %cst_108 {dimension_numbers = #tpu.dot_dimension_numbers<[1], [1], [0], [0], [0, 0, 1, 0], [], []>} : vector<17x8xbf16>, vector<17x8xbf16>, vector<17x17xf32> -> vector<17x17xf32>
    %cst_109 = arith.constant 0.353553385 : f32
    %158 = vector.broadcast %cst_109 : f32 to vector<17x17xf32>
    %159 = arith.mulf %157, %158 : vector<17x17xf32>
    %cst_110 = arith.constant dense<0xFF800000> : vector<17xf32>
    %160 = vector.multi_reduction <maximumf>, %159, %cst_110 [1] : vector<17x17xf32> to vector<17xf32>
    %161 = vector.shape_cast %160 : vector<17xf32> to vector<17x1xf32>
    %162 = vector.broadcast %161 : vector<17x1xf32> to vector<17x17xf32>
    %163 = arith.subf %159, %162 : vector<17x17xf32>
    %164 = math.exp %163 : vector<17x17xf32>
    %cst_111 = arith.constant dense<0.000000e+00> : vector<17xf32>
    %165 = vector.multi_reduction <add>, %164, %cst_111 [1] : vector<17x17xf32> to vector<17xf32>
    %166 = vector.shape_cast %165 : vector<17xf32> to vector<17x1xf32>
    %167 = tpu.reciprocal %166 {approx = true} : vector<17x1xf32> -> vector<17x1xf32>
    %168 = vector.broadcast %167 : vector<17x1xf32> to vector<17x17xf32>
    %169 = arith.mulf %164, %168 : vector<17x17xf32>
    %170 = arith.truncf %169 : vector<17x17xf32> to vector<17x17xbf16>
    %171 = arith.truncf %154 : vector<17x8xf32> to vector<17x8xbf16>
    %cst_112 = arith.constant dense<0.000000e+00> : vector<17x8xf32>
    %172 = tpu.matmul %170, %171, %cst_112 {dimension_numbers = #tpu.dot_dimension_numbers<[1], [0], [0], [1], [0, 0, 1, 1], [], []>} : vector<17x17xbf16>, vector<17x8xbf16>, vector<17x8xf32> -> vector<17x8xf32>
    %173 = arith.truncf %172 : vector<17x8xf32> to vector<17x8xbf16>
    %c2_113 = arith.constant 2 : index
    %c0_114 = arith.constant 0 : index
    %c0_115 = arith.constant 0 : index
    %174 = vector.load %arg17[%c2_113, %c0_114, %c0_115] : memref<8x8x32xbf16, #tpu.memory_space<vmem>>, vector<1x8x32xbf16>
    %175 = vector.shape_cast %174 : vector<1x8x32xbf16> to vector<8x32xbf16>
    %cst_116 = arith.constant dense<0.000000e+00> : vector<17x32xf32>
    %176 = tpu.matmul %173, %175, %cst_116 {dimension_numbers = #tpu.dot_dimension_numbers<[1], [0], [0], [1], [0, 0, 1, 1], [], []>} : vector<17x8xbf16>, vector<8x32xbf16>, vector<17x32xf32> -> vector<17x32xf32>
    %177 = arith.addf %133, %176 : vector<17x32xf32>
    %c3 = arith.constant 3 : index
    %c0_117 = arith.constant 0 : index
    %c0_118 = arith.constant 0 : index
    %178 = vector.load %arg11[%c3, %c0_117, %c0_118] : memref<8x32x8xbf16, #tpu.memory_space<vmem>>, vector<1x32x8xbf16>
    %179 = vector.shape_cast %178 : vector<1x32x8xbf16> to vector<32x8xbf16>
    %cst_119 = arith.constant dense<0.000000e+00> : vector<17x8xf32>
    %180 = tpu.matmul %46, %179, %cst_119 {dimension_numbers = #tpu.dot_dimension_numbers<[1], [0], [0], [1], [0, 0, 1, 1], [], []>} : vector<17x32xbf16>, vector<32x8xbf16>, vector<17x8xf32> -> vector<17x8xf32>
    %c3_120 = arith.constant 3 : index
    %c0_121 = arith.constant 0 : index
    %c0_122 = arith.constant 0 : index
    %181 = vector.load %arg12[%c3_120, %c0_121, %c0_122] : memref<8x1x8xf32, #tpu.memory_space<vmem>>, vector<1x1x8xf32>
    %182 = vector.shape_cast %181 : vector<1x1x8xf32> to vector<1x8xf32>
    %183 = vector.broadcast %182 : vector<1x8xf32> to vector<17x8xf32>
    %184 = arith.addf %180, %183 : vector<17x8xf32>
    %c3_123 = arith.constant 3 : index
    %c0_124 = arith.constant 0 : index
    %c0_125 = arith.constant 0 : index
    %185 = vector.load %arg13[%c3_123, %c0_124, %c0_125] : memref<8x32x8xbf16, #tpu.memory_space<vmem>>, vector<1x32x8xbf16>
    %186 = vector.shape_cast %185 : vector<1x32x8xbf16> to vector<32x8xbf16>
    %cst_126 = arith.constant dense<0.000000e+00> : vector<17x8xf32>
    %187 = tpu.matmul %46, %186, %cst_126 {dimension_numbers = #tpu.dot_dimension_numbers<[1], [0], [0], [1], [0, 0, 1, 1], [], []>} : vector<17x32xbf16>, vector<32x8xbf16>, vector<17x8xf32> -> vector<17x8xf32>
    %c3_127 = arith.constant 3 : index
    %c0_128 = arith.constant 0 : index
    %c0_129 = arith.constant 0 : index
    %188 = vector.load %arg14[%c3_127, %c0_128, %c0_129] : memref<8x1x8xf32, #tpu.memory_space<vmem>>, vector<1x1x8xf32>
    %189 = vector.shape_cast %188 : vector<1x1x8xf32> to vector<1x8xf32>
    %190 = vector.broadcast %189 : vector<1x8xf32> to vector<17x8xf32>
    %191 = arith.addf %187, %190 : vector<17x8xf32>
    %c3_130 = arith.constant 3 : index
    %c0_131 = arith.constant 0 : index
    %c0_132 = arith.constant 0 : index
    %192 = vector.load %arg15[%c3_130, %c0_131, %c0_132] : memref<8x32x8xbf16, #tpu.memory_space<vmem>>, vector<1x32x8xbf16>
    %193 = vector.shape_cast %192 : vector<1x32x8xbf16> to vector<32x8xbf16>
    %cst_133 = arith.constant dense<0.000000e+00> : vector<17x8xf32>
    %194 = tpu.matmul %46, %193, %cst_133 {dimension_numbers = #tpu.dot_dimension_numbers<[1], [0], [0], [1], [0, 0, 1, 1], [], []>} : vector<17x32xbf16>, vector<32x8xbf16>, vector<17x8xf32> -> vector<17x8xf32>
    %c3_134 = arith.constant 3 : index
    %c0_135 = arith.constant 0 : index
    %c0_136 = arith.constant 0 : index
    %195 = vector.load %arg16[%c3_134, %c0_135, %c0_136] : memref<8x1x8xf32, #tpu.memory_space<vmem>>, vector<1x1x8xf32>
    %196 = vector.shape_cast %195 : vector<1x1x8xf32> to vector<1x8xf32>
    %197 = vector.broadcast %196 : vector<1x8xf32> to vector<17x8xf32>
    %198 = arith.addf %194, %197 : vector<17x8xf32>
    %199 = arith.truncf %184 : vector<17x8xf32> to vector<17x8xbf16>
    %200 = arith.truncf %191 : vector<17x8xf32> to vector<17x8xbf16>
    %cst_137 = arith.constant dense<0.000000e+00> : vector<17x17xf32>
    %201 = tpu.matmul %199, %200, %cst_137 {dimension_numbers = #tpu.dot_dimension_numbers<[1], [1], [0], [0], [0, 0, 1, 0], [], []>} : vector<17x8xbf16>, vector<17x8xbf16>, vector<17x17xf32> -> vector<17x17xf32>
    %cst_138 = arith.constant 0.353553385 : f32
    %202 = vector.broadcast %cst_138 : f32 to vector<17x17xf32>
    %203 = arith.mulf %201, %202 : vector<17x17xf32>
    %cst_139 = arith.constant dense<0xFF800000> : vector<17xf32>
    %204 = vector.multi_reduction <maximumf>, %203, %cst_139 [1] : vector<17x17xf32> to vector<17xf32>
    %205 = vector.shape_cast %204 : vector<17xf32> to vector<17x1xf32>
    %206 = vector.broadcast %205 : vector<17x1xf32> to vector<17x17xf32>
    %207 = arith.subf %203, %206 : vector<17x17xf32>
    %208 = math.exp %207 : vector<17x17xf32>
    %cst_140 = arith.constant dense<0.000000e+00> : vector<17xf32>
    %209 = vector.multi_reduction <add>, %208, %cst_140 [1] : vector<17x17xf32> to vector<17xf32>
    %210 = vector.shape_cast %209 : vector<17xf32> to vector<17x1xf32>
    %211 = tpu.reciprocal %210 {approx = true} : vector<17x1xf32> -> vector<17x1xf32>
    %212 = vector.broadcast %211 : vector<17x1xf32> to vector<17x17xf32>
    %213 = arith.mulf %208, %212 : vector<17x17xf32>
    %214 = arith.truncf %213 : vector<17x17xf32> to vector<17x17xbf16>
    %215 = arith.truncf %198 : vector<17x8xf32> to vector<17x8xbf16>
    %cst_141 = arith.constant dense<0.000000e+00> : vector<17x8xf32>
    %216 = tpu.matmul %214, %215, %cst_141 {dimension_numbers = #tpu.dot_dimension_numbers<[1], [0], [0], [1], [0, 0, 1, 1], [], []>} : vector<17x17xbf16>, vector<17x8xbf16>, vector<17x8xf32> -> vector<17x8xf32>
    %217 = arith.truncf %216 : vector<17x8xf32> to vector<17x8xbf16>
    %c3_142 = arith.constant 3 : index
    %c0_143 = arith.constant 0 : index
    %c0_144 = arith.constant 0 : index
    %218 = vector.load %arg17[%c3_142, %c0_143, %c0_144] : memref<8x8x32xbf16, #tpu.memory_space<vmem>>, vector<1x8x32xbf16>
    %219 = vector.shape_cast %218 : vector<1x8x32xbf16> to vector<8x32xbf16>
    %cst_145 = arith.constant dense<0.000000e+00> : vector<17x32xf32>
    %220 = tpu.matmul %217, %219, %cst_145 {dimension_numbers = #tpu.dot_dimension_numbers<[1], [0], [0], [1], [0, 0, 1, 1], [], []>} : vector<17x8xbf16>, vector<8x32xbf16>, vector<17x32xf32> -> vector<17x32xf32>
    %221 = arith.addf %177, %220 : vector<17x32xf32>
    %222 = arith.addf %19, %221 : vector<17x32xf32>
    %c0_146 = arith.constant 0 : index
    %c0_147 = arith.constant 0 : index
    %c0_148 = arith.constant 0 : index
    %223 = vector.load %arg18[%c0_146, %c0_147, %c0_148] : memref<2x1x32xf32, #tpu.memory_space<vmem>>, vector<1x1x32xf32>
    %224 = vector.shape_cast %223 : vector<1x1x32xf32> to vector<1x32xf32>
    %225 = vector.broadcast %224 : vector<1x32xf32> to vector<17x32xf32>
    %226 = arith.addf %222, %225 : vector<17x32xf32>
    %c0_149 = arith.constant 0 : index
    %c0_150 = arith.constant 0 : index
    %c0_151 = arith.constant 0 : index
    %227 = vector.load %arg19[%c0_149, %c0_150, %c0_151] : memref<2x1x32xf32, #tpu.memory_space<vmem>>, vector<1x1x32xf32>
    %228 = vector.shape_cast %227 : vector<1x1x32xf32> to vector<1x32xf32>
    %c0_152 = arith.constant 0 : index
    %c0_153 = arith.constant 0 : index
    %c0_154 = arith.constant 0 : index
    %229 = vector.load %arg20[%c0_152, %c0_153, %c0_154] : memref<2x1x32xf32, #tpu.memory_space<vmem>>, vector<1x1x32xf32>
    %230 = vector.shape_cast %229 : vector<1x1x32xf32> to vector<1x32xf32>
    %cst_155 = arith.constant dense<0.000000e+00> : vector<17xf32>
    %231 = vector.multi_reduction <add>, %226, %cst_155 [1] : vector<17x32xf32> to vector<17xf32>
    %232 = vector.shape_cast %231 : vector<17xf32> to vector<17x1xf32>
    %cst_156 = arith.constant 3.200000e+01 : f32
    %233 = vector.broadcast %cst_156 : f32 to vector<17x1xf32>
    %234 = arith.divf %232, %233 : vector<17x1xf32>
    %235 = vector.broadcast %234 : vector<17x1xf32> to vector<17x32xf32>
    %236 = arith.subf %226, %235 : vector<17x32xf32>
    %237 = arith.mulf %236, %236 : vector<17x32xf32>
    %cst_157 = arith.constant dense<0.000000e+00> : vector<17xf32>
    %238 = vector.multi_reduction <add>, %237, %cst_157 [1] : vector<17x32xf32> to vector<17xf32>
    %239 = vector.shape_cast %238 : vector<17xf32> to vector<17x1xf32>
    %cst_158 = arith.constant 3.200000e+01 : f32
    %240 = vector.broadcast %cst_158 : f32 to vector<17x1xf32>
    %241 = arith.divf %239, %240 : vector<17x1xf32>
    %242 = vector.broadcast %234 : vector<17x1xf32> to vector<17x32xf32>
    %243 = arith.subf %226, %242 : vector<17x32xf32>
    %cst_159 = arith.constant 9.99999974E-6 : f32
    %244 = vector.broadcast %cst_159 : f32 to vector<17x1xf32>
    %245 = arith.addf %241, %244 : vector<17x1xf32>
    %246 = math.rsqrt %245 : vector<17x1xf32>
    %247 = vector.broadcast %246 : vector<17x1xf32> to vector<17x32xf32>
    %248 = arith.mulf %243, %247 : vector<17x32xf32>
    %249 = vector.broadcast %228 : vector<1x32xf32> to vector<17x32xf32>
    %250 = arith.mulf %248, %249 : vector<17x32xf32>
    %251 = vector.broadcast %230 : vector<1x32xf32> to vector<17x32xf32>
    %252 = arith.addf %250, %251 : vector<17x32xf32>
    %253 = arith.truncf %252 : vector<17x32xf32> to vector<17x32xbf16>
    %c0_160 = arith.constant 0 : index
    %c0_161 = arith.constant 0 : index
    %c0_162 = arith.constant 0 : index
    %254 = vector.load %arg21[%c0_160, %c0_161, %c0_162] : memref<2x32x128xbf16, #tpu.memory_space<vmem>>, vector<1x32x128xbf16>
    %255 = vector.shape_cast %254 : vector<1x32x128xbf16> to vector<32x128xbf16>
    %cst_163 = arith.constant dense<0.000000e+00> : vector<17x128xf32>
    %256 = tpu.matmul %253, %255, %cst_163 {dimension_numbers = #tpu.dot_dimension_numbers<[1], [0], [0], [1], [0, 0, 1, 1], [], []>} : vector<17x32xbf16>, vector<32x128xbf16>, vector<17x128xf32> -> vector<17x128xf32>
    %c0_164 = arith.constant 0 : index
    %c0_165 = arith.constant 0 : index
    %c0_166 = arith.constant 0 : index
    %257 = vector.load %arg22[%c0_164, %c0_165, %c0_166] : memref<2x1x128xf32, #tpu.memory_space<vmem>>, vector<1x1x128xf32>
    %258 = vector.shape_cast %257 : vector<1x1x128xf32> to vector<1x128xf32>
    %259 = vector.broadcast %258 : vector<1x128xf32> to vector<17x128xf32>
    %260 = arith.addf %256, %259 : vector<17x128xf32>
    %cst_167 = arith.constant 5.000000e-01 : f32
    %261 = vector.broadcast %cst_167 : f32 to vector<17x128xf32>
    %262 = arith.mulf %261, %260 : vector<17x128xf32>
    %cst_168 = arith.constant 4.471500e-02 : f32
    %263 = vector.broadcast %cst_168 : f32 to vector<17x128xf32>
    %264 = arith.mulf %263, %260 : vector<17x128xf32>
    %265 = arith.mulf %264, %260 : vector<17x128xf32>
    %266 = arith.mulf %265, %260 : vector<17x128xf32>
    %267 = arith.addf %260, %266 : vector<17x128xf32>
    %cst_169 = arith.constant 0.797884583 : f32
    %268 = vector.broadcast %cst_169 : f32 to vector<17x128xf32>
    %269 = arith.mulf %268, %267 : vector<17x128xf32>
    %270 = math.tanh %269 : vector<17x128xf32>
    %cst_170 = arith.constant 1.000000e+00 : f32
    %271 = vector.broadcast %cst_170 : f32 to vector<17x128xf32>
    %272 = arith.addf %271, %270 : vector<17x128xf32>
    %273 = arith.mulf %262, %272 : vector<17x128xf32>
    %274 = arith.truncf %273 : vector<17x128xf32> to vector<17x128xbf16>
    %c0_171 = arith.constant 0 : index
    %c0_172 = arith.constant 0 : index
    %c0_173 = arith.constant 0 : index
    %275 = vector.load %arg23[%c0_171, %c0_172, %c0_173] : memref<2x128x32xbf16, #tpu.memory_space<vmem>>, vector<1x128x32xbf16>
    %276 = vector.shape_cast %275 : vector<1x128x32xbf16> to vector<128x32xbf16>
    %cst_174 = arith.constant dense<0.000000e+00> : vector<17x32xf32>
    %277 = tpu.matmul %274, %276, %cst_174 {dimension_numbers = #tpu.dot_dimension_numbers<[1], [0], [0], [1], [0, 0, 1, 1], [], []>} : vector<17x128xbf16>, vector<128x32xbf16>, vector<17x32xf32> -> vector<17x32xf32>
    %278 = arith.addf %226, %277 : vector<17x32xf32>
    %c0_175 = arith.constant 0 : index
    %c0_176 = arith.constant 0 : index
    %c0_177 = arith.constant 0 : index
    %279 = vector.load %arg24[%c0_175, %c0_176, %c0_177] : memref<2x1x32xf32, #tpu.memory_space<vmem>>, vector<1x1x32xf32>
    %280 = vector.shape_cast %279 : vector<1x1x32xf32> to vector<1x32xf32>
    %281 = vector.broadcast %280 : vector<1x32xf32> to vector<17x32xf32>
    %282 = arith.addf %278, %281 : vector<17x32xf32>
    %c1_178 = arith.constant 1 : index
    %c0_179 = arith.constant 0 : index
    %c0_180 = arith.constant 0 : index
    %283 = vector.load %arg9[%c1_178, %c0_179, %c0_180] : memref<2x1x32xf32, #tpu.memory_space<vmem>>, vector<1x1x32xf32>
    %284 = vector.shape_cast %283 : vector<1x1x32xf32> to vector<1x32xf32>
    %c1_181 = arith.constant 1 : index
    %c0_182 = arith.constant 0 : index
    %c0_183 = arith.constant 0 : index
    %285 = vector.load %arg10[%c1_181, %c0_182, %c0_183] : memref<2x1x32xf32, #tpu.memory_space<vmem>>, vector<1x1x32xf32>
    %286 = vector.shape_cast %285 : vector<1x1x32xf32> to vector<1x32xf32>
    %cst_184 = arith.constant dense<0.000000e+00> : vector<17xf32>
    %287 = vector.multi_reduction <add>, %282, %cst_184 [1] : vector<17x32xf32> to vector<17xf32>
    %288 = vector.shape_cast %287 : vector<17xf32> to vector<17x1xf32>
    %cst_185 = arith.constant 3.200000e+01 : f32
    %289 = vector.broadcast %cst_185 : f32 to vector<17x1xf32>
    %290 = arith.divf %288, %289 : vector<17x1xf32>
    %291 = vector.broadcast %290 : vector<17x1xf32> to vector<17x32xf32>
    %292 = arith.subf %282, %291 : vector<17x32xf32>
    %293 = arith.mulf %292, %292 : vector<17x32xf32>
    %cst_186 = arith.constant dense<0.000000e+00> : vector<17xf32>
    %294 = vector.multi_reduction <add>, %293, %cst_186 [1] : vector<17x32xf32> to vector<17xf32>
    %295 = vector.shape_cast %294 : vector<17xf32> to vector<17x1xf32>
    %cst_187 = arith.constant 3.200000e+01 : f32
    %296 = vector.broadcast %cst_187 : f32 to vector<17x1xf32>
    %297 = arith.divf %295, %296 : vector<17x1xf32>
    %298 = vector.broadcast %290 : vector<17x1xf32> to vector<17x32xf32>
    %299 = arith.subf %282, %298 : vector<17x32xf32>
    %cst_188 = arith.constant 9.99999974E-6 : f32
    %300 = vector.broadcast %cst_188 : f32 to vector<17x1xf32>
    %301 = arith.addf %297, %300 : vector<17x1xf32>
    %302 = math.rsqrt %301 : vector<17x1xf32>
    %303 = vector.broadcast %302 : vector<17x1xf32> to vector<17x32xf32>
    %304 = arith.mulf %299, %303 : vector<17x32xf32>
    %305 = vector.broadcast %284 : vector<1x32xf32> to vector<17x32xf32>
    %306 = arith.mulf %304, %305 : vector<17x32xf32>
    %307 = vector.broadcast %286 : vector<1x32xf32> to vector<17x32xf32>
    %308 = arith.addf %306, %307 : vector<17x32xf32>
    %309 = arith.truncf %308 : vector<17x32xf32> to vector<17x32xbf16>
    %c4 = arith.constant 4 : index
    %c0_189 = arith.constant 0 : index
    %c0_190 = arith.constant 0 : index
    %310 = vector.load %arg11[%c4, %c0_189, %c0_190] : memref<8x32x8xbf16, #tpu.memory_space<vmem>>, vector<1x32x8xbf16>
    %311 = vector.shape_cast %310 : vector<1x32x8xbf16> to vector<32x8xbf16>
    %cst_191 = arith.constant dense<0.000000e+00> : vector<17x8xf32>
    %312 = tpu.matmul %309, %311, %cst_191 {dimension_numbers = #tpu.dot_dimension_numbers<[1], [0], [0], [1], [0, 0, 1, 1], [], []>} : vector<17x32xbf16>, vector<32x8xbf16>, vector<17x8xf32> -> vector<17x8xf32>
    %c4_192 = arith.constant 4 : index
    %c0_193 = arith.constant 0 : index
    %c0_194 = arith.constant 0 : index
    %313 = vector.load %arg12[%c4_192, %c0_193, %c0_194] : memref<8x1x8xf32, #tpu.memory_space<vmem>>, vector<1x1x8xf32>
    %314 = vector.shape_cast %313 : vector<1x1x8xf32> to vector<1x8xf32>
    %315 = vector.broadcast %314 : vector<1x8xf32> to vector<17x8xf32>
    %316 = arith.addf %312, %315 : vector<17x8xf32>
    %c4_195 = arith.constant 4 : index
    %c0_196 = arith.constant 0 : index
    %c0_197 = arith.constant 0 : index
    %317 = vector.load %arg13[%c4_195, %c0_196, %c0_197] : memref<8x32x8xbf16, #tpu.memory_space<vmem>>, vector<1x32x8xbf16>
    %318 = vector.shape_cast %317 : vector<1x32x8xbf16> to vector<32x8xbf16>
    %cst_198 = arith.constant dense<0.000000e+00> : vector<17x8xf32>
    %319 = tpu.matmul %309, %318, %cst_198 {dimension_numbers = #tpu.dot_dimension_numbers<[1], [0], [0], [1], [0, 0, 1, 1], [], []>} : vector<17x32xbf16>, vector<32x8xbf16>, vector<17x8xf32> -> vector<17x8xf32>
    %c4_199 = arith.constant 4 : index
    %c0_200 = arith.constant 0 : index
    %c0_201 = arith.constant 0 : index
    %320 = vector.load %arg14[%c4_199, %c0_200, %c0_201] : memref<8x1x8xf32, #tpu.memory_space<vmem>>, vector<1x1x8xf32>
    %321 = vector.shape_cast %320 : vector<1x1x8xf32> to vector<1x8xf32>
    %322 = vector.broadcast %321 : vector<1x8xf32> to vector<17x8xf32>
    %323 = arith.addf %319, %322 : vector<17x8xf32>
    %c4_202 = arith.constant 4 : index
    %c0_203 = arith.constant 0 : index
    %c0_204 = arith.constant 0 : index
    %324 = vector.load %arg15[%c4_202, %c0_203, %c0_204] : memref<8x32x8xbf16, #tpu.memory_space<vmem>>, vector<1x32x8xbf16>
    %325 = vector.shape_cast %324 : vector<1x32x8xbf16> to vector<32x8xbf16>
    %cst_205 = arith.constant dense<0.000000e+00> : vector<17x8xf32>
    %326 = tpu.matmul %309, %325, %cst_205 {dimension_numbers = #tpu.dot_dimension_numbers<[1], [0], [0], [1], [0, 0, 1, 1], [], []>} : vector<17x32xbf16>, vector<32x8xbf16>, vector<17x8xf32> -> vector<17x8xf32>
    %c4_206 = arith.constant 4 : index
    %c0_207 = arith.constant 0 : index
    %c0_208 = arith.constant 0 : index
    %327 = vector.load %arg16[%c4_206, %c0_207, %c0_208] : memref<8x1x8xf32, #tpu.memory_space<vmem>>, vector<1x1x8xf32>
    %328 = vector.shape_cast %327 : vector<1x1x8xf32> to vector<1x8xf32>
    %329 = vector.broadcast %328 : vector<1x8xf32> to vector<17x8xf32>
    %330 = arith.addf %326, %329 : vector<17x8xf32>
    %331 = arith.truncf %316 : vector<17x8xf32> to vector<17x8xbf16>
    %332 = arith.truncf %323 : vector<17x8xf32> to vector<17x8xbf16>
    %cst_209 = arith.constant dense<0.000000e+00> : vector<17x17xf32>
    %333 = tpu.matmul %331, %332, %cst_209 {dimension_numbers = #tpu.dot_dimension_numbers<[1], [1], [0], [0], [0, 0, 1, 0], [], []>} : vector<17x8xbf16>, vector<17x8xbf16>, vector<17x17xf32> -> vector<17x17xf32>
    %cst_210 = arith.constant 0.353553385 : f32
    %334 = vector.broadcast %cst_210 : f32 to vector<17x17xf32>
    %335 = arith.mulf %333, %334 : vector<17x17xf32>
    %cst_211 = arith.constant dense<0xFF800000> : vector<17xf32>
    %336 = vector.multi_reduction <maximumf>, %335, %cst_211 [1] : vector<17x17xf32> to vector<17xf32>
    %337 = vector.shape_cast %336 : vector<17xf32> to vector<17x1xf32>
    %338 = vector.broadcast %337 : vector<17x1xf32> to vector<17x17xf32>
    %339 = arith.subf %335, %338 : vector<17x17xf32>
    %340 = math.exp %339 : vector<17x17xf32>
    %cst_212 = arith.constant dense<0.000000e+00> : vector<17xf32>
    %341 = vector.multi_reduction <add>, %340, %cst_212 [1] : vector<17x17xf32> to vector<17xf32>
    %342 = vector.shape_cast %341 : vector<17xf32> to vector<17x1xf32>
    %343 = tpu.reciprocal %342 {approx = true} : vector<17x1xf32> -> vector<17x1xf32>
    %344 = vector.broadcast %343 : vector<17x1xf32> to vector<17x17xf32>
    %345 = arith.mulf %340, %344 : vector<17x17xf32>
    %346 = arith.truncf %345 : vector<17x17xf32> to vector<17x17xbf16>
    %347 = arith.truncf %330 : vector<17x8xf32> to vector<17x8xbf16>
    %cst_213 = arith.constant dense<0.000000e+00> : vector<17x8xf32>
    %348 = tpu.matmul %346, %347, %cst_213 {dimension_numbers = #tpu.dot_dimension_numbers<[1], [0], [0], [1], [0, 0, 1, 1], [], []>} : vector<17x17xbf16>, vector<17x8xbf16>, vector<17x8xf32> -> vector<17x8xf32>
    %349 = arith.truncf %348 : vector<17x8xf32> to vector<17x8xbf16>
    %c4_214 = arith.constant 4 : index
    %c0_215 = arith.constant 0 : index
    %c0_216 = arith.constant 0 : index
    %350 = vector.load %arg17[%c4_214, %c0_215, %c0_216] : memref<8x8x32xbf16, #tpu.memory_space<vmem>>, vector<1x8x32xbf16>
    %351 = vector.shape_cast %350 : vector<1x8x32xbf16> to vector<8x32xbf16>
    %cst_217 = arith.constant dense<0.000000e+00> : vector<17x32xf32>
    %352 = tpu.matmul %349, %351, %cst_217 {dimension_numbers = #tpu.dot_dimension_numbers<[1], [0], [0], [1], [0, 0, 1, 1], [], []>} : vector<17x8xbf16>, vector<8x32xbf16>, vector<17x32xf32> -> vector<17x32xf32>
    %c5 = arith.constant 5 : index
    %c0_218 = arith.constant 0 : index
    %c0_219 = arith.constant 0 : index
    %353 = vector.load %arg11[%c5, %c0_218, %c0_219] : memref<8x32x8xbf16, #tpu.memory_space<vmem>>, vector<1x32x8xbf16>
    %354 = vector.shape_cast %353 : vector<1x32x8xbf16> to vector<32x8xbf16>
    %cst_220 = arith.constant dense<0.000000e+00> : vector<17x8xf32>
    %355 = tpu.matmul %309, %354, %cst_220 {dimension_numbers = #tpu.dot_dimension_numbers<[1], [0], [0], [1], [0, 0, 1, 1], [], []>} : vector<17x32xbf16>, vector<32x8xbf16>, vector<17x8xf32> -> vector<17x8xf32>
    %c5_221 = arith.constant 5 : index
    %c0_222 = arith.constant 0 : index
    %c0_223 = arith.constant 0 : index
    %356 = vector.load %arg12[%c5_221, %c0_222, %c0_223] : memref<8x1x8xf32, #tpu.memory_space<vmem>>, vector<1x1x8xf32>
    %357 = vector.shape_cast %356 : vector<1x1x8xf32> to vector<1x8xf32>
    %358 = vector.broadcast %357 : vector<1x8xf32> to vector<17x8xf32>
    %359 = arith.addf %355, %358 : vector<17x8xf32>
    %c5_224 = arith.constant 5 : index
    %c0_225 = arith.constant 0 : index
    %c0_226 = arith.constant 0 : index
    %360 = vector.load %arg13[%c5_224, %c0_225, %c0_226] : memref<8x32x8xbf16, #tpu.memory_space<vmem>>, vector<1x32x8xbf16>
    %361 = vector.shape_cast %360 : vector<1x32x8xbf16> to vector<32x8xbf16>
    %cst_227 = arith.constant dense<0.000000e+00> : vector<17x8xf32>
    %362 = tpu.matmul %309, %361, %cst_227 {dimension_numbers = #tpu.dot_dimension_numbers<[1], [0], [0], [1], [0, 0, 1, 1], [], []>} : vector<17x32xbf16>, vector<32x8xbf16>, vector<17x8xf32> -> vector<17x8xf32>
    %c5_228 = arith.constant 5 : index
    %c0_229 = arith.constant 0 : index
    %c0_230 = arith.constant 0 : index
    %363 = vector.load %arg14[%c5_228, %c0_229, %c0_230] : memref<8x1x8xf32, #tpu.memory_space<vmem>>, vector<1x1x8xf32>
    %364 = vector.shape_cast %363 : vector<1x1x8xf32> to vector<1x8xf32>
    %365 = vector.broadcast %364 : vector<1x8xf32> to vector<17x8xf32>
    %366 = arith.addf %362, %365 : vector<17x8xf32>
    %c5_231 = arith.constant 5 : index
    %c0_232 = arith.constant 0 : index
    %c0_233 = arith.constant 0 : index
    %367 = vector.load %arg15[%c5_231, %c0_232, %c0_233] : memref<8x32x8xbf16, #tpu.memory_space<vmem>>, vector<1x32x8xbf16>
    %368 = vector.shape_cast %367 : vector<1x32x8xbf16> to vector<32x8xbf16>
    %cst_234 = arith.constant dense<0.000000e+00> : vector<17x8xf32>
    %369 = tpu.matmul %309, %368, %cst_234 {dimension_numbers = #tpu.dot_dimension_numbers<[1], [0], [0], [1], [0, 0, 1, 1], [], []>} : vector<17x32xbf16>, vector<32x8xbf16>, vector<17x8xf32> -> vector<17x8xf32>
    %c5_235 = arith.constant 5 : index
    %c0_236 = arith.constant 0 : index
    %c0_237 = arith.constant 0 : index
    %370 = vector.load %arg16[%c5_235, %c0_236, %c0_237] : memref<8x1x8xf32, #tpu.memory_space<vmem>>, vector<1x1x8xf32>
    %371 = vector.shape_cast %370 : vector<1x1x8xf32> to vector<1x8xf32>
    %372 = vector.broadcast %371 : vector<1x8xf32> to vector<17x8xf32>
    %373 = arith.addf %369, %372 : vector<17x8xf32>
    %374 = arith.truncf %359 : vector<17x8xf32> to vector<17x8xbf16>
    %375 = arith.truncf %366 : vector<17x8xf32> to vector<17x8xbf16>
    %cst_238 = arith.constant dense<0.000000e+00> : vector<17x17xf32>
    %376 = tpu.matmul %374, %375, %cst_238 {dimension_numbers = #tpu.dot_dimension_numbers<[1], [1], [0], [0], [0, 0, 1, 0], [], []>} : vector<17x8xbf16>, vector<17x8xbf16>, vector<17x17xf32> -> vector<17x17xf32>
    %cst_239 = arith.constant 0.353553385 : f32
    %377 = vector.broadcast %cst_239 : f32 to vector<17x17xf32>
    %378 = arith.mulf %376, %377 : vector<17x17xf32>
    %cst_240 = arith.constant dense<0xFF800000> : vector<17xf32>
    %379 = vector.multi_reduction <maximumf>, %378, %cst_240 [1] : vector<17x17xf32> to vector<17xf32>
    %380 = vector.shape_cast %379 : vector<17xf32> to vector<17x1xf32>
    %381 = vector.broadcast %380 : vector<17x1xf32> to vector<17x17xf32>
    %382 = arith.subf %378, %381 : vector<17x17xf32>
    %383 = math.exp %382 : vector<17x17xf32>
    %cst_241 = arith.constant dense<0.000000e+00> : vector<17xf32>
    %384 = vector.multi_reduction <add>, %383, %cst_241 [1] : vector<17x17xf32> to vector<17xf32>
    %385 = vector.shape_cast %384 : vector<17xf32> to vector<17x1xf32>
    %386 = tpu.reciprocal %385 {approx = true} : vector<17x1xf32> -> vector<17x1xf32>
    %387 = vector.broadcast %386 : vector<17x1xf32> to vector<17x17xf32>
    %388 = arith.mulf %383, %387 : vector<17x17xf32>
    %389 = arith.truncf %388 : vector<17x17xf32> to vector<17x17xbf16>
    %390 = arith.truncf %373 : vector<17x8xf32> to vector<17x8xbf16>
    %cst_242 = arith.constant dense<0.000000e+00> : vector<17x8xf32>
    %391 = tpu.matmul %389, %390, %cst_242 {dimension_numbers = #tpu.dot_dimension_numbers<[1], [0], [0], [1], [0, 0, 1, 1], [], []>} : vector<17x17xbf16>, vector<17x8xbf16>, vector<17x8xf32> -> vector<17x8xf32>
    %392 = arith.truncf %391 : vector<17x8xf32> to vector<17x8xbf16>
    %c5_243 = arith.constant 5 : index
    %c0_244 = arith.constant 0 : index
    %c0_245 = arith.constant 0 : index
    %393 = vector.load %arg17[%c5_243, %c0_244, %c0_245] : memref<8x8x32xbf16, #tpu.memory_space<vmem>>, vector<1x8x32xbf16>
    %394 = vector.shape_cast %393 : vector<1x8x32xbf16> to vector<8x32xbf16>
    %cst_246 = arith.constant dense<0.000000e+00> : vector<17x32xf32>
    %395 = tpu.matmul %392, %394, %cst_246 {dimension_numbers = #tpu.dot_dimension_numbers<[1], [0], [0], [1], [0, 0, 1, 1], [], []>} : vector<17x8xbf16>, vector<8x32xbf16>, vector<17x32xf32> -> vector<17x32xf32>
    %396 = arith.addf %352, %395 : vector<17x32xf32>
    %c6 = arith.constant 6 : index
    %c0_247 = arith.constant 0 : index
    %c0_248 = arith.constant 0 : index
    %397 = vector.load %arg11[%c6, %c0_247, %c0_248] : memref<8x32x8xbf16, #tpu.memory_space<vmem>>, vector<1x32x8xbf16>
    %398 = vector.shape_cast %397 : vector<1x32x8xbf16> to vector<32x8xbf16>
    %cst_249 = arith.constant dense<0.000000e+00> : vector<17x8xf32>
    %399 = tpu.matmul %309, %398, %cst_249 {dimension_numbers = #tpu.dot_dimension_numbers<[1], [0], [0], [1], [0, 0, 1, 1], [], []>} : vector<17x32xbf16>, vector<32x8xbf16>, vector<17x8xf32> -> vector<17x8xf32>
    %c6_250 = arith.constant 6 : index
    %c0_251 = arith.constant 0 : index
    %c0_252 = arith.constant 0 : index
    %400 = vector.load %arg12[%c6_250, %c0_251, %c0_252] : memref<8x1x8xf32, #tpu.memory_space<vmem>>, vector<1x1x8xf32>
    %401 = vector.shape_cast %400 : vector<1x1x8xf32> to vector<1x8xf32>
    %402 = vector.broadcast %401 : vector<1x8xf32> to vector<17x8xf32>
    %403 = arith.addf %399, %402 : vector<17x8xf32>
    %c6_253 = arith.constant 6 : index
    %c0_254 = arith.constant 0 : index
    %c0_255 = arith.constant 0 : index
    %404 = vector.load %arg13[%c6_253, %c0_254, %c0_255] : memref<8x32x8xbf16, #tpu.memory_space<vmem>>, vector<1x32x8xbf16>
    %405 = vector.shape_cast %404 : vector<1x32x8xbf16> to vector<32x8xbf16>
    %cst_256 = arith.constant dense<0.000000e+00> : vector<17x8xf32>
    %406 = tpu.matmul %309, %405, %cst_256 {dimension_numbers = #tpu.dot_dimension_numbers<[1], [0], [0], [1], [0, 0, 1, 1], [], []>} : vector<17x32xbf16>, vector<32x8xbf16>, vector<17x8xf32> -> vector<17x8xf32>
    %c6_257 = arith.constant 6 : index
    %c0_258 = arith.constant 0 : index
    %c0_259 = arith.constant 0 : index
    %407 = vector.load %arg14[%c6_257, %c0_258, %c0_259] : memref<8x1x8xf32, #tpu.memory_space<vmem>>, vector<1x1x8xf32>
    %408 = vector.shape_cast %407 : vector<1x1x8xf32> to vector<1x8xf32>
    %409 = vector.broadcast %408 : vector<1x8xf32> to vector<17x8xf32>
    %410 = arith.addf %406, %409 : vector<17x8xf32>
    %c6_260 = arith.constant 6 : index
    %c0_261 = arith.constant 0 : index
    %c0_262 = arith.constant 0 : index
    %411 = vector.load %arg15[%c6_260, %c0_261, %c0_262] : memref<8x32x8xbf16, #tpu.memory_space<vmem>>, vector<1x32x8xbf16>
    %412 = vector.shape_cast %411 : vector<1x32x8xbf16> to vector<32x8xbf16>
    %cst_263 = arith.constant dense<0.000000e+00> : vector<17x8xf32>
    %413 = tpu.matmul %309, %412, %cst_263 {dimension_numbers = #tpu.dot_dimension_numbers<[1], [0], [0], [1], [0, 0, 1, 1], [], []>} : vector<17x32xbf16>, vector<32x8xbf16>, vector<17x8xf32> -> vector<17x8xf32>
    %c6_264 = arith.constant 6 : index
    %c0_265 = arith.constant 0 : index
    %c0_266 = arith.constant 0 : index
    %414 = vector.load %arg16[%c6_264, %c0_265, %c0_266] : memref<8x1x8xf32, #tpu.memory_space<vmem>>, vector<1x1x8xf32>
    %415 = vector.shape_cast %414 : vector<1x1x8xf32> to vector<1x8xf32>
    %416 = vector.broadcast %415 : vector<1x8xf32> to vector<17x8xf32>
    %417 = arith.addf %413, %416 : vector<17x8xf32>
    %418 = arith.truncf %403 : vector<17x8xf32> to vector<17x8xbf16>
    %419 = arith.truncf %410 : vector<17x8xf32> to vector<17x8xbf16>
    %cst_267 = arith.constant dense<0.000000e+00> : vector<17x17xf32>
    %420 = tpu.matmul %418, %419, %cst_267 {dimension_numbers = #tpu.dot_dimension_numbers<[1], [1], [0], [0], [0, 0, 1, 0], [], []>} : vector<17x8xbf16>, vector<17x8xbf16>, vector<17x17xf32> -> vector<17x17xf32>
    %cst_268 = arith.constant 0.353553385 : f32
    %421 = vector.broadcast %cst_268 : f32 to vector<17x17xf32>
    %422 = arith.mulf %420, %421 : vector<17x17xf32>
    %cst_269 = arith.constant dense<0xFF800000> : vector<17xf32>
    %423 = vector.multi_reduction <maximumf>, %422, %cst_269 [1] : vector<17x17xf32> to vector<17xf32>
    %424 = vector.shape_cast %423 : vector<17xf32> to vector<17x1xf32>
    %425 = vector.broadcast %424 : vector<17x1xf32> to vector<17x17xf32>
    %426 = arith.subf %422, %425 : vector<17x17xf32>
    %427 = math.exp %426 : vector<17x17xf32>
    %cst_270 = arith.constant dense<0.000000e+00> : vector<17xf32>
    %428 = vector.multi_reduction <add>, %427, %cst_270 [1] : vector<17x17xf32> to vector<17xf32>
    %429 = vector.shape_cast %428 : vector<17xf32> to vector<17x1xf32>
    %430 = tpu.reciprocal %429 {approx = true} : vector<17x1xf32> -> vector<17x1xf32>
    %431 = vector.broadcast %430 : vector<17x1xf32> to vector<17x17xf32>
    %432 = arith.mulf %427, %431 : vector<17x17xf32>
    %433 = arith.truncf %432 : vector<17x17xf32> to vector<17x17xbf16>
    %434 = arith.truncf %417 : vector<17x8xf32> to vector<17x8xbf16>
    %cst_271 = arith.constant dense<0.000000e+00> : vector<17x8xf32>
    %435 = tpu.matmul %433, %434, %cst_271 {dimension_numbers = #tpu.dot_dimension_numbers<[1], [0], [0], [1], [0, 0, 1, 1], [], []>} : vector<17x17xbf16>, vector<17x8xbf16>, vector<17x8xf32> -> vector<17x8xf32>
    %436 = arith.truncf %435 : vector<17x8xf32> to vector<17x8xbf16>
    %c6_272 = arith.constant 6 : index
    %c0_273 = arith.constant 0 : index
    %c0_274 = arith.constant 0 : index
    %437 = vector.load %arg17[%c6_272, %c0_273, %c0_274] : memref<8x8x32xbf16, #tpu.memory_space<vmem>>, vector<1x8x32xbf16>
    %438 = vector.shape_cast %437 : vector<1x8x32xbf16> to vector<8x32xbf16>
    %cst_275 = arith.constant dense<0.000000e+00> : vector<17x32xf32>
    %439 = tpu.matmul %436, %438, %cst_275 {dimension_numbers = #tpu.dot_dimension_numbers<[1], [0], [0], [1], [0, 0, 1, 1], [], []>} : vector<17x8xbf16>, vector<8x32xbf16>, vector<17x32xf32> -> vector<17x32xf32>
    %440 = arith.addf %396, %439 : vector<17x32xf32>
    %c7 = arith.constant 7 : index
    %c0_276 = arith.constant 0 : index
    %c0_277 = arith.constant 0 : index
    %441 = vector.load %arg11[%c7, %c0_276, %c0_277] : memref<8x32x8xbf16, #tpu.memory_space<vmem>>, vector<1x32x8xbf16>
    %442 = vector.shape_cast %441 : vector<1x32x8xbf16> to vector<32x8xbf16>
    %cst_278 = arith.constant dense<0.000000e+00> : vector<17x8xf32>
    %443 = tpu.matmul %309, %442, %cst_278 {dimension_numbers = #tpu.dot_dimension_numbers<[1], [0], [0], [1], [0, 0, 1, 1], [], []>} : vector<17x32xbf16>, vector<32x8xbf16>, vector<17x8xf32> -> vector<17x8xf32>
    %c7_279 = arith.constant 7 : index
    %c0_280 = arith.constant 0 : index
    %c0_281 = arith.constant 0 : index
    %444 = vector.load %arg12[%c7_279, %c0_280, %c0_281] : memref<8x1x8xf32, #tpu.memory_space<vmem>>, vector<1x1x8xf32>
    %445 = vector.shape_cast %444 : vector<1x1x8xf32> to vector<1x8xf32>
    %446 = vector.broadcast %445 : vector<1x8xf32> to vector<17x8xf32>
    %447 = arith.addf %443, %446 : vector<17x8xf32>
    %c7_282 = arith.constant 7 : index
    %c0_283 = arith.constant 0 : index
    %c0_284 = arith.constant 0 : index
    %448 = vector.load %arg13[%c7_282, %c0_283, %c0_284] : memref<8x32x8xbf16, #tpu.memory_space<vmem>>, vector<1x32x8xbf16>
    %449 = vector.shape_cast %448 : vector<1x32x8xbf16> to vector<32x8xbf16>
    %cst_285 = arith.constant dense<0.000000e+00> : vector<17x8xf32>
    %450 = tpu.matmul %309, %449, %cst_285 {dimension_numbers = #tpu.dot_dimension_numbers<[1], [0], [0], [1], [0, 0, 1, 1], [], []>} : vector<17x32xbf16>, vector<32x8xbf16>, vector<17x8xf32> -> vector<17x8xf32>
    %c7_286 = arith.constant 7 : index
    %c0_287 = arith.constant 0 : index
    %c0_288 = arith.constant 0 : index
    %451 = vector.load %arg14[%c7_286, %c0_287, %c0_288] : memref<8x1x8xf32, #tpu.memory_space<vmem>>, vector<1x1x8xf32>
    %452 = vector.shape_cast %451 : vector<1x1x8xf32> to vector<1x8xf32>
    %453 = vector.broadcast %452 : vector<1x8xf32> to vector<17x8xf32>
    %454 = arith.addf %450, %453 : vector<17x8xf32>
    %c7_289 = arith.constant 7 : index
    %c0_290 = arith.constant 0 : index
    %c0_291 = arith.constant 0 : index
    %455 = vector.load %arg15[%c7_289, %c0_290, %c0_291] : memref<8x32x8xbf16, #tpu.memory_space<vmem>>, vector<1x32x8xbf16>
    %456 = vector.shape_cast %455 : vector<1x32x8xbf16> to vector<32x8xbf16>
    %cst_292 = arith.constant dense<0.000000e+00> : vector<17x8xf32>
    %457 = tpu.matmul %309, %456, %cst_292 {dimension_numbers = #tpu.dot_dimension_numbers<[1], [0], [0], [1], [0, 0, 1, 1], [], []>} : vector<17x32xbf16>, vector<32x8xbf16>, vector<17x8xf32> -> vector<17x8xf32>
    %c7_293 = arith.constant 7 : index
    %c0_294 = arith.constant 0 : index
    %c0_295 = arith.constant 0 : index
    %458 = vector.load %arg16[%c7_293, %c0_294, %c0_295] : memref<8x1x8xf32, #tpu.memory_space<vmem>>, vector<1x1x8xf32>
    %459 = vector.shape_cast %458 : vector<1x1x8xf32> to vector<1x8xf32>
    %460 = vector.broadcast %459 : vector<1x8xf32> to vector<17x8xf32>
    %461 = arith.addf %457, %460 : vector<17x8xf32>
    %462 = arith.truncf %447 : vector<17x8xf32> to vector<17x8xbf16>
    %463 = arith.truncf %454 : vector<17x8xf32> to vector<17x8xbf16>
    %cst_296 = arith.constant dense<0.000000e+00> : vector<17x17xf32>
    %464 = tpu.matmul %462, %463, %cst_296 {dimension_numbers = #tpu.dot_dimension_numbers<[1], [1], [0], [0], [0, 0, 1, 0], [], []>} : vector<17x8xbf16>, vector<17x8xbf16>, vector<17x17xf32> -> vector<17x17xf32>
    %cst_297 = arith.constant 0.353553385 : f32
    %465 = vector.broadcast %cst_297 : f32 to vector<17x17xf32>
    %466 = arith.mulf %464, %465 : vector<17x17xf32>
    %cst_298 = arith.constant dense<0xFF800000> : vector<17xf32>
    %467 = vector.multi_reduction <maximumf>, %466, %cst_298 [1] : vector<17x17xf32> to vector<17xf32>
    %468 = vector.shape_cast %467 : vector<17xf32> to vector<17x1xf32>
    %469 = vector.broadcast %468 : vector<17x1xf32> to vector<17x17xf32>
    %470 = arith.subf %466, %469 : vector<17x17xf32>
    %471 = math.exp %470 : vector<17x17xf32>
    %cst_299 = arith.constant dense<0.000000e+00> : vector<17xf32>
    %472 = vector.multi_reduction <add>, %471, %cst_299 [1] : vector<17x17xf32> to vector<17xf32>
    %473 = vector.shape_cast %472 : vector<17xf32> to vector<17x1xf32>
    %474 = tpu.reciprocal %473 {approx = true} : vector<17x1xf32> -> vector<17x1xf32>
    %475 = vector.broadcast %474 : vector<17x1xf32> to vector<17x17xf32>
    %476 = arith.mulf %471, %475 : vector<17x17xf32>
    %477 = arith.truncf %476 : vector<17x17xf32> to vector<17x17xbf16>
    %478 = arith.truncf %461 : vector<17x8xf32> to vector<17x8xbf16>
    %cst_300 = arith.constant dense<0.000000e+00> : vector<17x8xf32>
    %479 = tpu.matmul %477, %478, %cst_300 {dimension_numbers = #tpu.dot_dimension_numbers<[1], [0], [0], [1], [0, 0, 1, 1], [], []>} : vector<17x17xbf16>, vector<17x8xbf16>, vector<17x8xf32> -> vector<17x8xf32>
    %480 = arith.truncf %479 : vector<17x8xf32> to vector<17x8xbf16>
    %c7_301 = arith.constant 7 : index
    %c0_302 = arith.constant 0 : index
    %c0_303 = arith.constant 0 : index
    %481 = vector.load %arg17[%c7_301, %c0_302, %c0_303] : memref<8x8x32xbf16, #tpu.memory_space<vmem>>, vector<1x8x32xbf16>
    %482 = vector.shape_cast %481 : vector<1x8x32xbf16> to vector<8x32xbf16>
    %cst_304 = arith.constant dense<0.000000e+00> : vector<17x32xf32>
    %483 = tpu.matmul %480, %482, %cst_304 {dimension_numbers = #tpu.dot_dimension_numbers<[1], [0], [0], [1], [0, 0, 1, 1], [], []>} : vector<17x8xbf16>, vector<8x32xbf16>, vector<17x32xf32> -> vector<17x32xf32>
    %484 = arith.addf %440, %483 : vector<17x32xf32>
    %485 = arith.addf %282, %484 : vector<17x32xf32>
    %c1_305 = arith.constant 1 : index
    %c0_306 = arith.constant 0 : index
    %c0_307 = arith.constant 0 : index
    %486 = vector.load %arg18[%c1_305, %c0_306, %c0_307] : memref<2x1x32xf32, #tpu.memory_space<vmem>>, vector<1x1x32xf32>
    %487 = vector.shape_cast %486 : vector<1x1x32xf32> to vector<1x32xf32>
    %488 = vector.broadcast %487 : vector<1x32xf32> to vector<17x32xf32>
    %489 = arith.addf %485, %488 : vector<17x32xf32>
    %c1_308 = arith.constant 1 : index
    %c0_309 = arith.constant 0 : index
    %c0_310 = arith.constant 0 : index
    %490 = vector.load %arg19[%c1_308, %c0_309, %c0_310] : memref<2x1x32xf32, #tpu.memory_space<vmem>>, vector<1x1x32xf32>
    %491 = vector.shape_cast %490 : vector<1x1x32xf32> to vector<1x32xf32>
    %c1_311 = arith.constant 1 : index
    %c0_312 = arith.constant 0 : index
    %c0_313 = arith.constant 0 : index
    %492 = vector.load %arg20[%c1_311, %c0_312, %c0_313] : memref<2x1x32xf32, #tpu.memory_space<vmem>>, vector<1x1x32xf32>
    %493 = vector.shape_cast %492 : vector<1x1x32xf32> to vector<1x32xf32>
    %cst_314 = arith.constant dense<0.000000e+00> : vector<17xf32>
    %494 = vector.multi_reduction <add>, %489, %cst_314 [1] : vector<17x32xf32> to vector<17xf32>
    %495 = vector.shape_cast %494 : vector<17xf32> to vector<17x1xf32>
    %cst_315 = arith.constant 3.200000e+01 : f32
    %496 = vector.broadcast %cst_315 : f32 to vector<17x1xf32>
    %497 = arith.divf %495, %496 : vector<17x1xf32>
    %498 = vector.broadcast %497 : vector<17x1xf32> to vector<17x32xf32>
    %499 = arith.subf %489, %498 : vector<17x32xf32>
    %500 = arith.mulf %499, %499 : vector<17x32xf32>
    %cst_316 = arith.constant dense<0.000000e+00> : vector<17xf32>
    %501 = vector.multi_reduction <add>, %500, %cst_316 [1] : vector<17x32xf32> to vector<17xf32>
    %502 = vector.shape_cast %501 : vector<17xf32> to vector<17x1xf32>
    %cst_317 = arith.constant 3.200000e+01 : f32
    %503 = vector.broadcast %cst_317 : f32 to vector<17x1xf32>
    %504 = arith.divf %502, %503 : vector<17x1xf32>
    %505 = vector.broadcast %497 : vector<17x1xf32> to vector<17x32xf32>
    %506 = arith.subf %489, %505 : vector<17x32xf32>
    %cst_318 = arith.constant 9.99999974E-6 : f32
    %507 = vector.broadcast %cst_318 : f32 to vector<17x1xf32>
    %508 = arith.addf %504, %507 : vector<17x1xf32>
    %509 = math.rsqrt %508 : vector<17x1xf32>
    %510 = vector.broadcast %509 : vector<17x1xf32> to vector<17x32xf32>
    %511 = arith.mulf %506, %510 : vector<17x32xf32>
    %512 = vector.broadcast %491 : vector<1x32xf32> to vector<17x32xf32>
    %513 = arith.mulf %511, %512 : vector<17x32xf32>
    %514 = vector.broadcast %493 : vector<1x32xf32> to vector<17x32xf32>
    %515 = arith.addf %513, %514 : vector<17x32xf32>
    %516 = arith.truncf %515 : vector<17x32xf32> to vector<17x32xbf16>
    %c1_319 = arith.constant 1 : index
    %c0_320 = arith.constant 0 : index
    %c0_321 = arith.constant 0 : index
    %517 = vector.load %arg21[%c1_319, %c0_320, %c0_321] : memref<2x32x128xbf16, #tpu.memory_space<vmem>>, vector<1x32x128xbf16>
    %518 = vector.shape_cast %517 : vector<1x32x128xbf16> to vector<32x128xbf16>
    %cst_322 = arith.constant dense<0.000000e+00> : vector<17x128xf32>
    %519 = tpu.matmul %516, %518, %cst_322 {dimension_numbers = #tpu.dot_dimension_numbers<[1], [0], [0], [1], [0, 0, 1, 1], [], []>} : vector<17x32xbf16>, vector<32x128xbf16>, vector<17x128xf32> -> vector<17x128xf32>
    %c1_323 = arith.constant 1 : index
    %c0_324 = arith.constant 0 : index
    %c0_325 = arith.constant 0 : index
    %520 = vector.load %arg22[%c1_323, %c0_324, %c0_325] : memref<2x1x128xf32, #tpu.memory_space<vmem>>, vector<1x1x128xf32>
    %521 = vector.shape_cast %520 : vector<1x1x128xf32> to vector<1x128xf32>
    %522 = vector.broadcast %521 : vector<1x128xf32> to vector<17x128xf32>
    %523 = arith.addf %519, %522 : vector<17x128xf32>
    %cst_326 = arith.constant 5.000000e-01 : f32
    %524 = vector.broadcast %cst_326 : f32 to vector<17x128xf32>
    %525 = arith.mulf %524, %523 : vector<17x128xf32>
    %cst_327 = arith.constant 4.471500e-02 : f32
    %526 = vector.broadcast %cst_327 : f32 to vector<17x128xf32>
    %527 = arith.mulf %526, %523 : vector<17x128xf32>
    %528 = arith.mulf %527, %523 : vector<17x128xf32>
    %529 = arith.mulf %528, %523 : vector<17x128xf32>
    %530 = arith.addf %523, %529 : vector<17x128xf32>
    %cst_328 = arith.constant 0.797884583 : f32
    %531 = vector.broadcast %cst_328 : f32 to vector<17x128xf32>
    %532 = arith.mulf %531, %530 : vector<17x128xf32>
    %533 = math.tanh %532 : vector<17x128xf32>
    %cst_329 = arith.constant 1.000000e+00 : f32
    %534 = vector.broadcast %cst_329 : f32 to vector<17x128xf32>
    %535 = arith.addf %534, %533 : vector<17x128xf32>
    %536 = arith.mulf %525, %535 : vector<17x128xf32>
    %537 = arith.truncf %536 : vector<17x128xf32> to vector<17x128xbf16>
    %c1_330 = arith.constant 1 : index
    %c0_331 = arith.constant 0 : index
    %c0_332 = arith.constant 0 : index
    %538 = vector.load %arg23[%c1_330, %c0_331, %c0_332] : memref<2x128x32xbf16, #tpu.memory_space<vmem>>, vector<1x128x32xbf16>
    %539 = vector.shape_cast %538 : vector<1x128x32xbf16> to vector<128x32xbf16>
    %cst_333 = arith.constant dense<0.000000e+00> : vector<17x32xf32>
    %540 = tpu.matmul %537, %539, %cst_333 {dimension_numbers = #tpu.dot_dimension_numbers<[1], [0], [0], [1], [0, 0, 1, 1], [], []>} : vector<17x128xbf16>, vector<128x32xbf16>, vector<17x32xf32> -> vector<17x32xf32>
    %541 = arith.addf %489, %540 : vector<17x32xf32>
    %c1_334 = arith.constant 1 : index
    %c0_335 = arith.constant 0 : index
    %c0_336 = arith.constant 0 : index
    %542 = vector.load %arg24[%c1_334, %c0_335, %c0_336] : memref<2x1x32xf32, #tpu.memory_space<vmem>>, vector<1x1x32xf32>
    %543 = vector.shape_cast %542 : vector<1x1x32xf32> to vector<1x32xf32>
    %544 = vector.broadcast %543 : vector<1x32xf32> to vector<17x32xf32>
    %545 = arith.addf %541, %544 : vector<17x32xf32>
    %546 = vector.extract_strided_slice %545 {offsets = [0, 0], sizes = [1, 32], strides = [1, 1]} : vector<17x32xf32> to vector<1x32xf32>
    %c0_337 = arith.constant 0 : index
    %c0_338 = arith.constant 0 : index
    %547 = vector.load %arg25[%c0_337, %c0_338] : memref<1x32xf32, #tpu.memory_space<vmem>>, vector<1x32xf32>
    %c0_339 = arith.constant 0 : index
    %c0_340 = arith.constant 0 : index
    %548 = vector.load %arg26[%c0_339, %c0_340] : memref<1x32xf32, #tpu.memory_space<vmem>>, vector<1x32xf32>
    %cst_341 = arith.constant dense<0.000000e+00> : vector<1xf32>
    %549 = vector.multi_reduction <add>, %546, %cst_341 [1] : vector<1x32xf32> to vector<1xf32>
    %550 = vector.shape_cast %549 : vector<1xf32> to vector<1x1xf32>
    %cst_342 = arith.constant 3.200000e+01 : f32
    %551 = vector.broadcast %cst_342 : f32 to vector<1x1xf32>
    %552 = arith.divf %550, %551 : vector<1x1xf32>
    %553 = vector.broadcast %552 : vector<1x1xf32> to vector<1x32xf32>
    %554 = arith.subf %546, %553 : vector<1x32xf32>
    %555 = arith.mulf %554, %554 : vector<1x32xf32>
    %cst_343 = arith.constant dense<0.000000e+00> : vector<1xf32>
    %556 = vector.multi_reduction <add>, %555, %cst_343 [1] : vector<1x32xf32> to vector<1xf32>
    %557 = vector.shape_cast %556 : vector<1xf32> to vector<1x1xf32>
    %cst_344 = arith.constant 3.200000e+01 : f32
    %558 = vector.broadcast %cst_344 : f32 to vector<1x1xf32>
    %559 = arith.divf %557, %558 : vector<1x1xf32>
    %560 = vector.broadcast %552 : vector<1x1xf32> to vector<1x32xf32>
    %561 = arith.subf %546, %560 : vector<1x32xf32>
    %cst_345 = arith.constant 9.99999974E-6 : f32
    %562 = vector.broadcast %cst_345 : f32 to vector<1x1xf32>
    %563 = arith.addf %559, %562 : vector<1x1xf32>
    %564 = math.rsqrt %563 : vector<1x1xf32>
    %565 = vector.broadcast %564 : vector<1x1xf32> to vector<1x32xf32>
    %566 = arith.mulf %561, %565 : vector<1x32xf32>
    %567 = arith.mulf %566, %547 : vector<1x32xf32>
    %568 = arith.addf %567, %548 : vector<1x32xf32>
    %569 = arith.truncf %568 : vector<1x32xf32> to vector<1x32xbf16>
    %c0_346 = arith.constant 0 : index
    %c0_347 = arith.constant 0 : index
    %570 = vector.load %arg27[%c0_346, %c0_347] : memref<32x5xbf16, #tpu.memory_space<vmem>>, vector<32x5xbf16>
    %cst_348 = arith.constant dense<0.000000e+00> : vector<1x5xf32>
    %571 = tpu.matmul %569, %570, %cst_348 {dimension_numbers = #tpu.dot_dimension_numbers<[1], [0], [0], [1], [0, 0, 1, 1], [], []>} : vector<1x32xbf16>, vector<32x5xbf16>, vector<1x5xf32> -> vector<1x5xf32>
    %c0_349 = arith.constant 0 : index
    %c0_350 = arith.constant 0 : index
    %572 = vector.load %arg28[%c0_349, %c0_350] : memref<1x5xf32, #tpu.memory_space<vmem>>, vector<1x5xf32>
    %573 = arith.addf %571, %572 : vector<1x5xf32>
    %c0_351 = arith.constant 0 : index
    %c0_352 = arith.constant 0 : index
    %c0_353 = arith.constant 0 : index
    %574 = vector.load %arg29[%c0_351, %c0_352, %c0_353] : memref<1x1x5xf32, #tpu.memory_space<vmem>>, vector<1x1x5xf32>
    %575 = vector.shape_cast %574 : vector<1x1x5xf32> to vector<1x5xf32>
    %576 = vector.shape_cast %573 : vector<1x5xf32> to vector<1x1x5xf32>
    tpu.vector_store %arg29[%c0_351, %c0_352, %c0_353], %576 {strides = array<i32>} : memref<1x1x5xf32, #tpu.memory_space<vmem>>, vector<1x1x5xf32>,
    return
  }
  func.func @transform_0(%arg0: i32) -> (i32, i32, i32) {
    %c0_i32 = arith.constant 0 : i32
    %c0_i32_0 = arith.constant 0 : i32
    %c0_i32_1 = arith.constant 0 : i32
    return %arg0, %c0_i32, %c0_i32_0 : i32, i32, i32
  }
  func.func @transform_1(%arg0: i32) -> (i32, i32, i32) {
    %c0_i32 = arith.constant 0 : i32
    %c0_i32_0 = arith.constant 0 : i32
    %c0_i32_1 = arith.constant 0 : i32
    return %arg0, %c0_i32, %c0_i32_0 : i32, i32, i32
  }
  func.func @transform_2(%arg0: i32) -> (i32, i32) {
    %c0_i32 = arith.constant 0 : i32
    %c0_i32_0 = arith.constant 0 : i32
    %c0_i32_1 = arith.constant 0 : i32
    return %c0_i32, %c0_i32_0 : i32, i32
  }
  func.func @transform_3(%arg0: i32) -> (i32, i32) {
    %c0_i32 = arith.constant 0 : i32
    %c0_i32_0 = arith.constant 0 : i32
    %c0_i32_1 = arith.constant 0 : i32
    return %c0_i32, %c0_i32_0 : i32, i32
  }
  func.func @transform_4(%arg0: i32) -> (i32, i32) {
    %c0_i32 = arith.constant 0 : i32
    %c0_i32_0 = arith.constant 0 : i32
    %c0_i32_1 = arith.constant 0 : i32
    return %c0_i32, %c0_i32_0 : i32, i32
  }
  func.func @transform_5(%arg0: i32) -> (i32, i32) {
    %c0_i32 = arith.constant 0 : i32
    %c0_i32_0 = arith.constant 0 : i32
    %c0_i32_1 = arith.constant 0 : i32
    return %c0_i32, %c0_i32_0 : i32, i32
  }
  func.func @transform_6(%arg0: i32) -> (i32, i32) {
    %c0_i32 = arith.constant 0 : i32
    %c0_i32_0 = arith.constant 0 : i32
    %c0_i32_1 = arith.constant 0 : i32
    return %c0_i32, %c0_i32_0 : i32, i32
  }
  func.func @transform_7(%arg0: i32) -> (i32, i32) {
    %c0_i32 = arith.constant 0 : i32
    %c0_i32_0 = arith.constant 0 : i32
    %c0_i32_1 = arith.constant 0 : i32
    return %c0_i32, %c0_i32_0 : i32, i32
  }
  func.func @transform_8(%arg0: i32) -> (i32, i32, i32) {
    %c0_i32 = arith.constant 0 : i32
    %c0_i32_0 = arith.constant 0 : i32
    %c0_i32_1 = arith.constant 0 : i32
    %c0_i32_2 = arith.constant 0 : i32
    return %c0_i32, %c0_i32_0, %c0_i32_1 : i32, i32, i32
  }
  func.func @transform_9(%arg0: i32) -> (i32, i32, i32) {
    %c0_i32 = arith.constant 0 : i32
    %c0_i32_0 = arith.constant 0 : i32
    %c0_i32_1 = arith.constant 0 : i32
    %c0_i32_2 = arith.constant 0 : i32
    return %c0_i32, %c0_i32_0, %c0_i32_1 : i32, i32, i32
  }
  func.func @transform_10(%arg0: i32) -> (i32, i32, i32) {
    %c0_i32 = arith.constant 0 : i32
    %c0_i32_0 = arith.constant 0 : i32
    %c0_i32_1 = arith.constant 0 : i32
    %c0_i32_2 = arith.constant 0 : i32
    return %c0_i32, %c0_i32_0, %c0_i32_1 : i32, i32, i32
  }
  func.func @transform_11(%arg0: i32) -> (i32, i32, i32) {
    %c0_i32 = arith.constant 0 : i32
    %c0_i32_0 = arith.constant 0 : i32
    %c0_i32_1 = arith.constant 0 : i32
    %c0_i32_2 = arith.constant 0 : i32
    return %c0_i32, %c0_i32_0, %c0_i32_1 : i32, i32, i32
  }
  func.func @transform_12(%arg0: i32) -> (i32, i32, i32) {
    %c0_i32 = arith.constant 0 : i32
    %c0_i32_0 = arith.constant 0 : i32
    %c0_i32_1 = arith.constant 0 : i32
    %c0_i32_2 = arith.constant 0 : i32
    return %c0_i32, %c0_i32_0, %c0_i32_1 : i32, i32, i32
  }
  func.func @transform_13(%arg0: i32) -> (i32, i32, i32) {
    %c0_i32 = arith.constant 0 : i32
    %c0_i32_0 = arith.constant 0 : i32
    %c0_i32_1 = arith.constant 0 : i32
    %c0_i32_2 = arith.constant 0 : i32
    return %c0_i32, %c0_i32_0, %c0_i32_1 : i32, i32, i32
  }
  func.func @transform_14(%arg0: i32) -> (i32, i32, i32) {
    %c0_i32 = arith.constant 0 : i32
    %c0_i32_0 = arith.constant 0 : i32
    %c0_i32_1 = arith.constant 0 : i32
    %c0_i32_2 = arith.constant 0 : i32
    return %c0_i32, %c0_i32_0, %c0_i32_1 : i32, i32, i32
  }
  func.func @transform_15(%arg0: i32) -> (i32, i32, i32) {
    %c0_i32 = arith.constant 0 : i32
    %c0_i32_0 = arith.constant 0 : i32
    %c0_i32_1 = arith.constant 0 : i32
    %c0_i32_2 = arith.constant 0 : i32
    return %c0_i32, %c0_i32_0, %c0_i32_1 : i32, i32, i32
  }
  func.func @transform_16(%arg0: i32) -> (i32, i32, i32) {
    %c0_i32 = arith.constant 0 : i32
    %c0_i32_0 = arith.constant 0 : i32
    %c0_i32_1 = arith.constant 0 : i32
    %c0_i32_2 = arith.constant 0 : i32
    return %c0_i32, %c0_i32_0, %c0_i32_1 : i32, i32, i32
  }
  func.func @transform_17(%arg0: i32) -> (i32, i32, i32) {
    %c0_i32 = arith.constant 0 : i32
    %c0_i32_0 = arith.constant 0 : i32
    %c0_i32_1 = arith.constant 0 : i32
    %c0_i32_2 = arith.constant 0 : i32
    return %c0_i32, %c0_i32_0, %c0_i32_1 : i32, i32, i32
  }
  func.func @transform_18(%arg0: i32) -> (i32, i32, i32) {
    %c0_i32 = arith.constant 0 : i32
    %c0_i32_0 = arith.constant 0 : i32
    %c0_i32_1 = arith.constant 0 : i32
    %c0_i32_2 = arith.constant 0 : i32
    return %c0_i32, %c0_i32_0, %c0_i32_1 : i32, i32, i32
  }
  func.func @transform_19(%arg0: i32) -> (i32, i32, i32) {
    %c0_i32 = arith.constant 0 : i32
    %c0_i32_0 = arith.constant 0 : i32
    %c0_i32_1 = arith.constant 0 : i32
    %c0_i32_2 = arith.constant 0 : i32
    return %c0_i32, %c0_i32_0, %c0_i32_1 : i32, i32, i32
  }
  func.func @transform_20(%arg0: i32) -> (i32, i32, i32) {
    %c0_i32 = arith.constant 0 : i32
    %c0_i32_0 = arith.constant 0 : i32
    %c0_i32_1 = arith.constant 0 : i32
    %c0_i32_2 = arith.constant 0 : i32
    return %c0_i32, %c0_i32_0, %c0_i32_1 : i32, i32, i32
  }
  func.func @transform_21(%arg0: i32) -> (i32, i32, i32) {
    %c0_i32 = arith.constant 0 : i32
    %c0_i32_0 = arith.constant 0 : i32
    %c0_i32_1 = arith.constant 0 : i32
    %c0_i32_2 = arith.constant 0 : i32
    return %c0_i32, %c0_i32_0, %c0_i32_1 : i32, i32, i32
  }
  func.func @transform_22(%arg0: i32) -> (i32, i32, i32) {
    %c0_i32 = arith.constant 0 : i32
    %c0_i32_0 = arith.constant 0 : i32
    %c0_i32_1 = arith.constant 0 : i32
    %c0_i32_2 = arith.constant 0 : i32
    return %c0_i32, %c0_i32_0, %c0_i32_1 : i32, i32, i32
  }
  func.func @transform_23(%arg0: i32) -> (i32, i32, i32) {
    %c0_i32 = arith.constant 0 : i32
    %c0_i32_0 = arith.constant 0 : i32
    %c0_i32_1 = arith.constant 0 : i32
    %c0_i32_2 = arith.constant 0 : i32
    return %c0_i32, %c0_i32_0, %c0_i32_1 : i32, i32, i32
  }
  func.func @transform_24(%arg0: i32) -> (i32, i32) {
    %c0_i32 = arith.constant 0 : i32
    %c0_i32_0 = arith.constant 0 : i32
    %c0_i32_1 = arith.constant 0 : i32
    return %c0_i32, %c0_i32_0 : i32, i32
  }
  func.func @transform_25(%arg0: i32) -> (i32, i32) {
    %c0_i32 = arith.constant 0 : i32
    %c0_i32_0 = arith.constant 0 : i32
    %c0_i32_1 = arith.constant 0 : i32
    return %c0_i32, %c0_i32_0 : i32, i32
  }
  func.func @transform_26(%arg0: i32) -> (i32, i32) {
    %c0_i32 = arith.constant 0 : i32
    %c0_i32_0 = arith.constant 0 : i32
    %c0_i32_1 = arith.constant 0 : i32
    return %c0_i32, %c0_i32_0 : i32, i32
  }
  func.func @transform_27(%arg0: i32) -> (i32, i32) {
    %c0_i32 = arith.constant 0 : i32
    %c0_i32_0 = arith.constant 0 : i32
    %c0_i32_1 = arith.constant 0 : i32
    return %c0_i32, %c0_i32_0 : i32, i32
  }
  func.func @transform_28(%arg0: i32) -> (i32, i32, i32) {
    %c0_i32 = arith.constant 0 : i32
    %c0_i32_0 = arith.constant 0 : i32
    %c0_i32_1 = arith.constant 0 : i32
    return %arg0, %c0_i32, %c0_i32_0 : i32, i32, i32
  }
}

</mosaic_0001>

<bundles_post_ra>
// kernel: tpu_custom_call.1
= control target key start
LH: loop header
LB: loop body
LE: loop exit
PB: predicated region body
PF: predicated region fallthrough
CT: control target
= control target key end

     0   :  { %s7903_s0 = inlined_call_operand.vmem [shape: f32[2,8,32], index: 0, kind: input, shape index: {}]   ;;  %s7904_s1 = inlined_call_operand.vmem [shape: f32[2,8,32], index: 1, kind: input, shape index: {}]   ;;  %s7905_s2 = inlined_call_operand.vmem [shape: bf16[32,32], index: 2, kind: input, shape index: {}]   ;;  %s7906_s3 = inlined_call_operand.vmem [shape: f32[1,32], index: 3, kind: input, shape index: {}]   ;;  %s7907_s4 = inlined_call_operand.vmem [shape: bf16[32,32], index: 4, kind: input, shape index: {}]   ;;  %s7908_s5 = inlined_call_operand.vmem [shape: f32[1,32], index: 5, kind: input, shape index: {}]   ;;  %s7909_s6 = inlined_call_operand.vmem [shape: f32[1,32], index: 6, kind: input, shape index: {}]   ;;  %s7910_s7 = inlined_call_operand.vmem [shape: f32[17,32], index: 7, kind: input, shape index: {}]   ;;  %s7911_s8 = inlined_call_operand.vmem [shape: f32[2,1,32], index: 8, kind: input, shape index: {}]   ;;  %s7912_s9 = inlined_call_operand.vmem [shape: f32[2,1,32], index: 9, kind: input, shape index: {}]   ;;  %s7913_s10 = inlined_call_operand.vmem [shape: bf16[8,32,8], index: 10, kind: input, shape index: {}]   ;;  %s7914_s11 = inlined_call_operand.vmem [shape: f32[8,1,8], index: 11, kind: input, shape index: {}]   ;;  %s7915_s12 = inlined_call_operand.vmem [shape: bf16[8,32,8], index: 12, kind: input, shape index: {}]   ;;  %s7916_s13 = inlined_call_operand.vmem [shape: f32[8,1,8], index: 13, kind: input, shape index: {}]   ;;  %s7917_s14 = inlined_call_operand.vmem [shape: bf16[8,32,8], index: 14, kind: input, shape index: {}]   ;;  %s7918_s15 = inlined_call_operand.vmem [shape: f32[8,1,8], index: 15, kind: input, shape index: {}]   ;;  %s7919_s16 = inlined_call_operand.vmem [shape: bf16[8,8,32], index: 16, kind: input, shape index: {}]   ;;  %s7920_s17 = inlined_call_operand.vmem [shape: f32[2,1,32], index: 17, kind: input, shape index: {}]   ;;  %s7921_s18 = inlined_call_operand.vmem [shape: f32[2,1,32], index: 18, kind: input, shape index: {}]   ;;  %s7922_s19 = inlined_call_operand.vmem [shape: f32[2,1,32], index: 19, kind: input, shape index: {}]   ;;  %s7923_s20 = inlined_call_operand.vmem [shape: bf16[2,32,128], index: 20, kind: input, shape index: {}]   ;;  %s7924_s21 = inlined_call_operand.vmem [shape: f32[2,1,128], index: 21, kind: input, shape index: {}]   ;;  %s7925_s22 = inlined_call_operand.vmem [shape: bf16[2,128,32], index: 22, kind: input, shape index: {}]   ;;  %s7926_s23 = inlined_call_operand.vmem [shape: f32[2,1,32], index: 23, kind: input, shape index: {}]   ;;  %s7927_s24 = inlined_call_operand.vmem [shape: f32[1,32], index: 24, kind: input, shape index: {}]   ;;  %s7928_s25 = inlined_call_operand.vmem [shape: f32[1,32], index: 25, kind: input, shape index: {}]   ;;  %s7929_s26 = inlined_call_operand.vmem [shape: bf16[32,5], index: 26, kind: input, shape index: {}]   ;;  %s7930_s27 = inlined_call_operand.vmem [shape: f32[1,5], index: 27, kind: input, shape index: {}]   ;;  %s7931_s28 = inlined_call_operand.hbm [shape: f32[2,1,5], index: 28, kind: output, shape index: {}]  }
   0x1   :  { %7956 = sst [smem:[#allocation12_spill]] %s7903_s0 }
   0x2   :  { %7957 = sst [smem:[#allocation13_spill]] %s7904_s1 }
   0x3   :  { %7958 = sst [smem:[#allocation14_spill]] %s7905_s2 }
   0x4   :  { %7959 = sst [smem:[#allocation15_spill]] %s7906_s3 }
   0x5   :  { %7960 = sst [smem:[#allocation16_spill]] %s7907_s4 }
   0x6   :  { %7961 = sst [smem:[#allocation17_spill]] %s7908_s5 }
   0x7   :  { %7962 = sst [smem:[#allocation18_spill]] %s7909_s6 }
   0x8   :  { %7963 = sst [smem:[#allocation19_spill]] %s7910_s7 }
   0x9   :  { %7964 = sst [smem:[#allocation20_spill]] %s7911_s8 }
   0xa   :  { %7965 = sst [smem:[#allocation21_spill]] %s7912_s9 }
   0xb   :  { %7966 = sst [smem:[#allocation22_spill]] %s7913_s10 }
   0xc   :  { %7967 = sst [smem:[#allocation23_spill]] %s7914_s11 }
   0xd   :  { %7968 = sst [smem:[#allocation24_spill]] %s7915_s12 }
   0xe   :  { %7969 = sst [smem:[#allocation25_spill]] %s7931_s28 }
   0xf   :  { %33 = vsyncpa [#allocation3], 0 }
  0x10   :  { %35 = vsyncpa [#allocation3 + $0x1], 0  ;;  %s6978_s8 = smov 0   ;;  %s6980_s5 = smov 0  }
  0x11   :  { %s6982_s9 = smov 0   ;;  %s6984_s30 = smov 0  }
  0x12 LB: > { %7970 = sst [smem:[#allocation5_spill]] %s6815_s8  ;;  %s6999_s3 = sadd.s32 4294967295, %s6827_s30   ;;  %s6827_s30 = sphi %s6984_s30, %s7998_s30   ;;  %s6823_s9 = sphi %s6982_s9, %s8000_s9   ;;  %s6819_s5 = sphi %s6980_s5, %s8002_s5   ;;  %s6815_s8 = sphi %s6978_s8, %s8001_s8  }
  0x13   : > { %7971 = sst [smem:[#allocation6_spill]] %s6823_s9  ;;  %s5459_s6 = sadd.s32 4294967294, %s6827_s30  }
  0x14   : > { %7972 = sst [smem:[#allocation7_spill]] %s6827_s30  ;;  %s7003_s10 = sadd.s32 1, %s6827_s30  }
  0x15   : > { %7973 = sst [smem:[#allocation8_spill]] %s7003_s10  ;;  %s646_s0 = sadd.s32 1, %s6823_s9 }
  0x16   : > { %s643_s11 = ssub.s32 %s6827_s30, %s7003_s10  ;;  %p656_p0 = scmp.ne.s32.totalorder %s6823_s9, %s6819_s5 }
  0x17   : > { %p644_p1 = scmp.eq.s32.totalorder %s643_s11, 0  ;;  %p657_p2 = scmp.eq.s32.totalorder %s6999_s3, 1 }
  0x18   : > { %p662_p3 = scmp.ne.s32.totalorder %s6819_s5, %s6815_s8  ;;  %p663_p4 = scmp.eq.s32.totalorder %s5459_s6, 1 }
  0x19   : > { %s7014_s29 = scalar_select %p644_p1, %s6823_s9, %s646_s0  }
  0x1a   : > { %p7016_p5 = por %p657_p2, %p656_p0  ;;  %p7020_p6 = por %p663_p4, %p662_p3 }
  0x1b   : > { %7974 = sst [smem:[#allocation9_spill]] %s7014_s29  ;;  %p5462_p7 = scmp.ge.s32.totalorder %s6827_s30, 1 }
  0x1c   : > { %s7975_s2 = scalar_select %p7016_p5, 1, 0 }
  0x1d   : > { %s7977_s7 = scalar_select %p7020_p6, 1, 0 }
  0x1e   : > { %7976 = sst [smem:[#allocation10_spill]] %s7975_s2  ;;  %p773_p8 = scmp.lt.s32.totalorder %s6827_s30, 3 }
  0x1f   : > { %7978 = sst [smem:[#allocation11_spill]] %s7977_s7 }
  0x20   : > { %p774_p9 = pnand %p5462_p7, %p773_p8 }
  0x21   : > { %s7979_s4 = sld [smem:[#allocation14_spill]] (!%p774_p9)  ;;  %p849_p10 = scmp.lt.s32.totalorder (!%p774_p9), %s6999_s3, 1 }
  0x22   : > { %777 = sbr.rel (%p774_p9) target bundleno = 10369 (0x2881), region = 132  ;;  %s7980_s9 = sld [smem:[#allocation12_spill]] (!%p774_p9) }
  0x23   : > { %s7981_s30 = sld [smem:[#allocation13_spill]] (!%p774_p9) }
  0x24   : > { %s7984_s29 = sld [smem:[#allocation18_spill]] (!%p774_p9) }
  0x25   : > { %s7986_s0 = sld [smem:[#allocation17_spill]] (!%p774_p9) }
  0x26   : > { %s7988_s1 = sld [smem:[#allocation24_spill]] (!%p774_p9) }
  0x27   : > { %v6559_v0 = vld [vmem:[%s7979_s4 + $0x8] sm:$0xff]   ;;  %v6829_v1 = vmov 0.0   ;;  %v6560_v2 = vld [vmem:[%s7979_s4] sm:$0xff]   ;;  %vm6830_vm0 = vmmov 0   ;;  %s850_s11 = scalar_select %p849_p10, %s6999_s3, 1  ;;  %vm883_vm1 = vcmask 261120  }
  0x28   : > { %6045 = vmatprep.subr.bf16.mxu1 %v6829_v1  ;;  %6049 = vmatprep.mubr.msk.bf16.mxu1 %vm6830_vm0, %v6829_v1  ;;  %s7982_s4 = sld [smem:[#allocation16_spill]]  ;;  %vm1002_vm2 = vcmask 1040384   ;;  %vm1019_vm3 = vcmask 253952   ;;  %v6567_v54 = vld [vmem:[%s7917_s14 + $0x8] sm:$0xff]   ;;  %vm1297_vm4 = vcmask 64512   ;;  %vm1361_vm5 = vcmask 138240  }
  0x29   : > { %6046 = vmatpush3.bf16.msra.mxu1 %v6559_v0  ;;  %s5463_s12 = sshll.u32 %s850_s11, 3  ;;  %s7989_s2 = sld [smem:[#allocation20_spill]]  ;;  %vm1368_vm6 = vcmask 131072   ;;  %vm1852_vm7 = vcmask 1043456   ;;  %vm5377_vm8 = vcmask 32768  }
  0x2a   : > { %6047 = vmatprep.subr.bf16.mxu1 %v6829_v1  ;;  %s852_s10 = scalar_lea.vmem %s7980_s9, %s5463_s12  ;;  %s856_s28 = scalar_lea.vmem %s7981_s30, %s5463_s12  ;;  %v995_v13 = vld [vmem:[%s7984_s29] sm:$0x1] }
  0x2b   : > { %v858_v3 = vld [vmem:[%s852_s10] sm:$0xff]  ;;  %s7983_s30 = sld [smem:[#allocation15_spill]] }
  0x2c   : > { %v859_v5 = vpack.c.bf16 %v858_v3, %v858_v3  ;;  %v927_v6 = vld [vmem:[%s856_s28] sm:$0xff]  ;;  %s7985_s12 = sld [smem:[#allocation19_spill]]  ;;  %v6564_v51 = vld [vmem:[%s7988_s1 + $0x8] sm:$0xff]  }
  0x2d   : > { %6048 = vmatpush3.bf16.msra.mxu1 %v6560_v2  ;;  %v928_v8 = vpack.c.bf16 %v927_v6, %v927_v6  ;;  %v5469_v19 = vld [vmem:[%s7986_s0] ss:$0 sm:$0xff]  ;;  %s7987_s29 = sld [smem:[#allocation22_spill]] }
  0x2e   : > { %6053 = vmatprep.subr.bf16.mxu1 %v6829_v1  ;;  %v6561_v4 = vld [vmem:[%s7982_s4 + $0x8] sm:$0xff]   ;;  %v6562_v7 = vld [vmem:[%s7982_s4] sm:$0xff]   ;;  %s7990_s0 = sld [smem:[#allocation21_spill]]  ;;  %s847_s4 = sand.u32 1, %s6819_s5  }
  0x2f   : > { %v6566_v53 = vld [vmem:[%s7988_s1] sm:$0xff]   ;;  %s7991_s7 = sld [smem:[#allocation23_spill]]  ;;  %s5380_s9 = scalar_lea.sflag [#allocation3], %s847_s4 }
  0x30   : > { %6050 = vmatmul.mubr.msk.bf16.vlgmr.msra.gmra.mxu1 %vm883_vm1, %v859_v5  ;;  %v5473_v3 = vld [vmem:[%s7989_s2] ss:$0 sm:$0xff]  ;;  %s7993_s8 = sld [smem:[#allocation25_spill]] }
  0x31   : > { %6054 = vmatpush3.bf16.msra.mxu1 %v6561_v4  ;;  %6057 = vmatprep.mubr.msk.bf16.mxu1 %vm6830_vm0, %v6829_v1  ;;  %v5465_v9 = vld [vmem:[%s7983_s30] ss:$0 sm:$0xff]  ;;  %s6832_s30 = smov [#allocation2]  }
  0x32   : > { %6055 = vmatprep.subr.bf16.mxu1 %v6829_v1  ;;  %v1005_v15 = vld [vmem:[%s7985_s12] sm:$0xff]  ;;  %v1007_v24 = vld [vmem:[%s7985_s12 + $0x10] sm:$0x1]  ;;  %v1006_v27 = vld [vmem:[%s7985_s12 + $0x8] sm:$0xff]  ;;  %s6771_s12 = sshll.u32 %s6832_s30, 4  ;;  %s6772_s12 = int_to_ptr.vmem [resolvable:$false] %s6771_s12 }
  0x33   : > { %v6563_v50 = vld [vmem:[%s7987_s29 + $0x8] sm:$0xff]   ;;  %v6565_v52 = vld [vmem:[%s7987_s29] sm:$0xff]   ;;  %s6773_s6 = scalar_lea.vmem %s6772_s12, 32 }
  0x34   : > { %6061 = vmatprep.subr.bf16.mxu0 %v6563_v50 }
  0x35   : > { %6056 = vmatpush3.bf16.msra.mxu1 %v6562_v7  ;;  %6062 = vmatpush3.bf16.msra.mxu0 %v6563_v50 }
  0x36   : > { %6069 = vmatprep.subr.bf16.mxu1 %v6564_v51  ;;  %6063 = vmatprep.subr.bf16.mxu0 %v6565_v52 }
  0x38   : > { %6058 = vmatmul.mubr.msk.bf16.vlgmr.msra.gmra.mxu1 %vm883_vm1, %v928_v8 }
  0x39   : > { %6070 = vmatpush3.bf16.msra.mxu1 %v6564_v51  ;;  %6064 = vmatpush3.bf16.msra.mxu0 %v6565_v52 }
  0x3a   : > { %6071 = vmatprep.subr.bf16.mxu1 %v6566_v53  ;;  %6077 = vmatprep.subr.bf16.mxu0 %v6567_v54 }
  0x3d   : > { %6072 = vmatpush3.bf16.msra.mxu1 %v6566_v53 }
  0xf0   : > { %v921_v10 = vpop.f32.mrf.mxu1 }
  0xf1   : > { %v922_v11 = vadd.f32 %v5465_v9, %v921_v10  ;;  %v5474_v9 = vld [vmem:[%s7990_s0] ss:$0 sm:$0xff] }
  0xf2   : > { %v6051_v12 = vpop.f32.mrf.mxu1 }
  0xf3   : > { %v997_v14 = vrot.slane %v922_v11, 7 }
  0xf4   : > { %v924_v16 = vpop.f32.mrf.mxu1 }
  0xf5   : > { %v1003_v17 = vsel %vm1002_vm2, %v995_v13, %v997_v14 }
  0xf6   : > { %v6052_v18 = vpop.f32.mrf.mxu1  ;;  %v7069_v20 = vadd.f32 %v1005_v15, %v1003_v17  ;;  %v6568_v17 = vld [vmem:[%s7917_s14] sm:$0xff]  }
  0xf7   : > { %v5480_v18 = vld [vmem:[%s7916_s13] ss:$0 sm:$0xff] }
  0xf8   : > { %v989_v21 = vpop.f32.mrf.mxu1  ;;  %v1013_v22 = vsel %vm883_vm1, %v7069_v20, 0.0 }
  0xf9   : > { %v990_v23 = vadd.f32 %v5469_v19, %v989_v21  ;;  %1014 = vadd.xlane.f32.xlu0 %v1013_v22 }
  0xfa   : > { %v6059_v25 = vpop.f32.mrf.mxu1 }
  0xfb   : > { %v1000_v26 = vrot.slane %v990_v23, 7 }
  0xfc   : > { %v992_v28 = vpop.f32.mrf.mxu1 }
  0xfd   : > { %v1004_v29 = vsel %vm1002_vm2, %v997_v14, %v1000_v26  ;;  %v7080_v30 = vadd.f32 %v1007_v24, %v1000_v26 }
  0xfe   : > { %v6060_v31 = vpop.f32.mrf.mxu1  ;;  %v7082_v32 = vadd.f32 %v1006_v27, %v1004_v29  ;;  %v5475_v29 = vld [vmem:[%s7991_s7] ss:$0 sm:$0xff] }
  0xff   : > { %v1020_v33 = vsel %vm1019_vm3, %v7080_v30, 0.0 }
 0x100   : > { %1021 = vadd.xlane.f32.xlu1 %v1020_v33  ;;  %v1016_v34 = vsel %vm883_vm1, %v7082_v32, 0.0 }
 0x101   : > { %1017 = vadd.xlane.f32.xlu0 %v1016_v34  ;;  %v5485_v34 = vld [vmem:[%s7918_s15] ss:$0 sm:$0xff] }
 0x182   : > { %v1015_v35 = vpop.xlane.xlu0 %1014 }
 0x183   : > { %v1024_v36 = vmul.f32 0.03125, %v1015_v35 }
 0x185   : > { %v1027_v37 = vsub.f32 %v7069_v20, %v1024_v36 }
 0x187   : > { %v1030_v38 = vmul.f32 %v1027_v37, %v1027_v37 }
 0x189   : > { %v1022_v39 = vpop.xlane.xlu1 %1021  ;;  %v1033_v40 = vsel %vm883_vm1, %v1030_v38, 0.0 }
 0x18a   : > { %v1026_v41 = vmul.f32 0.03125, %v1022_v39  ;;  %1034 = vadd.xlane.f32.xlu1 %v1033_v40  ;;  %v1018_v42 = vpop.xlane.xlu0 %1017 }
 0x18b   : > { %v1025_v43 = vmul.f32 0.03125, %v1018_v42 }
 0x18c   : > { %v1029_v44 = vsub.f32 %v7080_v30, %v1026_v41 }
 0x18d   : > { %v1028_v45 = vsub.f32 %v7082_v32, %v1025_v43  ;;  %v6831_v43 = vmov 0  }
 0x18e   : > { %v1032_v46 = vmul.f32 %v1029_v44, %v1029_v44 }
 0x18f   : > { %v1031_v47 = vmul.f32 %v1028_v45, %v1028_v45 }
 0x190   : > { %v1039_v48 = vsel %vm1019_vm3, %v1032_v46, 0.0 }
 0x191   : > { %1040 = vadd.xlane.f32.xlu1 %v1039_v48  ;;  %v1036_v49 = vsel %vm883_vm1, %v1031_v47, 0.0  ;;  %v6569_v47 = vld [vmem:[%s7988_s1 + $0x18] sm:$0xff]  }
 0x192   : > { %1037 = vadd.xlane.f32.xlu0 %v1036_v49 }
 0x213   : > { %v1035_v55 = vpop.xlane.xlu1 %1034 }
 0x214   : > { %v1042_v56 = vmul.f32 0.03125, %v1035_v55 }
 0x216   : > { %v1045_v57 = vadd.f32 1e-05, %v1042_v56 }
 0x218   : > { %6633 = vrsqrt.f32 %v1045_v57  ;;  %v6570_v57 = vld [vmem:[%s7988_s1 + $0x10] sm:$0xff]  }
 0x21a   : > { %v1041_v58 = vpop.xlane.xlu1 %1040 }
 0x21b   : > { %v1044_v59 = vmul.f32 0.03125, %v1041_v58  ;;  %v1038_v60 = vpop.xlane.xlu0 %1037 }
 0x21c   : > { %v1043_v61 = vmul.f32 0.03125, %v1038_v60 }
 0x21d   : > { %v1047_v62 = vadd.f32 1e-05, %v1044_v59 }
 0x21e   : > { %v1046_v63 = vadd.f32 1e-05, %v1043_v61 }
 0x21f   : > { %6635 = vrsqrt.f32 %v1047_v62 }
 0x220   : > { %6637 = vrsqrt.f32 %v1046_v63 }
 0x225   : > { %v6634_v0 = vpop.eup %6633 }
 0x226   : > { %v1051_v2 = vmul.f32 %v6634_v0, %v1027_v37 }
 0x228   : > { %v1060_v7 = vmul.f32 %v5473_v3, %v1051_v2  ;;  %v5509_v2 = vld [vmem:[%s7916_s13 + $0x1] ss:$0 sm:$0xff] }
 0x22a   : > { %v1069_v13 = vadd.f32 %v5474_v9, %v1060_v7 }
 0x22c   : > { %v6636_v4 = vpop.eup %6635 }
 0x22d   : > { %v6638_v5 = vpop.eup %6637  ;;  %v1053_v6 = vmul.f32 %v6636_v4, %v1029_v44  ;;  %v7146_v44 = vsel %vm1002_vm2, 65535, %v6831_v43 }
 0x22e   : > { %v1052_v8 = vmul.f32 %v6638_v5, %v1028_v45 }
 0x22f   : > { %v1062_v10 = vmul.f32 %v5473_v3, %v1053_v6 }
 0x230   : > { %v1061_v11 = vmul.f32 %v5473_v3, %v1052_v8 }
 0x231   : > { %v1071_v12 = vadd.f32 %v5474_v9, %v1062_v10 }
 0x232   : > { %v1070_v14 = vadd.f32 %v5474_v9, %v1061_v11 }
 0x233   : > { %v7117_v16 = vpack.c.bf16 %v1071_v12, %v1071_v12 }
 0x234   : > { %v7115_v15 = vpack.c.bf16 %v1070_v14, %v1069_v13 }
 0x236   : > { %6065 = vmatprep.mubr.msk.bf16.mxu0 %vm883_vm1, %v7115_v15  ;;  %6073 = vmatprep.mubr.msk.bf16.mxu1 %vm883_vm1, %v7115_v15 }
 0x237   : > { %6066 = vmatmul.mubr.msk.bf16.vlgmr.msra.gmra.mxu0 %vm883_vm1, %v7117_v16  ;;  %6074 = vmatmul.mubr.msk.bf16.vlgmr.msra.gmra.mxu1 %vm883_vm1, %v7117_v16 }
 0x238   : > { %6078 = vmatpush3.bf16.msra.mxu0 %v6567_v54  ;;  %6081 = vmatprep.mubr.msk.bf16.mxu0 %vm883_vm1, %v7115_v15 }
 0x239   : > { %6079 = vmatprep.subr.bf16.mxu0 %v6568_v17 }
 0x23c   : > { %6080 = vmatpush3.bf16.msra.mxu0 %v6568_v17 }
 0x23f   : > { %6082 = vmatmul.mubr.msk.bf16.vlgmr.msra.gmra.mxu0 %vm883_vm1, %v7117_v16 }
 0x2f7   : > { %v6067_v19 = vpop.f32.mrf.mxu0  ;;  %v6075_v21 = vpop.f32.mrf.mxu1 }
 0x2f8   : > { %v1217_v22 = vadd.f32 %v6075_v21, %v5480_v18  ;;  %v1146_v52 = vadd.f32 %v6067_v19, %v5475_v29 }
 0x2f9   : > { %v1137_v23 = vpop.f32.mrf.mxu0  ;;  %v1208_v24 = vpop.f32.mrf.mxu1 }
 0x2fa   : > { %v1296_v25 = vpack.c.bf16 %v1217_v22, %v1217_v22  ;;  %v1138_v35 = vadd.f32 %v5475_v29, %v1137_v23  ;;  %v1209_v36 = vadd.f32 %v5480_v18, %v1208_v24  ;;  %v1294_v56 = vpack.c.bf16 %v1146_v52, %v1146_v52  ;;  %v6574_v52 = vld [vmem:[%s7917_s14 + $0x10] sm:$0xff]  }
 0x2fb   : > { %v6068_v26 = vpop.f32.mrf.mxu0  ;;  %v6076_v27 = vpop.f32.mrf.mxu1 }
 0x2fc   : > { %v1308_v28 = vsel %vm1297_vm4, %v1296_v25, 0  ;;  %6493 = vmatprep.subr.msk.bf16.mxu1 %vm1297_vm4, %v1296_v25 }
 0x2fd   : > { %v1140_v31 = vpop.f32.mrf.mxu0  ;;  %v1211_v33 = vpop.f32.mrf.mxu1  ;;  %6086 = vmatpush3.bf16.xpose.msra.mxu1 %v1308_v28 }
 0x2fe   : > { %v1141_v37 = vadd.f32 %v5475_v29, %v1140_v31  ;;  %v1212_v38 = vadd.f32 %v5480_v18, %v1211_v33 }
 0x2ff   : > { %v6083_v39 = vpop.f32.mrf.mxu0 }
 0x300   : > { %v1293_v40 = vpack.c.bf16 %v1141_v37, %v1138_v35  ;;  %v1295_v41 = vpack.c.bf16 %v1212_v38, %v1209_v36  ;;  %v1288_v42 = vadd.f32 %v6083_v39, %v5485_v34  ;;  %v6571_v37 = vld [vmem:[%s7987_s29 + $0x18] sm:$0xff]  }
 0x301   : > { %v1279_v45 = vpop.f32.mrf.mxu0 }
 0x302   : > { %v1399_v46 = vpack.c.bf16 %v1288_v42, %v1288_v42  ;;  %6494 = vmatprep.subr.msk.bf16.mxu1 %vm1297_vm4, %v1295_v41  ;;  %6089 = vmatprep.mubr.msk.bf16.mxu1 %vm1297_vm4, %v1293_v40  ;;  %v1305_v50 = vsel %vm1297_vm4, %v1295_v41, 0  ;;  %v1280_v53 = vadd.f32 %v5485_v34, %v1279_v45 }
 0x303   : > { %v6084_v48 = vpop.f32.mrf.mxu0 }
 0x304   : > { %v1409_v49 = vand.u32 %v7146_v44, %v1399_v46 }
 0x305   : > { %v1282_v51 = vpop.f32.mrf.mxu0  ;;  %6088 = vmatpush3.bf16.xpose.msra.mxu1 %v1305_v50  ;;  %v6572_v50 = vld [vmem:[%s7987_s29 + $0x10] sm:$0xff]  }
 0x306   : > { %v1283_v54 = vadd.f32 %v5485_v34, %v1282_v51  ;;  %6093 = vmatprep.subr.bf16.mxu0 %v1409_v49  ;;  %6109 = vmatprep.subr.bf16.mxu1 %v6569_v47  ;;  %v6573_v51 = vld [vmem:[%s7917_s14 + $0x18] sm:$0xff]  }
 0x307   : > { %6094 = vmatpush3.bf16.msra.mxu0 %v1409_v49 }
 0x308   : > { %v1398_v55 = vpack.c.bf16 %v1283_v54, %v1280_v53  ;;  %v1461_v53 = vld [vmem:[%s7919_s16] sm:$0xf] }
 0x30a   : > { %6095 = vmatprep.subr.bf16.mxu0 %v1398_v55 }
 0x30b   : > { %6096 = vmatpush3.bf16.msra.mxu0 %v1398_v55 }
 0x30c   : > { %6090 = vmatmul.mubr.msk.bf16.vlgmr.msra.gmra.mxu1 %vm1297_vm4, %v1294_v56  ;;  %6101 = vmatprep.subr.bf16.mxu0 %v6571_v37 }
 0x30d   : > { %6110 = vmatpush3.bf16.msra.mxu1 %v6569_v47  ;;  %6113 = vmatprep.mubr.msk.bf16.mxu1 %vm883_vm1, %v7115_v15 }
 0x30e   : > { %6111 = vmatprep.subr.bf16.mxu1 %v6570_v57 }
 0x311   : > { %6112 = vmatpush3.bf16.msra.mxu1 %v6570_v57 }
 0x314   : > { %6114 = vmatmul.mubr.msk.bf16.vlgmr.msra.gmra.mxu1 %vm883_vm1, %v7117_v16 }
 0x3cc   : > { %v6091_v58 = vpop.f32.mrf.mxu1 }
 0x3cd   : > { %v1360_v62 = vmul.f32 0.35355338, %v6091_v58 }
 0x3ce   : > { %v1344_v59 = vpop.f32.mrf.mxu1 }
 0x3cf   : > { %v1358_v60 = vmul.f32 0.35355338, %v1344_v59  ;;  %v1369_v6 = vsel %vm1368_vm6, %v1360_v62, -inf }
 0x3d0   : > { %v6092_v61 = vpop.f32.mrf.mxu1 }
 0x3d1   : > { %v1362_v63 = vsel %vm1361_vm5, %v1358_v60, -inf }
 0x3d2   : > { %1363 = vmax.xlane.f32.xlu0 %v1362_v63  ;;  %v1347_v0 = vpop.f32.mrf.mxu1 }
 0x3d3   : > { %v1359_v3 = vmul.f32 0.35355338, %v1347_v0  ;;  %v5519_v0 = vld [vmem:[%s7918_s15 + $0x1] ss:$0 sm:$0xff] }
 0x3d4   : > { %v6115_v4 = vpop.f32.mrf.mxu1 }
 0x3d5   : > { %v1603_v5 = vadd.f32 %v6115_v4, %v5509_v2  ;;  %v1365_v7 = vsel %vm1361_vm5, %v1359_v3, -inf }
 0x3d6   : > { %1370 = vmax.xlane.f32.xlu0 %v1369_v6  ;;  %v1594_v8 = vpop.f32.mrf.mxu1  ;;  %1366 = vmax.xlane.f32.xlu1 %v1365_v7 }
 0x3d7   : > { %v1684_v9 = vpack.c.bf16 %v1603_v5, %v1603_v5  ;;  %v1595_v13 = vadd.f32 %v5509_v2, %v1594_v8 }
 0x3d8   : > { %v6116_v10 = vpop.f32.mrf.mxu1 }
 0x3d9   : > { %v1695_v11 = vsel %vm1297_vm4, %v1684_v9, 0  ;;  %6495 = vmatprep.subr.msk.bf16.mxu1 %vm1297_vm4, %v1684_v9  ;;  %v1911_v9 = vsel %vm1852_vm7, %v1461_v53, 0  ;;  %v6575_v10 = vld [vmem:[%s7988_s1 + $0x28] sm:$0xff]  }
 0x3da   : > { %v1597_v12 = vpop.f32.mrf.mxu1  ;;  %6126 = vmatpush3.bf16.xpose.msra.mxu1 %v1695_v11 }
 0x3db   : > { %v1598_v14 = vadd.f32 %v5509_v2, %v1597_v12 }
 0x3dd   : > { %v1683_v17 = vpack.c.bf16 %v1598_v14, %v1595_v13 }
 0x3df   : > { %6496 = vmatprep.subr.msk.bf16.mxu1 %vm1297_vm4, %v1683_v17  ;;  %v1692_v18 = vsel %vm1297_vm4, %v1683_v17, 0 }
 0x3e2   : > { %6128 = vmatpush3.bf16.xpose.msra.mxu1 %v1692_v18 }
 0x3e3   : > { %6498 = vmatprep.subr.msk.bf16.mxu1 %vm1852_vm7, %v1461_v53 }
 0x45b   : > { %v1364_v19 = vpop.xlane.xlu0 %1363 }
 0x45c   : > { %v1372_v21 = vsub.f32 %v1358_v60, %v1364_v19  ;;  %v5499_v60 = vld [vmem:[%s7991_s7 + $0x1] ss:$0 sm:$0xff] }
 0x45e   : > { %v1375_v22 = vmul.f32 1.442695, %v1372_v21 }
 0x45f   : > { %v1371_v23 = vpop.xlane.xlu0 %1370  ;;  %v1367_v24 = vpop.xlane.xlu1 %1366 }
 0x460   : > { %6639 = vpow2.f32 %v1375_v22  ;;  %v1374_v25 = vsub.f32 %v1360_v62, %v1371_v23  ;;  %v1373_v26 = vsub.f32 %v1359_v3, %v1367_v24  ;;  %v6576_v23 = vld [vmem:[%s7988_s1 + $0x20] sm:$0xff]  }
 0x462   : > { %v1379_v27 = vmul.f32 1.442695, %v1374_v25  ;;  %v1377_v28 = vmul.f32 1.442695, %v1373_v26 }
 0x464   : > { %6641 = vpow2.f32 %v1379_v27 }
 0x465   : > { %6643 = vpow2.f32 %v1377_v28 }
 0x46d   : > { %v6640_v29 = vpop.eup %6639 }
 0x46e   : > { %v1381_v31 = vsel %vm1361_vm5, %v6640_v29, 0.0 }
 0x46f   : > { %1382 = vadd.xlane.f32.xlu1 %v1381_v31 }
 0x471   : > { %v6642_v33 = vpop.eup %6641 }
 0x472   : > { %v6644_v34 = vpop.eup %6643  ;;  %v1387_v35 = vsel %vm1368_vm6, %v6642_v33, 0.0 }
 0x473   : > { %1388 = vadd.xlane.f32.xlu1 %v1387_v35  ;;  %v1384_v36 = vsel %vm1361_vm5, %v6644_v34, 0.0 }
 0x474   : > { %1385 = vadd.xlane.f32.xlu0 %v1384_v36 }
 0x4f8   : > { %v1383_v38 = vpop.xlane.xlu1 %1382 }
 0x4f9   : > { %6645 = vrcp.f32 %v1383_v38 }
 0x4fc   : > { %v1389_v39 = vpop.xlane.xlu1 %1388 }
 0x4fd   : > { %v1386_v40 = vpop.xlane.xlu0 %1385  ;;  %6647 = vrcp.f32 %v1389_v39 }
 0x4fe   : > { %6649 = vrcp.f32 %v1386_v40  ;;  %v5548_v40 = vld [vmem:[%s7916_s13 + $0x2] ss:$0 sm:$0xff] }
 0x506   : > { %v6646_v41 = vpop.eup %6645 }
 0x507   : > { %v1393_v46 = vmul.f32 %v6646_v41, %v6640_v29 }
 0x50a   : > { %v6648_v42 = vpop.eup %6647 }
 0x50b   : > { %v6650_v43 = vpop.eup %6649  ;;  %v1395_v45 = vmul.f32 %v6648_v42, %v6642_v33 }
 0x50c   : > { %v1394_v47 = vmul.f32 %v6650_v43, %v6644_v34 }
 0x50d   : > { %v1397_v48 = vpack.c.bf16 %v1395_v45, %v1395_v45 }
 0x50e   : > { %v1396_v49 = vpack.c.bf16 %v1394_v47, %v1393_v46 }
 0x510   : > { %6097 = vmatprep.mubr.msk.bf16.mxu0 %vm1361_vm5, %v1396_v49 }
 0x511   : > { %6098 = vmatmul.mubr.msk.bf16.vlgmr.msra.gmra.mxu0 %vm1361_vm5, %v1397_v48 }
 0x512   : > { %6102 = vmatpush3.bf16.msra.mxu0 %v6571_v37  ;;  %6105 = vmatprep.mubr.msk.bf16.mxu0 %vm883_vm1, %v7115_v15 }
 0x513   : > { %6103 = vmatprep.subr.bf16.mxu0 %v6572_v50 }
 0x516   : > { %6104 = vmatpush3.bf16.msra.mxu0 %v6572_v50 }
 0x517   : > { %6117 = vmatprep.subr.bf16.mxu0 %v6573_v51 }
 0x519   : > { %6106 = vmatmul.mubr.msk.bf16.vlgmr.msra.gmra.mxu0 %vm883_vm1, %v7117_v16 }
 0x51a   : > { %6118 = vmatpush3.bf16.msra.mxu0 %v6573_v51  ;;  %6121 = vmatprep.mubr.msk.bf16.mxu0 %vm883_vm1, %v7115_v15 }
 0x51b   : > { %6119 = vmatprep.subr.bf16.mxu0 %v6574_v52 }
 0x51e   : > { %6120 = vmatpush3.bf16.msra.mxu0 %v6574_v52 }
 0x521   : > { %6122 = vmatmul.mubr.msk.bf16.vlgmr.msra.gmra.mxu0 %vm883_vm1, %v7117_v16 }
 0x5d1   : > { %v6099_v54 = vpop.f32.mrf.mxu0 }
 0x5d2   : > { %v1460_v22 = vpack.c.bf16 %v6099_v54, %v6099_v54 }
 0x5d3   : > { %v1445_v55 = vpop.f32.mrf.mxu0 }
 0x5d5   : > { %v6100_v56 = vpop.f32.mrf.mxu0 }
 0x5d7   : > { %v1448_v57 = vpop.f32.mrf.mxu0 }
 0x5d8   : > { %v1459_v11 = vpack.c.bf16 %v1448_v57, %v1445_v55 }
 0x5d9   : > { %v6107_v58 = vpop.f32.mrf.mxu0 }
 0x5da   : > { %v1530_v62 = vadd.f32 %v6107_v58, %v5499_v60 }
 0x5db   : > { %v1521_v59 = vpop.f32.mrf.mxu0 }
 0x5dc   : > { %v1522_v2 = vadd.f32 %v5499_v60, %v1521_v59  ;;  %v1682_v7 = vpack.c.bf16 %v1530_v62, %v1530_v62 }
 0x5dd   : > { %v6108_v61 = vpop.f32.mrf.mxu0 }
 0x5df   : > { %v1524_v63 = vpop.f32.mrf.mxu0 }
 0x5e0   : > { %v1525_v3 = vadd.f32 %v5499_v60, %v1524_v63 }
 0x5e1   : > { %v6123_v4 = vpop.f32.mrf.mxu0 }
 0x5e2   : > { %v1681_v5 = vpack.c.bf16 %v1525_v3, %v1522_v2  ;;  %v1676_v6 = vadd.f32 %v6123_v4, %v5519_v0 }
 0x5e3   : > { %v1667_v8 = vpop.f32.mrf.mxu0 }
 0x5e4   : > { %v1784_v12 = vpack.c.bf16 %v1676_v6, %v1676_v6  ;;  %6129 = vmatprep.mubr.msk.bf16.mxu1 %vm1297_vm4, %v1681_v5  ;;  %v1668_v18 = vadd.f32 %v5519_v0, %v1667_v8 }
 0x5e5   : > { %v6124_v13 = vpop.f32.mrf.mxu0  ;;  %6130 = vmatmul.mubr.msk.bf16.vlgmr.msra.gmra.mxu1 %vm1297_vm4, %v1682_v7 }
 0x5e6   : > { %v1792_v14 = vand.u32 %v1784_v12, %v7146_v44  ;;  %6149 = vmatprep.mubr.msk.bf16.mxu1 %vm1297_vm4, %v1459_v11  ;;  %6148 = vmatpush3.bf16.msra.mxu1 %v1911_v9 }
 0x5e7   : > { %v1670_v17 = vpop.f32.mrf.mxu0  ;;  %6161 = vmatprep.subr.bf16.mxu1 %v6575_v10 }
 0x5e8   : > { %v1671_v19 = vadd.f32 %v5519_v0, %v1670_v17  ;;  %6133 = vmatprep.subr.bf16.mxu0 %v1792_v14 }
 0x5e9   : > { %6134 = vmatpush3.bf16.msra.mxu0 %v1792_v14 }
 0x5ea   : > { %v1783_v21 = vpack.c.bf16 %v1671_v19, %v1668_v18  ;;  %v5528_v18 = vld [vmem:[%s7919_s16 + $0x4] sm:$0xf] }
 0x5eb   : > { %v1854_v19 = vsel %vm1852_vm7, %v5528_v18, 0 }
 0x5ec   : > { %6135 = vmatprep.subr.bf16.mxu0 %v1783_v21 }
 0x5ed   : > { %6136 = vmatpush3.bf16.msra.mxu0 %v1783_v21  ;;  %6150 = vmatmul.mubr.msk.bf16.vlgmr.msra.gmra.mxu1 %vm1297_vm4, %v1460_v22  ;;  %v6577_v21 = vld [vmem:[%s7987_s29 + $0x28] sm:$0xff]  }
 0x5ee   : > { %6162 = vmatpush3.bf16.msra.mxu1 %v6575_v10  ;;  %6165 = vmatprep.mubr.msk.bf16.mxu1 %vm883_vm1, %v7115_v15 }
 0x5ef   : > { %6163 = vmatprep.subr.bf16.mxu1 %v6576_v23  ;;  %6497 = vmatprep.subr.msk.bf16.mxu0 %vm1852_vm7, %v5528_v18 }
 0x5f2   : > { %6164 = vmatpush3.bf16.msra.mxu1 %v6576_v23 }
 0x5f5   : > { %6166 = vmatmul.mubr.msk.bf16.vlgmr.msra.gmra.mxu1 %vm883_vm1, %v7117_v16 }
 0x6a5   : > { %v6131_v24 = vpop.f32.mrf.mxu1 }
 0x6a6   : > { %v1747_v28 = vmul.f32 0.35355338, %v6131_v24 }
 0x6a7   : > { %v1731_v25 = vpop.f32.mrf.mxu1 }
 0x6a8   : > { %v1745_v26 = vmul.f32 0.35355338, %v1731_v25  ;;  %v1754_v35 = vsel %vm1368_vm6, %v1747_v28, -inf }
 0x6a9   : > { %v6132_v27 = vpop.f32.mrf.mxu1 }
 0x6aa   : > { %v1748_v29 = vsel %vm1361_vm5, %v1745_v26, -inf }
 0x6ab   : > { %1749 = vmax.xlane.f32.xlu0 %v1748_v29  ;;  %v1734_v31 = vpop.f32.mrf.mxu1  ;;  %v6579_v29 = vld [vmem:[%s7917_s14 + $0x28] sm:$0xff]  }
 0x6ac   : > { %v1746_v33 = vmul.f32 0.35355338, %v1734_v31  ;;  %v6580_v31 = vld [vmem:[%s7917_s14 + $0x20] sm:$0xff]  }
 0x6ad   : > { %v7225_v34 = vpop.f32.mrf.mxu1 }
 0x6ae   : > { %v1751_v36 = vsel %vm1361_vm5, %v1746_v33, -inf }
 0x6af   : > { %1755 = vmax.xlane.f32.xlu0 %v1754_v35  ;;  %1752 = vmax.xlane.f32.xlu1 %v1751_v36  ;;  %v7229_v37 = vpop.f32.mrf.mxu1 }
 0x6b1   : > { %v6152_v38 = vpop.f32.mrf.mxu1 }
 0x6b3   : > { %v7231_v39 = vpop.f32.mrf.mxu1 }
 0x6b5   : > { %v6167_v41 = vpop.f32.mrf.mxu1 }
 0x6b6   : > { %v2102_v42 = vadd.f32 %v6167_v41, %v5548_v40 }
 0x6b7   : > { %v2093_v43 = vpop.f32.mrf.mxu1 }
 0x6b8   : > { %v2183_v45 = vpack.c.bf16 %v2102_v42, %v2102_v42  ;;  %v2094_v49 = vadd.f32 %v5548_v40, %v2093_v43  ;;  %v5538_v43 = vld [vmem:[%s7991_s7 + $0x2] ss:$0 sm:$0xff] }
 0x6b9   : > { %v6168_v46 = vpop.f32.mrf.mxu1 }
 0x6ba   : > { %v2194_v47 = vsel %vm1297_vm4, %v2183_v45, 0  ;;  %6499 = vmatprep.subr.msk.bf16.mxu1 %vm1297_vm4, %v2183_v45 }
 0x6bb   : > { %v2096_v48 = vpop.f32.mrf.mxu1  ;;  %6178 = vmatpush3.bf16.xpose.msra.mxu1 %v2194_v47 }
 0x6bc   : > { %v2097_v50 = vadd.f32 %v5548_v40, %v2096_v48  ;;  %v5558_v48 = vld [vmem:[%s7918_s15 + $0x2] ss:$0 sm:$0xff] }
 0x6be   : > { %v2182_v51 = vpack.c.bf16 %v2097_v50, %v2094_v49 }
 0x6c0   : > { %6500 = vmatprep.subr.msk.bf16.mxu1 %vm1297_vm4, %v2182_v51  ;;  %v2191_v52 = vsel %vm1297_vm4, %v2182_v51, 0 }
 0x6c3   : > { %6180 = vmatpush3.bf16.xpose.msra.mxu1 %v2191_v52 }
 0x734   : > { %v1750_v53 = vpop.xlane.xlu0 %1749 }
 0x735   : > { %v1757_v54 = vsub.f32 %v1745_v26, %v1750_v53 }
 0x737   : > { %v1760_v55 = vmul.f32 1.442695, %v1757_v54 }
 0x738   : > { %v1756_v56 = vpop.xlane.xlu0 %1755  ;;  %v1753_v57 = vpop.xlane.xlu1 %1752 }
 0x739   : > { %6651 = vpow2.f32 %v1760_v55  ;;  %v1759_v58 = vsub.f32 %v1747_v28, %v1756_v56  ;;  %v1758_v59 = vsub.f32 %v1746_v33, %v1753_v57  ;;  %v6578_v28 = vld [vmem:[%s7987_s29 + $0x20] sm:$0xff]   ;;  %v6581_v33 = vld [vmem:[%s7987_s29 + $0x38] sm:$0xff]   ;;  %v6582_v56 = vld [vmem:[%s7987_s29 + $0x30] sm:$0xff]  }
 0x73a   : > { %6199 = vmatprep.subr.bf16.mxu1 %v6581_v33 }
 0x73b   : > { %v1764_v60 = vmul.f32 1.442695, %v1759_v58  ;;  %v1762_v61 = vmul.f32 1.442695, %v1758_v59 }
 0x73d   : > { %6653 = vpow2.f32 %v1764_v60 }
 0x73e   : > { %6655 = vpow2.f32 %v1762_v61  ;;  %v6583_v61 = vld [vmem:[%s7917_s14 + $0x38] sm:$0xff]  }
 0x746   : > { %v6652_v62 = vpop.eup %6651 }
 0x747   : > { %v1766_v63 = vsel %vm1361_vm5, %v6652_v62, 0.0 }
 0x748   : > { %1767 = vadd.xlane.f32.xlu1 %v1766_v63 }
 0x74a   : > { %v6654_v0 = vpop.eup %6653 }
 0x74b   : > { %v6656_v2 = vpop.eup %6655  ;;  %v1772_v3 = vsel %vm1368_vm6, %v6654_v0, 0.0 }
 0x74c   : > { %1773 = vadd.xlane.f32.xlu1 %v1772_v3  ;;  %v1769_v4 = vsel %vm1361_vm5, %v6656_v2, 0.0 }
 0x74d   : > { %1770 = vadd.xlane.f32.xlu0 %v1769_v4 }
 0x7d1   : > { %v1768_v5 = vpop.xlane.xlu1 %1767 }
 0x7d2   : > { %6657 = vrcp.f32 %v1768_v5 }
 0x7d5   : > { %v1774_v6 = vpop.xlane.xlu1 %1773 }
 0x7d6   : > { %v1771_v7 = vpop.xlane.xlu0 %1770  ;;  %6659 = vrcp.f32 %v1774_v6 }
 0x7d7   : > { %6661 = vrcp.f32 %v1771_v7 }
 0x7df   : > { %v6658_v8 = vpop.eup %6657 }
 0x7e0   : > { %v1778_v12 = vmul.f32 %v6658_v8, %v6652_v62 }
 0x7e3   : > { %v6660_v9 = vpop.eup %6659 }
 0x7e4   : > { %v6662_v10 = vpop.eup %6661  ;;  %v1780_v11 = vmul.f32 %v6660_v9, %v6654_v0 }
 0x7e5   : > { %v1779_v13 = vmul.f32 %v6662_v10, %v6656_v2  ;;  %v6584_v2 = vld [vmem:[%s7917_s14 + $0x30] sm:$0xff]   ;;  %v5575_v10 = vld [vmem:[%s7991_s7 + $0x3] ss:$0 sm:$0xff] }
 0x7e6   : > { %v1782_v14 = vpack.c.bf16 %v1780_v11, %v1780_v11 }
 0x7e7   : > { %v1781_v17 = vpack.c.bf16 %v1779_v13, %v1778_v12 }
 0x7e9   : > { %6137 = vmatprep.mubr.msk.bf16.mxu0 %vm1361_vm5, %v1781_v17 }
 0x7ea   : > { %6138 = vmatmul.mubr.msk.bf16.vlgmr.msra.gmra.mxu0 %vm1361_vm5, %v1782_v14 }
 0x7eb   : > { %6142 = vmatpush3.bf16.msra.mxu0 %v1854_v19 }
 0x7ec   : > { %6153 = vmatprep.subr.bf16.mxu0 %v6577_v21 }
 0x8aa   : > { %v6139_v22 = vpop.f32.mrf.mxu0 }
 0x8ab   : > { %v1843_v27 = vpack.c.bf16 %v6139_v22, %v6139_v22  ;;  %v5595_v22 = vld [vmem:[%s7918_s15 + $0x3] ss:$0 sm:$0xff] }
 0x8ac   : > { %v1828_v23 = vpop.f32.mrf.mxu0 }
 0x8ae   : > { %v6140_v24 = vpop.f32.mrf.mxu0 }
 0x8b0   : > { %v1831_v25 = vpop.f32.mrf.mxu0 }
 0x8b1   : > { %v1842_v26 = vpack.c.bf16 %v1831_v25, %v1828_v23 }
 0x8b3   : > { %6143 = vmatprep.mubr.msk.bf16.mxu0 %vm1297_vm4, %v1842_v26 }
 0x8b4   : > { %6144 = vmatmul.mubr.msk.bf16.vlgmr.msra.gmra.mxu0 %vm1297_vm4, %v1843_v27 }
 0x8b5   : > { %6154 = vmatpush3.bf16.msra.mxu0 %v6577_v21  ;;  %6157 = vmatprep.mubr.msk.bf16.mxu0 %vm883_vm1, %v7115_v15 }
 0x8b6   : > { %6155 = vmatprep.subr.bf16.mxu0 %v6578_v28 }
 0x8b9   : > { %6156 = vmatpush3.bf16.msra.mxu0 %v6578_v28 }
 0x8ba   : > { %6169 = vmatprep.subr.bf16.mxu0 %v6579_v29 }
 0x8bc   : > { %6158 = vmatmul.mubr.msk.bf16.vlgmr.msra.gmra.mxu0 %vm883_vm1, %v7117_v16 }
 0x8bd   : > { %6170 = vmatpush3.bf16.msra.mxu0 %v6579_v29  ;;  %6173 = vmatprep.mubr.msk.bf16.mxu0 %vm883_vm1, %v7115_v15 }
 0x8be   : > { %6171 = vmatprep.subr.bf16.mxu0 %v6580_v31 }
 0x8c1   : > { %6172 = vmatpush3.bf16.msra.mxu0 %v6580_v31 }
 0x8c4   : > { %6174 = vmatmul.mubr.msk.bf16.vlgmr.msra.gmra.mxu0 %vm883_vm1, %v7117_v16 }
 0x974   : > { %v7275_v35 = vpop.f32.mrf.mxu0 }
 0x976   : > { %v7277_v36 = vpop.f32.mrf.mxu0 }
 0x978   : > { %v6146_v38 = vpop.f32.mrf.mxu0 }
 0x97a   : > { %v7279_v40 = vpop.f32.mrf.mxu0 }
 0x97c   : > { %v6159_v41 = vpop.f32.mrf.mxu0 }
 0x97d   : > { %v2029_v46 = vadd.f32 %v6159_v41, %v5538_v43 }
 0x97e   : > { %v2020_v42 = vpop.f32.mrf.mxu0 }
 0x97f   : > { %v2021_v49 = vadd.f32 %v5538_v43, %v2020_v42  ;;  %v2181_v54 = vpack.c.bf16 %v2029_v46, %v2029_v46 }
 0x980   : > { %v6160_v45 = vpop.f32.mrf.mxu0 }
 0x982   : > { %v2023_v47 = vpop.f32.mrf.mxu0 }
 0x983   : > { %v2024_v50 = vadd.f32 %v5538_v43, %v2023_v47 }
 0x984   : > { %v6175_v51 = vpop.f32.mrf.mxu0 }
 0x985   : > { %v2180_v52 = vpack.c.bf16 %v2024_v50, %v2021_v49  ;;  %v2175_v53 = vadd.f32 %v6175_v51, %v5558_v48 }
 0x986   : > { %v2166_v55 = vpop.f32.mrf.mxu0 }
 0x987   : > { %v2283_v57 = vpack.c.bf16 %v2175_v53, %v2175_v53  ;;  %6181 = vmatprep.mubr.msk.bf16.mxu1 %vm1297_vm4, %v2180_v52  ;;  %v2167_v62 = vadd.f32 %v5558_v48, %v2166_v55 }
 0x988   : > { %v6176_v58 = vpop.f32.mrf.mxu0  ;;  %6182 = vmatmul.mubr.msk.bf16.vlgmr.msra.gmra.mxu1 %vm1297_vm4, %v2181_v54 }
 0x989   : > { %v2291_v59 = vand.u32 %v2283_v57, %v7146_v44  ;;  %6200 = vmatpush3.bf16.msra.mxu1 %v6581_v33  ;;  %6203 = vmatprep.mubr.msk.bf16.mxu1 %vm883_vm1, %v7115_v15 }
 0x98a   : > { %v2169_v60 = vpop.f32.mrf.mxu0  ;;  %6201 = vmatprep.subr.bf16.mxu1 %v6582_v56 }
 0x98b   : > { %v2170_v63 = vadd.f32 %v5558_v48, %v2169_v60  ;;  %6185 = vmatprep.subr.bf16.mxu0 %v2291_v59 }
 0x98c   : > { %6186 = vmatpush3.bf16.msra.mxu0 %v2291_v59 }
 0x98d   : > { %v2282_v0 = vpack.c.bf16 %v2170_v63, %v2167_v62  ;;  %6202 = vmatpush3.bf16.msra.mxu1 %v6582_v56 }
 0x98e   : > { %6215 = vmatprep.subr.bf16.mxu1 %v6583_v61 }
 0x98f   : > { %6187 = vmatprep.subr.bf16.mxu0 %v2282_v0 }
 0x990   : > { %6188 = vmatpush3.bf16.msra.mxu0 %v2282_v0  ;;  %6204 = vmatmul.mubr.msk.bf16.vlgmr.msra.gmra.mxu1 %vm883_vm1, %v7117_v16 }
 0x991   : > { %6216 = vmatpush3.bf16.msra.mxu1 %v6583_v61  ;;  %6219 = vmatprep.mubr.msk.bf16.mxu1 %vm883_vm1, %v7115_v15 }
 0x992   : > { %6217 = vmatprep.subr.bf16.mxu1 %v6584_v2 }
 0x995   : > { %6218 = vmatpush3.bf16.msra.mxu1 %v6584_v2 }
 0x998   : > { %6220 = vmatmul.mubr.msk.bf16.vlgmr.msra.gmra.mxu1 %vm883_vm1, %v7117_v16 }
 0xa48   : > { %v6183_v3 = vpop.f32.mrf.mxu1 }
 0xa49   : > { %v2246_v7 = vmul.f32 0.35355338, %v6183_v3 }
 0xa4a   : > { %v2230_v4 = vpop.f32.mrf.mxu1 }
 0xa4b   : > { %v2244_v5 = vmul.f32 0.35355338, %v2230_v4  ;;  %v2253_v14 = vsel %vm1368_vm6, %v2246_v7, -inf }
 0xa4c   : > { %v6184_v6 = vpop.f32.mrf.mxu1 }
 0xa4d   : > { %v2247_v8 = vsel %vm1361_vm5, %v2244_v5, -inf }
 0xa4e   : > { %2248 = vmax.xlane.f32.xlu0 %v2247_v8  ;;  %v2233_v9 = vpop.f32.mrf.mxu1  ;;  %v5567_v8 = vld [vmem:[%s7919_s16 + $0x8] sm:$0xf] }
 0xa4f   : > { %v2245_v11 = vmul.f32 0.35355338, %v2233_v9  ;;  %6501 = vmatprep.subr.msk.bf16.mxu0 %vm1852_vm7, %v5567_v8  ;;  %v2352_v9 = vsel %vm1852_vm7, %v5567_v8, 0 }
 0xa50   : > { %v6205_v12 = vpop.f32.mrf.mxu1 }
 0xa51   : > { %v7311_v13 = vadd.f32 %v6205_v12, %v5575_v10  ;;  %v2250_v17 = vsel %vm1361_vm5, %v2245_v11, -inf }
 0xa52   : > { %2254 = vmax.xlane.f32.xlu0 %v2253_v14  ;;  %v2464_v18 = vpop.f32.mrf.mxu1  ;;  %2251 = vmax.xlane.f32.xlu1 %v2250_v17 }
 0xa53   : > { %v7318_v23 = vadd.f32 %v5575_v10, %v2464_v18 }
 0xa54   : > { %v6206_v19 = vpop.f32.mrf.mxu1 }
 0xa56   : > { %v2467_v21 = vpop.f32.mrf.mxu1 }
 0xa57   : > { %v7320_v24 = vadd.f32 %v5575_v10, %v2467_v21  ;;  %v6585_v10 = vld [vmem:[%s7988_s1 + $0x38] sm:$0xff]   ;;  %v6586_v21 = vld [vmem:[%s7988_s1 + $0x30] sm:$0xff]  }
 0xa58   : > { %v6221_v25 = vpop.f32.mrf.mxu1 }
 0xa59   : > { %v2624_v26 = vpack.c.bf16 %v7320_v24, %v7318_v23  ;;  %v2619_v27 = vadd.f32 %v6221_v25, %v5595_v22  ;;  %v5585_v23 = vld [vmem:[%s7916_s13 + $0x3] ss:$0 sm:$0xff] }
 0xa5a   : > { %v2610_v28 = vpop.f32.mrf.mxu1 }
 0xa5b   : > { %v2727_v29 = vpack.c.bf16 %v2619_v27, %v2619_v27  ;;  %v2611_v41 = vadd.f32 %v5595_v22, %v2610_v28  ;;  %v1948_v27 = vadd.f32 %v7229_v37, %v7277_v36 }
 0xa5c   : > { %v6222_v31 = vpop.f32.mrf.mxu1 }
 0xa5d   : > { %v2735_v33 = vand.u32 %v2727_v29, %v7146_v44 }
 0xa5e   : > { %v2613_v38 = vpop.f32.mrf.mxu1 }
 0xa5f   : > { %v2614_v42 = vadd.f32 %v5595_v22, %v2613_v38  ;;  %6231 = vmatprep.subr.bf16.mxu1 %v2735_v33  ;;  %v1956_v22 = vadd.f32 %v7225_v34, %v7275_v35 }
 0xa60   : > { %6232 = vmatpush3.bf16.msra.mxu1 %v2735_v33 }
 0xa61   : > { %v2726_v43 = vpack.c.bf16 %v2614_v42, %v2611_v41 }
 0xa63   : > { %6233 = vmatprep.subr.bf16.mxu1 %v2726_v43 }
 0xa64   : > { %6234 = vmatpush3.bf16.msra.mxu1 %v2726_v43 }
 0xad7   : > { %v2249_v45 = vpop.xlane.xlu0 %2248 }
 0xad8   : > { %v2256_v46 = vsub.f32 %v2244_v5, %v2249_v45  ;;  %v2625_v45 = vpack.c.bf16 %v7311_v13, %v7311_v13 }
 0xada   : > { %v2259_v47 = vmul.f32 1.442695, %v2256_v46 }
 0xadb   : > { %v2255_v48 = vpop.xlane.xlu0 %2254  ;;  %v2252_v49 = vpop.xlane.xlu1 %2251 }
 0xadc   : > { %6663 = vpow2.f32 %v2259_v47  ;;  %v2258_v50 = vsub.f32 %v2246_v7, %v2255_v48  ;;  %v2257_v51 = vsub.f32 %v2245_v11, %v2252_v49 }
 0xade   : > { %v2263_v52 = vmul.f32 1.442695, %v2258_v50  ;;  %v2261_v53 = vmul.f32 1.442695, %v2257_v51 }
 0xae0   : > { %6665 = vpow2.f32 %v2263_v52 }
 0xae1   : > { %6667 = vpow2.f32 %v2261_v53 }
 0xae9   : > { %v6664_v54 = vpop.eup %6663 }
 0xaea   : > { %v2265_v55 = vsel %vm1361_vm5, %v6664_v54, 0.0 }
 0xaeb   : > { %2266 = vadd.xlane.f32.xlu1 %v2265_v55 }
 0xaed   : > { %v6666_v56 = vpop.eup %6665 }
 0xaee   : > { %v6668_v57 = vpop.eup %6667  ;;  %v2271_v58 = vsel %vm1368_vm6, %v6666_v56, 0.0 }
 0xaef   : > { %2272 = vadd.xlane.f32.xlu1 %v2271_v58  ;;  %v2268_v59 = vsel %vm1361_vm5, %v6668_v57, 0.0 }
 0xaf0   : > { %2269 = vadd.xlane.f32.xlu0 %v2268_v59 }
 0xb74   : > { %v2267_v60 = vpop.xlane.xlu1 %2266 }
 0xb75   : > { %6669 = vrcp.f32 %v2267_v60 }
 0xb78   : > { %v2273_v61 = vpop.xlane.xlu1 %2272 }
 0xb79   : > { %v2270_v62 = vpop.xlane.xlu0 %2269  ;;  %6671 = vrcp.f32 %v2273_v61 }
 0xb7a   : > { %6673 = vrcp.f32 %v2270_v62 }
 0xb82   : > { %v6670_v63 = vpop.eup %6669 }
 0xb83   : > { %v2277_v4 = vmul.f32 %v6670_v63, %v6664_v54 }
 0xb86   : > { %v6672_v0 = vpop.eup %6671 }
 0xb87   : > { %v6674_v2 = vpop.eup %6673  ;;  %v2279_v3 = vmul.f32 %v6672_v0, %v6666_v56 }
 0xb88   : > { %v2278_v5 = vmul.f32 %v6674_v2, %v6668_v57 }
 0xb89   : > { %v2281_v6 = vpack.c.bf16 %v2279_v3, %v2279_v3 }
 0xb8a   : > { %v2280_v7 = vpack.c.bf16 %v2278_v5, %v2277_v4 }
 0xb8c   : > { %6189 = vmatprep.mubr.msk.bf16.mxu0 %vm1361_vm5, %v2280_v7 }
 0xb8d   : > { %6190 = vmatmul.mubr.msk.bf16.vlgmr.msra.gmra.mxu0 %vm1361_vm5, %v2281_v6 }
 0xb8e   : > { %6194 = vmatpush3.bf16.msra.mxu0 %v2352_v9 }
 0xb8f   : > { %6207 = vmatprep.subr.bf16.mxu0 %v6585_v10 }
 0xc4d   : > { %v6191_v11 = vpop.f32.mrf.mxu0 }
 0xc4e   : > { %v2342_v19 = vpack.c.bf16 %v6191_v11, %v6191_v11 }
 0xc4f   : > { %v2327_v12 = vpop.f32.mrf.mxu0 }
 0xc51   : > { %v6192_v14 = vpop.f32.mrf.mxu0 }
 0xc53   : > { %v2330_v17 = vpop.f32.mrf.mxu0 }
 0xc54   : > { %v2341_v18 = vpack.c.bf16 %v2330_v17, %v2327_v12 }
 0xc56   : > { %6195 = vmatprep.mubr.msk.bf16.mxu0 %vm1297_vm4, %v2341_v18 }
 0xc57   : > { %6196 = vmatmul.mubr.msk.bf16.vlgmr.msra.gmra.mxu0 %vm1297_vm4, %v2342_v19 }
 0xc58   : > { %6208 = vmatpush3.bf16.msra.mxu0 %v6585_v10  ;;  %6211 = vmatprep.mubr.msk.bf16.mxu0 %vm883_vm1, %v7115_v15 }
 0xc59   : > { %6209 = vmatprep.subr.bf16.mxu0 %v6586_v21 }
 0xc5c   : > { %6210 = vmatpush3.bf16.msra.mxu0 %v6586_v21 }
 0xc5f   : > { %6212 = vmatmul.mubr.msk.bf16.vlgmr.msra.gmra.mxu0 %vm883_vm1, %v7117_v16  ;;  %v1951_v16 = vadd.f32 %v7231_v39, %v7279_v40 }
 0xc60   : > { %6227 = vmatprep.mubr.msk.bf16.mxu0 %vm1297_vm4, %v2624_v26 }
 0xd17   : > { %v6197_v25 = vpop.f32.mrf.mxu0 }
 0xd18   : > { %v7355_v28 = vadd.f32 %v6197_v25, %v1956_v22  ;;  %v5604_v22 = vld [vmem:[%s7919_s16 + $0xc] sm:$0xf] }
 0xd19   : > { %v2388_v15 = vpop.f32.mrf.mxu0  ;;  %6504 = vmatprep.subr.msk.bf16.mxu1 %vm1852_vm7, %v5604_v22  ;;  %v2796_v25 = vsel %vm1852_vm7, %v5604_v22, 0 }
 0xd1a   : > { %v7357_v29 = vadd.f32 %v2388_v15, %v1948_v27 }
 0xd1b   : > { %v6198_v31 = vpop.f32.mrf.mxu0 }
 0xd1d   : > { %v2391_v33 = vpop.f32.mrf.mxu0 }
 0xd1e   : > { %v7364_v24 = vadd.f32 %v2391_v33, %v1951_v16 }
 0xd1f   : > { %v6213_v34 = vpop.f32.mrf.mxu0 }
 0xd20   : > { %v2546_v35 = vadd.f32 %v6213_v34, %v5585_v23 }
 0xd21   : > { %v2537_v26 = vpop.f32.mrf.mxu0 }
 0xd22   : > { %v2627_v37 = vpack.c.bf16 %v2546_v35, %v2546_v35  ;;  %v2538_v42 = vadd.f32 %v5585_v23, %v2537_v26 }
 0xd23   : > { %v6214_v36 = vpop.f32.mrf.mxu0 }
 0xd24   : > { %v2638_v38 = vsel %vm1297_vm4, %v2627_v37, 0  ;;  %6502 = vmatprep.subr.msk.bf16.mxu0 %vm1297_vm4, %v2627_v37 }
 0xd25   : > { %v2540_v41 = vpop.f32.mrf.mxu0  ;;  %6224 = vmatpush3.bf16.xpose.msra.mxu0 %v2638_v38 }
 0xd26   : > { %v2541_v39 = vadd.f32 %v5585_v23, %v2540_v41 }
 0xd28   : > { %v2626_v40 = vpack.c.bf16 %v2541_v39, %v2538_v42  ;;  %v5607_v42 = vld [vmem:[%s7920_s17] ss:$0 sm:$0xff] }
 0xd2a   : > { %6503 = vmatprep.subr.msk.bf16.mxu0 %vm1297_vm4, %v2626_v40  ;;  %v2635_v43 = vsel %vm1297_vm4, %v2626_v40, 0 }
 0xd2d   : > { %6226 = vmatpush3.bf16.xpose.msra.mxu0 %v2635_v43 }
 0xd34   : > { %6228 = vmatmul.mubr.msk.bf16.vlgmr.msra.gmra.mxu0 %vm1297_vm4, %v2625_v45 }
 0xdf4   : > { %v6229_v46 = vpop.f32.mrf.mxu0 }
 0xdf5   : > { %v2690_v50 = vmul.f32 0.35355338, %v6229_v46 }
 0xdf6   : > { %v2674_v47 = vpop.f32.mrf.mxu0 }
 0xdf7   : > { %v2688_v48 = vmul.f32 0.35355338, %v2674_v47  ;;  %v2697_v54 = vsel %vm1368_vm6, %v2690_v50, -inf }
 0xdf8   : > { %v6230_v49 = vpop.f32.mrf.mxu0 }
 0xdf9   : > { %v2691_v51 = vsel %vm1361_vm5, %v2688_v48, -inf }
 0xdfa   : > { %2692 = vmax.xlane.f32.xlu0 %v2691_v51  ;;  %v2677_v52 = vpop.f32.mrf.mxu0 }
 0xdfb   : > { %v2689_v53 = vmul.f32 0.35355338, %v2677_v52 }
 0xdfd   : > { %v2694_v55 = vsel %vm1361_vm5, %v2689_v53, -inf }
 0xdfe   : > { %2698 = vmax.xlane.f32.xlu0 %v2697_v54  ;;  %2695 = vmax.xlane.f32.xlu1 %v2694_v55 }
 0xe83   : > { %v2693_v56 = vpop.xlane.xlu0 %2692 }
 0xe84   : > { %v2700_v13 = vsub.f32 %v2688_v48, %v2693_v56 }
 0xe86   : > { %v2703_v57 = vmul.f32 1.442695, %v2700_v13 }
 0xe87   : > { %v2699_v58 = vpop.xlane.xlu0 %2698  ;;  %v2696_v59 = vpop.xlane.xlu1 %2695 }
 0xe88   : > { %6675 = vpow2.f32 %v2703_v57  ;;  %v2702_v60 = vsub.f32 %v2690_v50, %v2699_v58  ;;  %v2701_v61 = vsub.f32 %v2689_v53, %v2696_v59  ;;  %v6587_v59 = vld [vmem:[%s7923_s20 + $0x8] sm:$0xff]  }
 0xe89   : > { %6245 = vmatprep.subr.bf16.mxu0 %v6587_v59 }
 0xe8a   : > { %v2707_v62 = vmul.f32 1.442695, %v2702_v60  ;;  %v2705_v63 = vmul.f32 1.442695, %v2701_v61  ;;  %v6588_v60 = vld [vmem:[%s7923_s20] sm:$0xff]   ;;  %6246 = vmatpush3.bf16.msra.mxu0 %v6587_v59 }
 0xe8b   : > { %6247 = vmatprep.subr.bf16.mxu0 %v6588_v60 }
 0xe8c   : > { %6677 = vpow2.f32 %v2707_v62 }
 0xe8d   : > { %6679 = vpow2.f32 %v2705_v63 }
 0xe8e   : > { %6248 = vmatpush3.bf16.msra.mxu0 %v6588_v60 }
 0xe95   : > { %v6676_v0 = vpop.eup %6675 }
 0xe96   : > { %v2709_v2 = vsel %vm1361_vm5, %v6676_v0, 0.0 }
 0xe97   : > { %2710 = vadd.xlane.f32.xlu1 %v2709_v2 }
 0xe99   : > { %v6678_v3 = vpop.eup %6677 }
 0xe9a   : > { %v6680_v4 = vpop.eup %6679  ;;  %v2715_v5 = vsel %vm1368_vm6, %v6678_v3, 0.0 }
 0xe9b   : > { %2716 = vadd.xlane.f32.xlu1 %v2715_v5  ;;  %v2712_v6 = vsel %vm1361_vm5, %v6680_v4, 0.0 }
 0xe9c   : > { %2713 = vadd.xlane.f32.xlu0 %v2712_v6 }
 0xf20   : > { %v2711_v7 = vpop.xlane.xlu1 %2710 }
 0xf21   : > { %6681 = vrcp.f32 %v2711_v7 }
 0xf24   : > { %v2717_v8 = vpop.xlane.xlu1 %2716 }
 0xf25   : > { %v2714_v9 = vpop.xlane.xlu0 %2713  ;;  %6683 = vrcp.f32 %v2717_v8 }
 0xf26   : > { %6685 = vrcp.f32 %v2714_v9  ;;  %v5608_v9 = vld [vmem:[%s7921_s18] ss:$0 sm:$0xff] }
 0xf2e   : > { %v6682_v10 = vpop.eup %6681 }
 0xf2f   : > { %v2721_v17 = vmul.f32 %v6682_v10, %v6676_v0 }
 0xf32   : > { %v6684_v11 = vpop.eup %6683 }
 0xf33   : > { %v6686_v12 = vpop.eup %6685  ;;  %v2723_v14 = vmul.f32 %v6684_v11, %v6678_v3 }
 0xf34   : > { %v2722_v18 = vmul.f32 %v6686_v12, %v6680_v4 }
 0xf35   : > { %v2725_v19 = vpack.c.bf16 %v2723_v14, %v2723_v14 }
 0xf36   : > { %v2724_v21 = vpack.c.bf16 %v2722_v18, %v2721_v17  ;;  %v5609_v18 = vld [vmem:[%s7922_s19] ss:$0 sm:$0xff] }
 0xf38   : > { %6235 = vmatprep.mubr.msk.bf16.mxu1 %vm1361_vm5, %v2724_v21 }
 0xf39   : > { %6236 = vmatmul.mubr.msk.bf16.vlgmr.msra.gmra.mxu1 %vm1361_vm5, %v2725_v19 }
 0xf3a   : > { %6240 = vmatpush3.bf16.msra.mxu1 %v2796_v25 }
 0xff9   : > { %v6237_v27 = vpop.f32.mrf.mxu1 }
 0xffa   : > { %v2786_v23 = vpack.c.bf16 %v6237_v27, %v6237_v27 }
 0xffb   : > { %v2771_v15 = vpop.f32.mrf.mxu1 }
 0xffd   : > { %v6238_v31 = vpop.f32.mrf.mxu1 }
 0xfff   : > { %v2774_v16 = vpop.f32.mrf.mxu1 }
0x1000   : > { %v2785_v33 = vpack.c.bf16 %v2774_v16, %v2771_v15  ;;  %v6589_v16 = vld [vmem:[%s7925_s22 + $0x38] sm:$0xff]  }
0x1001   : > { %6253 = vmatprep.subr.bf16.mxu1 %v6589_v16 }
0x1002   : > { %6241 = vmatprep.mubr.msk.bf16.mxu1 %vm1297_vm4, %v2785_v33  ;;  %v6590_v33 = vld [vmem:[%s7925_s22 + $0x30] sm:$0xff]  }
0x1003   : > { %6242 = vmatmul.mubr.msk.bf16.vlgmr.msra.gmra.mxu1 %vm1297_vm4, %v2786_v23  ;;  %v6591_v23 = vld [vmem:[%s7925_s22 + $0x28] sm:$0xff]  }
0x1004   : > { %6254 = vmatpush3.bf16.msra.mxu1 %v6589_v16 }
0x1005   : > { %6255 = vmatprep.subr.bf16.mxu1 %v6590_v33 }
0x1008   : > { %6256 = vmatpush3.bf16.msra.mxu1 %v6590_v33 }
0x1009   : > { %6257 = vmatprep.subr.bf16.mxu1 %v6591_v23 }
0x100c   : > { %6258 = vmatpush3.bf16.msra.mxu1 %v6591_v23 }
0x10c3   : > { %v6243_v34 = vpop.f32.mrf.mxu1 }
0x10c4   : > { %v2848_v35 = vadd.f32 %v6243_v34, %v7355_v28  ;;  %v6592_v34 = vld [vmem:[%s7925_s22 + $0x20] sm:$0xff]  }
0x10c5   : > { %v2832_v26 = vpop.f32.mrf.mxu1  ;;  %6259 = vmatprep.subr.bf16.mxu1 %v6592_v34 }
0x10c6   : > { %v2846_v37 = vadd.f32 %v2832_v26, %v7357_v29  ;;  %v2851_v38 = vadd.f32 %v2848_v35, %v7080_v30  ;;  %v6593_v35 = vld [vmem:[%s7925_s22 + $0x18] sm:$0xff]   ;;  %6260 = vmatpush3.bf16.msra.mxu1 %v6592_v34  ;;  %v6594_v26 = vld [vmem:[%s7925_s22 + $0x10] sm:$0xff]  }
0x10c7   : > { %v6244_v36 = vpop.f32.mrf.mxu1  ;;  %6261 = vmatprep.subr.bf16.mxu1 %v6593_v35 }
0x10c8   : > { %v2849_v41 = vadd.f32 %v2846_v37, %v7069_v20  ;;  %v7398_v45 = vadd.f32 %v5607_v42, %v2851_v38  ;;  %v6595_v37 = vld [vmem:[%s7925_s22 + $0x8] sm:$0xff]   ;;  %v6596_v36 = vld [vmem:[%s7925_s22] sm:$0xff]  }
0x10c9   : > { %v2835_v39 = vpop.f32.mrf.mxu1  ;;  %v5610_v38 = vld [vmem:[%s7924_s21] ss:$0 sm:$0xff] }
0x10ca   : > { %v7395_v40 = vadd.f32 %v5607_v42, %v2849_v41  ;;  %v2847_v43 = vadd.f32 %v2835_v39, %v7364_v24  ;;  %v2870_v46 = vsel %vm1019_vm3, %v7398_v45, 0.0  ;;  %6262 = vmatpush3.bf16.msra.mxu1 %v6593_v35 }
0x10cb   : > { %6263 = vmatprep.subr.bf16.mxu1 %v6594_v26 }
0x10cc   : > { %v2850_v28 = vadd.f32 %v2847_v43, %v7082_v32  ;;  %v2864_v29 = vsel %vm883_vm1, %v7395_v40, 0.0 }
0x10cd   : > { %2865 = vadd.xlane.f32.xlu0 %v2864_v29 }
0x10ce   : > { %v7403_v30 = vadd.f32 %v5607_v42, %v2850_v28  ;;  %6264 = vmatpush3.bf16.msra.mxu1 %v6594_v26 }
0x10cf   : > { %6265 = vmatprep.subr.bf16.mxu1 %v6595_v37 }
0x10d0   : > { %v2867_v20 = vsel %vm883_vm1, %v7403_v30, 0.0 }
0x10d1   : > { %2868 = vadd.xlane.f32.xlu1 %v2867_v20  ;;  %2871 = vadd.xlane.f32.xlu0 %v2870_v46 }
0x10d2   : > { %6266 = vmatpush3.bf16.msra.mxu1 %v6595_v37 }
0x10d3   : > { %6267 = vmatprep.subr.bf16.mxu1 %v6596_v36 }
0x10d6   : > { %6268 = vmatpush3.bf16.msra.mxu1 %v6596_v36 }
0x1156   : > { %v2866_v47 = vpop.xlane.xlu0 %2865 }
0x1157   : > { %v2873_v24 = vmul.f32 0.03125, %v2866_v47 }
0x1159   : > { %v2876_v48 = vsub.f32 %v7395_v40, %v2873_v24 }
0x115a   : > { %v2869_v49 = vpop.xlane.xlu1 %2868  ;;  %v2872_v32 = vpop.xlane.xlu0 %2871 }
0x115b   : > { %v2874_v50 = vmul.f32 0.03125, %v2869_v49  ;;  %v2875_v51 = vmul.f32 0.03125, %v2872_v32  ;;  %v2879_v52 = vmul.f32 %v2876_v48, %v2876_v48 }
0x115d   : > { %v2877_v53 = vsub.f32 %v7403_v30, %v2874_v50  ;;  %v2878_v54 = vsub.f32 %v7398_v45, %v2875_v51  ;;  %v2882_v55 = vsel %vm883_vm1, %v2879_v52, 0.0 }
0x115e   : > { %2883 = vadd.xlane.f32.xlu1 %v2882_v55 }
0x115f   : > { %v2880_v56 = vmul.f32 %v2877_v53, %v2877_v53  ;;  %v2881_v13 = vmul.f32 %v2878_v54, %v2878_v54 }
0x1161   : > { %v2885_v57 = vsel %vm883_vm1, %v2880_v56, 0.0  ;;  %v2888_v58 = vsel %vm1019_vm3, %v2881_v13, 0.0 }
0x1162   : > { %2886 = vadd.xlane.f32.xlu0 %v2885_v57  ;;  %2889 = vadd.xlane.f32.xlu1 %v2888_v58 }
0x11e7   : > { %v2884_v61 = vpop.xlane.xlu1 %2883 }
0x11e8   : > { %v2891_v62 = vmul.f32 0.03125, %v2884_v61 }
0x11ea   : > { %v2894_v63 = vadd.f32 1e-05, %v2891_v62 }
0x11eb   : > { %v2890_v0 = vpop.xlane.xlu1 %2889  ;;  %v2887_v2 = vpop.xlane.xlu0 %2886 }
0x11ec   : > { %6687 = vrsqrt.f32 %v2894_v63  ;;  %v2893_v3 = vmul.f32 0.03125, %v2890_v0  ;;  %v2892_v4 = vmul.f32 0.03125, %v2887_v2 }
0x11ee   : > { %v2896_v5 = vadd.f32 1e-05, %v2893_v3  ;;  %v2895_v6 = vadd.f32 1e-05, %v2892_v4 }
0x11f0   : > { %6689 = vrsqrt.f32 %v2896_v5 }
0x11f1   : > { %6691 = vrsqrt.f32 %v2895_v6 }
0x11f9   : > { %v6688_v7 = vpop.eup %6687 }
0x11fa   : > { %v2900_v8 = vmul.f32 %v6688_v7, %v2876_v48 }
0x11fc   : > { %v2909_v17 = vmul.f32 %v5608_v9, %v2900_v8 }
0x11fd   : > { %v6690_v10 = vpop.eup %6689 }
0x11fe   : > { %v6692_v11 = vpop.eup %6691  ;;  %v2902_v12 = vmul.f32 %v6690_v10, %v2878_v54  ;;  %v2918_v25 = vadd.f32 %v5609_v18, %v2909_v17 }
0x11ff   : > { %v2901_v14 = vmul.f32 %v6692_v11, %v2877_v53 }
0x1200   : > { %v2911_v19 = vmul.f32 %v5608_v9, %v2902_v12 }
0x1201   : > { %v2910_v21 = vmul.f32 %v5608_v9, %v2901_v14  ;;  %v5623_v14 = vld [vmem:[%s7926_s23] ss:$0 sm:$0xff] }
0x1202   : > { %v2920_v22 = vadd.f32 %v5609_v18, %v2911_v19 }
0x1203   : > { %v2919_v27 = vadd.f32 %v5609_v18, %v2910_v21 }
0x1204   : > { %v2922_v15 = vpack.c.bf16 %v2920_v22, %v2920_v22 }
0x1205   : > { %v2921_v31 = vpack.c.bf16 %v2919_v27, %v2918_v25 }
0x1207   : > { %6249 = vmatprep.mubr.msk.bf16.mxu0 %vm883_vm1, %v2921_v31 }
0x1208   : > { %6250 = vmatmul.mubr.msk.bf16.vlgmr.msra.gmra.mxu0 %vm883_vm1, %v2922_v15 }
0x12c8   : > { %v6251_v41 = vpop.f32.mrf.mxu0 }
0x12c9   : > { %v2995_v42 = vadd.f32 %v6251_v41, %v5610_v38 }
0x12ca   : > { %v2986_v39 = vpop.f32.mrf.mxu0 }
0x12cb   : > { %v3005_v43 = vmul.f32 0.044715, %v2995_v42  ;;  %v2987_v28 = vadd.f32 %v5610_v38, %v2986_v39  ;;  %v3002_v63 = vmul.f32 0.5, %v2995_v42 }
0x12cc   : > { %v6252_v29 = vpop.f32.mrf.mxu0 }
0x12cd   : > { %v3008_v20 = vmul.f32 %v3005_v43, %v2995_v42  ;;  %v3003_v46 = vmul.f32 0.044715, %v2987_v28  ;;  %v3000_v0 = vmul.f32 0.5, %v2987_v28  ;;  %v6597_v43 = vld [vmem:[%s7987_s29 + $0x48] sm:$0xff]  }
0x12ce   : > { %v2989_v47 = vpop.f32.mrf.mxu0  ;;  %6273 = vmatprep.subr.bf16.mxu0 %v6597_v43  ;;  %v6599_v29 = vld [vmem:[%s7988_s1 + $0x48] sm:$0xff]  }
0x12cf   : > { %v3011_v24 = vmul.f32 %v3008_v20, %v2995_v42  ;;  %v3006_v48 = vmul.f32 %v3003_v46, %v2987_v28  ;;  %v2990_v49 = vadd.f32 %v5610_v38, %v2989_v47  ;;  %6274 = vmatpush3.bf16.msra.mxu0 %v6597_v43 }
0x12d1   : > { %v3014_v32 = vadd.f32 %v3011_v24, %v2995_v42  ;;  %v3009_v50 = vmul.f32 %v3006_v48, %v2987_v28  ;;  %v3004_v51 = vmul.f32 0.044715, %v2990_v49  ;;  %v3001_v2 = vmul.f32 0.5, %v2990_v49 }
0x12d3   : > { %v3017_v52 = vmul.f32 0.7978846, %v3014_v32  ;;  %v3007_v53 = vmul.f32 %v3004_v51, %v2990_v49  ;;  %v3012_v54 = vadd.f32 %v3009_v50, %v2987_v28  ;;  %v6598_v28 = vld [vmem:[%s7987_s29 + $0x40] sm:$0xff]  }
0x12d4   : > { %6275 = vmatprep.subr.bf16.mxu0 %v6598_v28 }
0x12d5   : > { %v3010_v55 = vmul.f32 %v3007_v53, %v2990_v49  ;;  %v3015_v56 = vmul.f32 0.7978846, %v3012_v54  ;;  %6693 = vtanh.f32 %v3017_v52  ;;  %6276 = vmatpush3.bf16.msra.mxu0 %v6598_v28  ;;  %v5626_v54 = vld [vmem:[%s7989_s2 + $0x1] ss:$0 sm:$0xff]  ;;  %s7994_s2 = smov %s7993_s8 }
0x12d6   : > { %6281 = vmatprep.subr.bf16.mxu0 %v6599_v29 }
0x12d7   : > { %v3013_v13 = vadd.f32 %v3010_v55, %v2990_v49  ;;  %6695 = vtanh.f32 %v3015_v56 }
0x12d9   : > { %v3016_v57 = vmul.f32 0.7978846, %v3013_v13 }
0x12db   : > { %6697 = vtanh.f32 %v3016_v57 }
0x12e2   : > { %v6694_v58 = vpop.eup %6693 }
0x12e3   : > { %v3023_v60 = vadd.f32 1.0, %v6694_v58  ;;  %v5627_v58 = vld [vmem:[%s7990_s0 + $0x1] ss:$0 sm:$0xff]  ;;  %s5821_s0 = sshll.u32 %s6999_s3, 4 }
0x12e4   : > { %v6696_v59 = vpop.eup %6695 }
0x12e5   : > { %v3021_v61 = vadd.f32 1.0, %v6696_v59  ;;  %v3026_v4 = vmul.f32 %v3023_v60, %v3002_v63 }
0x12e7   : > { %v3024_v5 = vmul.f32 %v3021_v61, %v3000_v0  ;;  %v3028_v8 = vpack.c.bf16 %v3026_v4, %v3026_v4  ;;  %v6600_v4 = vld [vmem:[%s7988_s1 + $0x40] sm:$0xff]  }
0x12e8   : > { %v6698_v62 = vpop.eup %6697 }
0x12e9   : > { %v3022_v3 = vadd.f32 1.0, %v6698_v62 }
0x12eb   : > { %v3025_v6 = vmul.f32 %v3022_v3, %v3001_v2 }
0x12ed   : > { %v3027_v7 = vpack.c.bf16 %v3025_v6, %v3024_v5  ;;  %v6601_v5 = vld [vmem:[%s7917_s14 + $0x48] sm:$0xff]   ;;  %v6602_v6 = vld [vmem:[%s7917_s14 + $0x40] sm:$0xff]  }
0x12ef   : > { %6269 = vmatprep.mubr.bf16.mxu1 %v3027_v7 }
0x12f0   : > { %6270 = vmatmul.mubr.bf16.vlgmr.msra.gmra.mxu1 %v3028_v8 }
0x13b0   : > { %v6271_v9 = vpop.f32.mrf.mxu1 }
0x13b1   : > { %v3143_v11 = vadd.f32 %v6271_v9, %v7398_v45 }
0x13b2   : > { %v3127_v10 = vpop.f32.mrf.mxu1 }
0x13b3   : > { %v3141_v12 = vadd.f32 %v3127_v10, %v7395_v40  ;;  %v7463_v21 = vadd.f32 %v5623_v14, %v3143_v11  ;;  %v5633_v10 = vld [vmem:[%s7991_s7 + $0x4] ss:$0 sm:$0xff] }
0x13b4   : > { %v6272_v17 = vpop.f32.mrf.mxu1 }
0x13b5   : > { %v7461_v18 = vadd.f32 %v5623_v14, %v3141_v12  ;;  %v3164_v40 = vsel %vm1019_vm3, %v7463_v21, 0.0  ;;  %v5643_v12 = vld [vmem:[%s7916_s13 + $0x4] ss:$0 sm:$0xff] }
0x13b6   : > { %v3130_v19 = vpop.f32.mrf.mxu1 }
0x13b7   : > { %v3142_v22 = vadd.f32 %v3130_v19, %v7403_v30  ;;  %v3158_v25 = vsel %vm883_vm1, %v7461_v18, 0.0 }
0x13b8   : > { %3159 = vadd.xlane.f32.xlu0 %v3158_v25 }
0x13b9   : > { %v7468_v27 = vadd.f32 %v5623_v14, %v3142_v22 }
0x13bb   : > { %v3161_v45 = vsel %vm883_vm1, %v7468_v27, 0.0 }
0x13bc   : > { %3165 = vadd.xlane.f32.xlu0 %v3164_v40  ;;  %3162 = vadd.xlane.f32.xlu1 %v3161_v45 }
0x1441   : > { %v3160_v15 = vpop.xlane.xlu0 %3159 }
0x1442   : > { %v3167_v31 = vmul.f32 0.03125, %v3160_v15 }
0x1444   : > { %v3170_v16 = vsub.f32 %v7461_v18, %v3167_v31 }
0x1445   : > { %v3166_v33 = vpop.xlane.xlu0 %3165  ;;  %v3163_v30 = vpop.xlane.xlu1 %3162 }
0x1446   : > { %v3169_v23 = vmul.f32 0.03125, %v3166_v33  ;;  %v3168_v34 = vmul.f32 0.03125, %v3163_v30  ;;  %v3173_v35 = vmul.f32 %v3170_v16, %v3170_v16  ;;  %v5653_v33 = vld [vmem:[%s7918_s15 + $0x4] ss:$0 sm:$0xff] }
0x1448   : > { %v3172_v26 = vsub.f32 %v7463_v21, %v3169_v23  ;;  %v3171_v37 = vsub.f32 %v7468_v27, %v3168_v34  ;;  %v3176_v36 = vsel %vm883_vm1, %v3173_v35, 0.0 }
0x1449   : > { %3177 = vadd.xlane.f32.xlu1 %v3176_v36 }
0x144a   : > { %v3175_v38 = vmul.f32 %v3172_v26, %v3172_v26  ;;  %v3174_v41 = vmul.f32 %v3171_v37, %v3171_v37 }
0x144c   : > { %v3182_v42 = vsel %vm1019_vm3, %v3175_v38, 0.0  ;;  %v3179_v39 = vsel %vm883_vm1, %v3174_v41, 0.0  ;;  %v6603_v38 = vld [vmem:[%s7988_s1 + $0x58] sm:$0xff]  }
0x144d   : > { %3183 = vadd.xlane.f32.xlu1 %v3182_v42  ;;  %3180 = vadd.xlane.f32.xlu0 %v3179_v39 }
0x14d2   : > { %v3178_v20 = vpop.xlane.xlu1 %3177 }
0x14d3   : > { %v3185_v46 = vmul.f32 0.03125, %v3178_v20 }
0x14d5   : > { %v3188_v47 = vadd.f32 1e-05, %v3185_v46 }
0x14d6   : > { %v3181_v24 = vpop.xlane.xlu0 %3180  ;;  %v3184_v48 = vpop.xlane.xlu1 %3183 }
0x14d7   : > { %6699 = vrsqrt.f32 %v3188_v47  ;;  %v3186_v49 = vmul.f32 0.03125, %v3181_v24  ;;  %v3187_v32 = vmul.f32 0.03125, %v3184_v48  ;;  %v6604_v24 = vld [vmem:[%s7988_s1 + $0x50] sm:$0xff]  }
0x14d9   : > { %v3189_v50 = vadd.f32 1e-05, %v3186_v49  ;;  %v3190_v51 = vadd.f32 1e-05, %v3187_v32 }
0x14db   : > { %6701 = vrsqrt.f32 %v3189_v50 }
0x14dc   : > { %6703 = vrsqrt.f32 %v3190_v51 }
0x14e4   : > { %v6700_v52 = vpop.eup %6699 }
0x14e5   : > { %v3194_v53 = vmul.f32 %v6700_v52, %v3170_v16 }
0x14e7   : > { %v3203_v13 = vmul.f32 %v5626_v54, %v3194_v53 }
0x14e8   : > { %v6702_v55 = vpop.eup %6701 }
0x14e9   : > { %v6704_v56 = vpop.eup %6703  ;;  %v3195_v57 = vmul.f32 %v6702_v55, %v3171_v37  ;;  %v3212_v62 = vadd.f32 %v5627_v58, %v3203_v13 }
0x14ea   : > { %v3196_v59 = vmul.f32 %v6704_v56, %v3172_v26 }
0x14eb   : > { %v3204_v60 = vmul.f32 %v5626_v54, %v3195_v57 }
0x14ec   : > { %v3205_v61 = vmul.f32 %v5626_v54, %v3196_v59  ;;  %v5678_v54 = vld [vmem:[%s7916_s13 + $0x5] ss:$0 sm:$0xff] }
0x14ed   : > { %v3213_v63 = vadd.f32 %v5627_v58, %v3204_v60 }
0x14ee   : > { %v3214_v0 = vadd.f32 %v5627_v58, %v3205_v61 }
0x14ef   : > { %v7495_v2 = vpack.c.bf16 %v3213_v63, %v3212_v62 }
0x14f0   : > { %v7497_v3 = vpack.c.bf16 %v3214_v0, %v3214_v0 }
0x14f1   : > { %6277 = vmatprep.mubr.msk.bf16.mxu0 %vm883_vm1, %v7495_v2 }
0x14f2   : > { %6278 = vmatmul.mubr.msk.bf16.vlgmr.msra.gmra.mxu0 %vm883_vm1, %v7497_v3 }
0x14f3   : > { %6282 = vmatpush3.bf16.msra.mxu0 %v6599_v29  ;;  %6285 = vmatprep.mubr.msk.bf16.mxu0 %vm883_vm1, %v7495_v2 }
0x14f4   : > { %6283 = vmatprep.subr.bf16.mxu0 %v6600_v4 }
0x14f7   : > { %6284 = vmatpush3.bf16.msra.mxu0 %v6600_v4 }
0x14f8   : > { %6289 = vmatprep.subr.bf16.mxu0 %v6601_v5 }
0x14fa   : > { %6286 = vmatmul.mubr.msk.bf16.vlgmr.msra.gmra.mxu0 %vm883_vm1, %v7497_v3 }
0x14fb   : > { %6290 = vmatpush3.bf16.msra.mxu0 %v6601_v5  ;;  %6293 = vmatprep.mubr.msk.bf16.mxu0 %vm883_vm1, %v7495_v2 }
0x14fc   : > { %6291 = vmatprep.subr.bf16.mxu0 %v6602_v6 }
0x14ff   : > { %6292 = vmatpush3.bf16.msra.mxu0 %v6602_v6 }
0x1502   : > { %6294 = vmatmul.mubr.msk.bf16.vlgmr.msra.gmra.mxu0 %vm883_vm1, %v7497_v3 }
0x15b2   : > { %v6279_v7 = vpop.f32.mrf.mxu0 }
0x15b3   : > { %v3291_v28 = vadd.f32 %v6279_v7, %v5633_v10 }
0x15b4   : > { %v3282_v8 = vpop.f32.mrf.mxu0 }
0x15b5   : > { %v3283_v14 = vadd.f32 %v5633_v10, %v3282_v8  ;;  %v3443_v47 = vpack.c.bf16 %v3291_v28, %v3291_v28  ;;  %v6608_v28 = vld [vmem:[%s7917_s14 + $0x50] sm:$0xff]  }
0x15b6   : > { %v6280_v9 = vpop.f32.mrf.mxu0 }
0x15b8   : > { %v3285_v11 = vpop.f32.mrf.mxu0 }
0x15b9   : > { %v3286_v17 = vadd.f32 %v5633_v10, %v3285_v11 }
0x15ba   : > { %v6287_v19 = vpop.f32.mrf.mxu0 }
0x15bb   : > { %v3442_v22 = vpack.c.bf16 %v3286_v17, %v3283_v14  ;;  %v3364_v25 = vadd.f32 %v6287_v19, %v5643_v12 }
0x15bc   : > { %v3355_v40 = vpop.f32.mrf.mxu0 }
0x15bd   : > { %v3445_v45 = vpack.c.bf16 %v3364_v25, %v3364_v25  ;;  %6301 = vmatprep.mubr.msk.bf16.mxu0 %vm1297_vm4, %v3442_v22  ;;  %v3356_v30 = vadd.f32 %v5643_v12, %v3355_v40 }
0x15be   : > { %v6288_v15 = vpop.f32.mrf.mxu0 }
0x15bf   : > { %v3456_v31 = vsel %vm1297_vm4, %v3445_v45, 0  ;;  %6505 = vmatprep.subr.msk.bf16.mxu0 %vm1297_vm4, %v3445_v45 }
0x15c0   : > { %v3358_v16 = vpop.f32.mrf.mxu0  ;;  %6298 = vmatpush3.bf16.xpose.msra.mxu0 %v3456_v31 }
0x15c1   : > { %v3359_v23 = vadd.f32 %v5643_v12, %v3358_v16  ;;  %v6605_v16 = vld [vmem:[%s7987_s29 + $0x58] sm:$0xff]  }
0x15c2   : > { %v6295_v34 = vpop.f32.mrf.mxu0 }
0x15c3   : > { %v3444_v35 = vpack.c.bf16 %v3359_v23, %v3356_v30  ;;  %v3437_v26 = vadd.f32 %v6295_v34, %v5653_v33 }
0x15c4   : > { %v3428_v37 = vpop.f32.mrf.mxu0 }
0x15c5   : > { %v3545_v36 = vpack.c.bf16 %v3437_v26, %v3437_v26  ;;  %6506 = vmatprep.subr.msk.bf16.mxu0 %vm1297_vm4, %v3444_v35  ;;  %v3453_v39 = vsel %vm1297_vm4, %v3444_v35, 0  ;;  %v3429_v29 = vadd.f32 %v5653_v33, %v3428_v37 }
0x15c6   : > { %v6296_v41 = vpop.f32.mrf.mxu0 }
0x15c7   : > { %v3553_v42 = vand.u32 %v3545_v36, %v7146_v44 }
0x15c8   : > { %v3431_v43 = vpop.f32.mrf.mxu0  ;;  %6300 = vmatpush3.bf16.xpose.msra.mxu0 %v3453_v39  ;;  %v6606_v39 = vld [vmem:[%s7987_s29 + $0x50] sm:$0xff]  }
0x15c9   : > { %v3432_v20 = vadd.f32 %v5653_v33, %v3431_v43  ;;  %6305 = vmatprep.subr.bf16.mxu1 %v3553_v42  ;;  %6321 = vmatprep.subr.bf16.mxu0 %v6603_v38  ;;  %v6607_v43 = vld [vmem:[%s7917_s14 + $0x58] sm:$0xff]  }
0x15ca   : > { %6306 = vmatpush3.bf16.msra.mxu1 %v3553_v42 }
0x15cb   : > { %v3544_v46 = vpack.c.bf16 %v3432_v20, %v3429_v29  ;;  %v5662_v29 = vld [vmem:[%s7919_s16 + $0x10] sm:$0xf] }
0x15cd   : > { %6307 = vmatprep.subr.bf16.mxu1 %v3544_v46 }
0x15ce   : > { %6308 = vmatpush3.bf16.msra.mxu1 %v3544_v46 }
0x15cf   : > { %6302 = vmatmul.mubr.msk.bf16.vlgmr.msra.gmra.mxu0 %vm1297_vm4, %v3443_v47  ;;  %6313 = vmatprep.subr.bf16.mxu1 %v6605_v16 }
0x15d0   : > { %6322 = vmatpush3.bf16.msra.mxu0 %v6603_v38  ;;  %6325 = vmatprep.mubr.msk.bf16.mxu0 %vm883_vm1, %v7495_v2 }
0x15d1   : > { %6323 = vmatprep.subr.bf16.mxu0 %v6604_v24 }
0x15d4   : > { %6324 = vmatpush3.bf16.msra.mxu0 %v6604_v24 }
0x15d7   : > { %6326 = vmatmul.mubr.msk.bf16.vlgmr.msra.gmra.mxu0 %vm883_vm1, %v7497_v3 }
0x168f   : > { %v6303_v48 = vpop.f32.mrf.mxu0 }
0x1690   : > { %v3508_v51 = vmul.f32 0.35355338, %v6303_v48 }
0x1691   : > { %v3492_v49 = vpop.f32.mrf.mxu0 }
0x1692   : > { %v3506_v32 = vmul.f32 0.35355338, %v3492_v49  ;;  %v3515_v57 = vsel %vm1368_vm6, %v3508_v51, -inf }
0x1693   : > { %v6304_v50 = vpop.f32.mrf.mxu0 }
0x1694   : > { %v3509_v52 = vsel %vm1361_vm5, %v3506_v32, -inf }
0x1695   : > { %3510 = vmax.xlane.f32.xlu0 %v3509_v52  ;;  %v3495_v53 = vpop.f32.mrf.mxu0 }
0x1696   : > { %v3507_v55 = vmul.f32 0.35355338, %v3495_v53  ;;  %v5688_v53 = vld [vmem:[%s7918_s15 + $0x5] ss:$0 sm:$0xff] }
0x1697   : > { %v6327_v56 = vpop.f32.mrf.mxu0 }
0x1698   : > { %v3748_v13 = vadd.f32 %v6327_v56, %v5678_v54  ;;  %v3512_v58 = vsel %vm1361_vm5, %v3507_v55, -inf }
0x1699   : > { %3516 = vmax.xlane.f32.xlu0 %v3515_v57  ;;  %v3739_v59 = vpop.f32.mrf.mxu0  ;;  %3513 = vmax.xlane.f32.xlu1 %v3512_v58 }
0x169a   : > { %v3829_v60 = vpack.c.bf16 %v3748_v13, %v3748_v13  ;;  %v3740_v0 = vadd.f32 %v5678_v54, %v3739_v59 }
0x169b   : > { %v6328_v61 = vpop.f32.mrf.mxu0 }
0x169c   : > { %v3840_v62 = vsel %vm1297_vm4, %v3829_v60, 0  ;;  %6507 = vmatprep.subr.msk.bf16.mxu0 %vm1297_vm4, %v3829_v60  ;;  %v4055_v60 = vsel %vm1852_vm7, %v5662_v29, 0  ;;  %v6609_v61 = vld [vmem:[%s7988_s1 + $0x68] sm:$0xff]  }
0x169d   : > { %v3742_v63 = vpop.f32.mrf.mxu0  ;;  %6338 = vmatpush3.bf16.xpose.msra.mxu0 %v3840_v62 }
0x169e   : > { %v3743_v4 = vadd.f32 %v5678_v54, %v3742_v63 }
0x16a0   : > { %v3828_v5 = vpack.c.bf16 %v3743_v4, %v3740_v0 }
0x16a2   : > { %6508 = vmatprep.subr.msk.bf16.mxu0 %vm1297_vm4, %v3828_v5  ;;  %v3837_v6 = vsel %vm1297_vm4, %v3828_v5, 0 }
0x16a5   : > { %6340 = vmatpush3.bf16.xpose.msra.mxu0 %v3837_v6 }
0x16a6   : > { %6510 = vmatprep.subr.msk.bf16.mxu0 %vm1852_vm7, %v5662_v29 }
0x171e   : > { %v3511_v7 = vpop.xlane.xlu0 %3510 }
0x171f   : > { %v3518_v8 = vsub.f32 %v3506_v32, %v3511_v7  ;;  %v5668_v32 = vld [vmem:[%s7991_s7 + $0x5] ss:$0 sm:$0xff] }
0x1721   : > { %v3521_v9 = vmul.f32 1.442695, %v3518_v8 }
0x1722   : > { %v3517_v10 = vpop.xlane.xlu0 %3516  ;;  %v3514_v11 = vpop.xlane.xlu1 %3513 }
0x1723   : > { %6705 = vpow2.f32 %v3521_v9  ;;  %v3520_v12 = vsub.f32 %v3508_v51, %v3517_v10  ;;  %v3519_v14 = vsub.f32 %v3507_v55, %v3514_v11  ;;  %v6610_v10 = vld [vmem:[%s7988_s1 + $0x60] sm:$0xff]  }
0x1725   : > { %v3525_v17 = vmul.f32 1.442695, %v3520_v12  ;;  %v3523_v19 = vmul.f32 1.442695, %v3519_v14 }
0x1727   : > { %6707 = vpow2.f32 %v3525_v17 }
0x1728   : > { %6709 = vpow2.f32 %v3523_v19 }
0x1730   : > { %v6706_v22 = vpop.eup %6705 }
0x1731   : > { %v3527_v25 = vsel %vm1361_vm5, %v6706_v22, 0.0 }
0x1732   : > { %3528 = vadd.xlane.f32.xlu1 %v3527_v25 }
0x1734   : > { %v6708_v40 = vpop.eup %6707 }
0x1735   : > { %v6710_v45 = vpop.eup %6709  ;;  %v3533_v15 = vsel %vm1368_vm6, %v6708_v40, 0.0 }
0x1736   : > { %3534 = vadd.xlane.f32.xlu1 %v3533_v15  ;;  %v3530_v31 = vsel %vm1361_vm5, %v6710_v45, 0.0 }
0x1737   : > { %3531 = vadd.xlane.f32.xlu0 %v3530_v31 }
0x17bb   : > { %v3529_v33 = vpop.xlane.xlu1 %3528 }
0x17bc   : > { %6711 = vrcp.f32 %v3529_v33 }
0x17bf   : > { %v3535_v30 = vpop.xlane.xlu1 %3534 }
0x17c0   : > { %v3532_v23 = vpop.xlane.xlu0 %3531  ;;  %6713 = vrcp.f32 %v3535_v30 }
0x17c1   : > { %6715 = vrcp.f32 %v3532_v23  ;;  %v5717_v23 = vld [vmem:[%s7916_s13 + $0x6] ss:$0 sm:$0xff] }
0x17c9   : > { %v6712_v34 = vpop.eup %6711 }
0x17ca   : > { %v3539_v36 = vmul.f32 %v6712_v34, %v6706_v22 }
0x17cd   : > { %v6714_v35 = vpop.eup %6713 }
0x17ce   : > { %v6716_v26 = vpop.eup %6715  ;;  %v3541_v37 = vmul.f32 %v6714_v35, %v6708_v40 }
0x17cf   : > { %v3540_v38 = vmul.f32 %v6716_v26, %v6710_v45 }
0x17d0   : > { %v3543_v41 = vpack.c.bf16 %v3541_v37, %v3541_v37 }
0x17d1   : > { %v3542_v42 = vpack.c.bf16 %v3540_v38, %v3539_v36 }
0x17d3   : > { %6309 = vmatprep.mubr.msk.bf16.mxu1 %vm1361_vm5, %v3542_v42 }
0x17d4   : > { %6310 = vmatmul.mubr.msk.bf16.vlgmr.msra.gmra.mxu1 %vm1361_vm5, %v3543_v41 }
0x17d5   : > { %6314 = vmatpush3.bf16.msra.mxu1 %v6605_v16  ;;  %6317 = vmatprep.mubr.msk.bf16.mxu1 %vm883_vm1, %v7495_v2 }
0x17d6   : > { %6315 = vmatprep.subr.bf16.mxu1 %v6606_v39 }
0x17d9   : > { %6316 = vmatpush3.bf16.msra.mxu1 %v6606_v39 }
0x17da   : > { %6329 = vmatprep.subr.bf16.mxu1 %v6607_v43 }
0x17dc   : > { %6318 = vmatmul.mubr.msk.bf16.vlgmr.msra.gmra.mxu1 %vm883_vm1, %v7497_v3 }
0x17dd   : > { %6330 = vmatpush3.bf16.msra.mxu1 %v6607_v43  ;;  %6333 = vmatprep.mubr.msk.bf16.mxu1 %vm883_vm1, %v7495_v2 }
0x17de   : > { %6331 = vmatprep.subr.bf16.mxu1 %v6608_v28 }
0x17e1   : > { %6332 = vmatpush3.bf16.msra.mxu1 %v6608_v28 }
0x17e4   : > { %6334 = vmatmul.mubr.msk.bf16.vlgmr.msra.gmra.mxu1 %vm883_vm1, %v7497_v3 }
0x1894   : > { %v6311_v20 = vpop.f32.mrf.mxu1 }
0x1895   : > { %v3604_v9 = vpack.c.bf16 %v6311_v20, %v6311_v20 }
0x1896   : > { %v3589_v46 = vpop.f32.mrf.mxu1 }
0x1898   : > { %v6312_v47 = vpop.f32.mrf.mxu1 }
0x189a   : > { %v3592_v24 = vpop.f32.mrf.mxu1 }
0x189b   : > { %v3603_v62 = vpack.c.bf16 %v3592_v24, %v3589_v46 }
0x189c   : > { %v6319_v48 = vpop.f32.mrf.mxu1 }
0x189d   : > { %v3675_v51 = vadd.f32 %v6319_v48, %v5668_v32 }
0x189e   : > { %v3666_v49 = vpop.f32.mrf.mxu1 }
0x189f   : > { %v3667_v54 = vadd.f32 %v5668_v32, %v3666_v49  ;;  %v3827_v58 = vpack.c.bf16 %v3675_v51, %v3675_v51 }
0x18a0   : > { %v6320_v50 = vpop.f32.mrf.mxu1 }
0x18a2   : > { %v3669_v52 = vpop.f32.mrf.mxu1 }
0x18a3   : > { %v3670_v55 = vadd.f32 %v5668_v32, %v3669_v52 }
0x18a4   : > { %v6335_v56 = vpop.f32.mrf.mxu1 }
0x18a5   : > { %v3826_v13 = vpack.c.bf16 %v3670_v55, %v3667_v54  ;;  %v3821_v57 = vadd.f32 %v6335_v56, %v5688_v53 }
0x18a6   : > { %v3812_v59 = vpop.f32.mrf.mxu1 }
0x18a7   : > { %v3929_v63 = vpack.c.bf16 %v3821_v57, %v3821_v57  ;;  %6341 = vmatprep.mubr.msk.bf16.mxu0 %vm1297_vm4, %v3826_v13  ;;  %v3813_v6 = vadd.f32 %v5688_v53, %v3812_v59 }
0x18a8   : > { %v6336_v0 = vpop.f32.mrf.mxu1  ;;  %6342 = vmatmul.mubr.msk.bf16.vlgmr.msra.gmra.mxu0 %vm1297_vm4, %v3827_v58 }
0x18a9   : > { %v3937_v4 = vand.u32 %v3929_v63, %v7146_v44  ;;  %6361 = vmatprep.mubr.msk.bf16.mxu0 %vm1297_vm4, %v3603_v62  ;;  %6360 = vmatpush3.bf16.msra.mxu0 %v4055_v60 }
0x18aa   : > { %v3815_v5 = vpop.f32.mrf.mxu1  ;;  %6373 = vmatprep.subr.bf16.mxu0 %v6609_v61 }
0x18ab   : > { %v3816_v7 = vadd.f32 %v5688_v53, %v3815_v5  ;;  %6345 = vmatprep.subr.bf16.mxu1 %v3937_v4 }
0x18ac   : > { %6346 = vmatpush3.bf16.msra.mxu1 %v3937_v4 }
0x18ad   : > { %v3928_v8 = vpack.c.bf16 %v3816_v7, %v3813_v6  ;;  %v5697_v6 = vld [vmem:[%s7919_s16 + $0x14] sm:$0xf] }
0x18ae   : > { %v3998_v7 = vsel %vm1852_vm7, %v5697_v6, 0 }
0x18af   : > { %6347 = vmatprep.subr.bf16.mxu1 %v3928_v8 }
0x18b0   : > { %6348 = vmatpush3.bf16.msra.mxu1 %v3928_v8  ;;  %6362 = vmatmul.mubr.msk.bf16.vlgmr.msra.gmra.mxu0 %vm1297_vm4, %v3604_v9  ;;  %v6611_v8 = vld [vmem:[%s7987_s29 + $0x68] sm:$0xff]  }
0x18b1   : > { %6374 = vmatpush3.bf16.msra.mxu0 %v6609_v61  ;;  %6377 = vmatprep.mubr.msk.bf16.mxu0 %vm883_vm1, %v7495_v2 }
0x18b2   : > { %6375 = vmatprep.subr.bf16.mxu0 %v6610_v10  ;;  %6509 = vmatprep.subr.msk.bf16.mxu1 %vm1852_vm7, %v5697_v6 }
0x18b5   : > { %6376 = vmatpush3.bf16.msra.mxu0 %v6610_v10 }
0x18b8   : > { %6378 = vmatmul.mubr.msk.bf16.vlgmr.msra.gmra.mxu0 %vm883_vm1, %v7497_v3 }
0x1968   : > { %v6343_v11 = vpop.f32.mrf.mxu0 }
0x1969   : > { %v3892_v19 = vmul.f32 0.35355338, %v6343_v11 }
0x196a   : > { %v3876_v12 = vpop.f32.mrf.mxu0 }
0x196b   : > { %v3890_v14 = vmul.f32 0.35355338, %v3876_v12  ;;  %v3899_v15 = vsel %vm1368_vm6, %v3892_v19, -inf }
0x196c   : > { %v6344_v17 = vpop.f32.mrf.mxu0 }
0x196d   : > { %v3893_v22 = vsel %vm1361_vm5, %v3890_v14, -inf }
0x196e   : > { %3894 = vmax.xlane.f32.xlu0 %v3893_v22  ;;  %v3879_v25 = vpop.f32.mrf.mxu0  ;;  %v6613_v22 = vld [vmem:[%s7917_s14 + $0x68] sm:$0xff]  }
0x196f   : > { %v3891_v40 = vmul.f32 0.35355338, %v3879_v25  ;;  %v6614_v25 = vld [vmem:[%s7917_s14 + $0x60] sm:$0xff]  }
0x1970   : > { %v7608_v45 = vpop.f32.mrf.mxu0 }
0x1971   : > { %v3896_v31 = vsel %vm1361_vm5, %v3891_v40, -inf }
0x1972   : > { %3900 = vmax.xlane.f32.xlu0 %v3899_v15  ;;  %3897 = vmax.xlane.f32.xlu1 %v3896_v31  ;;  %v7612_v16 = vpop.f32.mrf.mxu0 }
0x1974   : > { %v6364_v33 = vpop.f32.mrf.mxu0 }
0x1976   : > { %v7614_v30 = vpop.f32.mrf.mxu0 }
0x1978   : > { %v6379_v34 = vpop.f32.mrf.mxu0 }
0x1979   : > { %v4246_v35 = vadd.f32 %v6379_v34, %v5717_v23 }
0x197a   : > { %v4237_v26 = vpop.f32.mrf.mxu0 }
0x197b   : > { %v4327_v37 = vpack.c.bf16 %v4246_v35, %v4246_v35  ;;  %v4238_v42 = vadd.f32 %v5717_v23, %v4237_v26  ;;  %v5707_v26 = vld [vmem:[%s7991_s7 + $0x6] ss:$0 sm:$0xff] }
0x197c   : > { %v6380_v36 = vpop.f32.mrf.mxu0 }
0x197d   : > { %v4338_v38 = vsel %vm1297_vm4, %v4327_v37, 0  ;;  %6511 = vmatprep.subr.msk.bf16.mxu0 %vm1297_vm4, %v4327_v37 }
0x197e   : > { %v4240_v41 = vpop.f32.mrf.mxu0  ;;  %6390 = vmatpush3.bf16.xpose.msra.mxu0 %v4338_v38 }
0x197f   : > { %v4241_v39 = vadd.f32 %v5717_v23, %v4240_v41  ;;  %v5727_v41 = vld [vmem:[%s7918_s15 + $0x6] ss:$0 sm:$0xff] }
0x1981   : > { %v4326_v43 = vpack.c.bf16 %v4241_v39, %v4238_v42 }
0x1983   : > { %6512 = vmatprep.subr.msk.bf16.mxu0 %vm1297_vm4, %v4326_v43  ;;  %v4335_v28 = vsel %vm1297_vm4, %v4326_v43, 0 }
0x1986   : > { %6392 = vmatpush3.bf16.xpose.msra.mxu0 %v4335_v28 }
0x19f7   : > { %v3895_v29 = vpop.xlane.xlu0 %3894 }
0x19f8   : > { %v3902_v20 = vsub.f32 %v3890_v14, %v3895_v29 }
0x19fa   : > { %v3905_v46 = vmul.f32 1.442695, %v3902_v20 }
0x19fb   : > { %v3901_v47 = vpop.xlane.xlu0 %3900  ;;  %v3898_v24 = vpop.xlane.xlu1 %3897 }
0x19fc   : > { %6717 = vpow2.f32 %v3905_v46  ;;  %v3904_v48 = vsub.f32 %v3892_v19, %v3901_v47  ;;  %v3903_v49 = vsub.f32 %v3891_v40, %v3898_v24  ;;  %v6612_v19 = vld [vmem:[%s7987_s29 + $0x60] sm:$0xff]   ;;  %v6615_v40 = vld [vmem:[%s7987_s29 + $0x78] sm:$0xff]   ;;  %v6616_v47 = vld [vmem:[%s7987_s29 + $0x70] sm:$0xff]  }
0x19fd   : > { %6411 = vmatprep.subr.bf16.mxu0 %v6615_v40 }
0x19fe   : > { %v3909_v32 = vmul.f32 1.442695, %v3904_v48  ;;  %v3907_v50 = vmul.f32 1.442695, %v3903_v49 }
0x1a00   : > { %6719 = vpow2.f32 %v3909_v32 }
0x1a01   : > { %6721 = vpow2.f32 %v3907_v50  ;;  %v6617_v50 = vld [vmem:[%s7917_s14 + $0x78] sm:$0xff]  }
0x1a09   : > { %v6718_v51 = vpop.eup %6717 }
0x1a0a   : > { %v3911_v52 = vsel %vm1361_vm5, %v6718_v51, 0.0 }
0x1a0b   : > { %3912 = vadd.xlane.f32.xlu1 %v3911_v52 }
0x1a0d   : > { %v6720_v53 = vpop.eup %6719 }
0x1a0e   : > { %v6722_v54 = vpop.eup %6721  ;;  %v3917_v55 = vsel %vm1368_vm6, %v6720_v53, 0.0 }
0x1a0f   : > { %3918 = vadd.xlane.f32.xlu1 %v3917_v55  ;;  %v3914_v56 = vsel %vm1361_vm5, %v6722_v54, 0.0 }
0x1a10   : > { %3915 = vadd.xlane.f32.xlu0 %v3914_v56 }
0x1a94   : > { %v3913_v13 = vpop.xlane.xlu1 %3912 }
0x1a95   : > { %6723 = vrcp.f32 %v3913_v13 }
0x1a98   : > { %v3919_v57 = vpop.xlane.xlu1 %3918 }
0x1a99   : > { %v3916_v58 = vpop.xlane.xlu0 %3915  ;;  %6725 = vrcp.f32 %v3919_v57 }
0x1a9a   : > { %6727 = vrcp.f32 %v3916_v58 }
0x1aa2   : > { %v6724_v59 = vpop.eup %6723 }
0x1aa3   : > { %v3923_v63 = vmul.f32 %v6724_v59, %v6718_v51 }
0x1aa6   : > { %v6726_v60 = vpop.eup %6725 }
0x1aa7   : > { %v6728_v61 = vpop.eup %6727  ;;  %v3925_v62 = vmul.f32 %v6726_v60, %v6720_v53 }
0x1aa8   : > { %v3924_v0 = vmul.f32 %v6728_v61, %v6722_v54  ;;  %v6618_v54 = vld [vmem:[%s7917_s14 + $0x70] sm:$0xff]   ;;  %v5744_v61 = vld [vmem:[%s7991_s7 + $0x7] ss:$0 sm:$0xff]  ;;  %s7862_s7 = scalar_lea.hbm %s7993_s8, %s5821_s0 }
0x1aa9   : > { %v3927_v4 = vpack.c.bf16 %v3925_v62, %v3925_v62 }
0x1aaa   : > { %v3926_v5 = vpack.c.bf16 %v3924_v0, %v3923_v63 }
0x1aac   : > { %6349 = vmatprep.mubr.msk.bf16.mxu1 %vm1361_vm5, %v3926_v5 }
0x1aad   : > { %6350 = vmatmul.mubr.msk.bf16.vlgmr.msra.gmra.mxu1 %vm1361_vm5, %v3927_v4 }
0x1aae   : > { %6354 = vmatpush3.bf16.msra.mxu1 %v3998_v7 }
0x1aaf   : > { %6365 = vmatprep.subr.bf16.mxu1 %v6611_v8 }
0x1b6d   : > { %v6351_v9 = vpop.f32.mrf.mxu1 }
0x1b6e   : > { %v3988_v17 = vpack.c.bf16 %v6351_v9, %v6351_v9  ;;  %v5764_v9 = vld [vmem:[%s7918_s15 + $0x7] ss:$0 sm:$0xff] }
0x1b6f   : > { %v3973_v10 = vpop.f32.mrf.mxu1 }
0x1b71   : > { %v6352_v11 = vpop.f32.mrf.mxu1 }
0x1b73   : > { %v3976_v12 = vpop.f32.mrf.mxu1 }
0x1b74   : > { %v3987_v14 = vpack.c.bf16 %v3976_v12, %v3973_v10 }
0x1b76   : > { %6355 = vmatprep.mubr.msk.bf16.mxu1 %vm1297_vm4, %v3987_v14 }
0x1b77   : > { %6356 = vmatmul.mubr.msk.bf16.vlgmr.msra.gmra.mxu1 %vm1297_vm4, %v3988_v17 }
0x1b78   : > { %6366 = vmatpush3.bf16.msra.mxu1 %v6611_v8  ;;  %6369 = vmatprep.mubr.msk.bf16.mxu1 %vm883_vm1, %v7495_v2 }
0x1b79   : > { %6367 = vmatprep.subr.bf16.mxu1 %v6612_v19 }
0x1b7c   : > { %6368 = vmatpush3.bf16.msra.mxu1 %v6612_v19 }
0x1b7d   : > { %6381 = vmatprep.subr.bf16.mxu1 %v6613_v22 }
0x1b7f   : > { %6370 = vmatmul.mubr.msk.bf16.vlgmr.msra.gmra.mxu1 %vm883_vm1, %v7497_v3 }
0x1b80   : > { %6382 = vmatpush3.bf16.msra.mxu1 %v6613_v22  ;;  %6385 = vmatprep.mubr.msk.bf16.mxu1 %vm883_vm1, %v7495_v2 }
0x1b81   : > { %6383 = vmatprep.subr.bf16.mxu1 %v6614_v25 }
0x1b84   : > { %6384 = vmatpush3.bf16.msra.mxu1 %v6614_v25 }
0x1b87   : > { %6386 = vmatmul.mubr.msk.bf16.vlgmr.msra.gmra.mxu1 %vm883_vm1, %v7497_v3 }
0x1c37   : > { %v7658_v15 = vpop.f32.mrf.mxu1 }
0x1c39   : > { %v7660_v31 = vpop.f32.mrf.mxu1 }
0x1c3b   : > { %v6358_v33 = vpop.f32.mrf.mxu1 }
0x1c3d   : > { %v7662_v23 = vpop.f32.mrf.mxu1 }
0x1c3f   : > { %v6371_v34 = vpop.f32.mrf.mxu1 }
0x1c40   : > { %v4173_v36 = vadd.f32 %v6371_v34, %v5707_v26 }
0x1c41   : > { %v4164_v35 = vpop.f32.mrf.mxu1 }
0x1c42   : > { %v4165_v42 = vadd.f32 %v5707_v26, %v4164_v35  ;;  %v4325_v20 = vpack.c.bf16 %v4173_v36, %v4173_v36 }
0x1c43   : > { %v6372_v37 = vpop.f32.mrf.mxu1 }
0x1c45   : > { %v4167_v38 = vpop.f32.mrf.mxu1 }
0x1c46   : > { %v4168_v39 = vadd.f32 %v5707_v26, %v4167_v38 }
0x1c47   : > { %v6387_v43 = vpop.f32.mrf.mxu1 }
0x1c48   : > { %v4324_v28 = vpack.c.bf16 %v4168_v39, %v4165_v42  ;;  %v4319_v29 = vadd.f32 %v6387_v43, %v5727_v41 }
0x1c49   : > { %v4310_v46 = vpop.f32.mrf.mxu1 }
0x1c4a   : > { %v4427_v24 = vpack.c.bf16 %v4319_v29, %v4319_v29  ;;  %6393 = vmatprep.mubr.msk.bf16.mxu0 %vm1297_vm4, %v4324_v28  ;;  %v4311_v51 = vadd.f32 %v5727_v41, %v4310_v46 }
0x1c4b   : > { %v6388_v48 = vpop.f32.mrf.mxu1  ;;  %6394 = vmatmul.mubr.msk.bf16.vlgmr.msra.gmra.mxu0 %vm1297_vm4, %v4325_v20 }
0x1c4c   : > { %v4435_v49 = vand.u32 %v4427_v24, %v7146_v44  ;;  %6412 = vmatpush3.bf16.msra.mxu0 %v6615_v40  ;;  %6415 = vmatprep.mubr.msk.bf16.mxu0 %vm883_vm1, %v7495_v2 }
0x1c4d   : > { %v4313_v32 = vpop.f32.mrf.mxu1  ;;  %6413 = vmatprep.subr.bf16.mxu0 %v6616_v47 }
0x1c4e   : > { %v4314_v52 = vadd.f32 %v5727_v41, %v4313_v32  ;;  %6397 = vmatprep.subr.bf16.mxu1 %v4435_v49 }
0x1c4f   : > { %6398 = vmatpush3.bf16.msra.mxu1 %v4435_v49 }
0x1c50   : > { %v4426_v53 = vpack.c.bf16 %v4314_v52, %v4311_v51  ;;  %6414 = vmatpush3.bf16.msra.mxu0 %v6616_v47 }
0x1c51   : > { %6427 = vmatprep.subr.bf16.mxu0 %v6617_v50 }
0x1c52   : > { %6399 = vmatprep.subr.bf16.mxu1 %v4426_v53 }
0x1c53   : > { %6400 = vmatpush3.bf16.msra.mxu1 %v4426_v53  ;;  %6416 = vmatmul.mubr.msk.bf16.vlgmr.msra.gmra.mxu0 %vm883_vm1, %v7497_v3 }
0x1c54   : > { %6428 = vmatpush3.bf16.msra.mxu0 %v6617_v50  ;;  %6431 = vmatprep.mubr.msk.bf16.mxu0 %vm883_vm1, %v7495_v2 }
0x1c55   : > { %6429 = vmatprep.subr.bf16.mxu0 %v6618_v54 }
0x1c58   : > { %6430 = vmatpush3.bf16.msra.mxu0 %v6618_v54 }
0x1c5b   : > { %6432 = vmatmul.mubr.msk.bf16.vlgmr.msra.gmra.mxu0 %vm883_vm1, %v7497_v3 }
0x1d0b   : > { %v6395_v55 = vpop.f32.mrf.mxu0 }
0x1d0c   : > { %v4390_v58 = vmul.f32 0.35355338, %v6395_v55 }
0x1d0d   : > { %v4374_v56 = vpop.f32.mrf.mxu0 }
0x1d0e   : > { %v4388_v13 = vmul.f32 0.35355338, %v4374_v56  ;;  %v4397_v4 = vsel %vm1368_vm6, %v4390_v58, -inf }
0x1d0f   : > { %v6396_v57 = vpop.f32.mrf.mxu0 }
0x1d10   : > { %v4391_v59 = vsel %vm1361_vm5, %v4388_v13, -inf }
0x1d11   : > { %4392 = vmax.xlane.f32.xlu0 %v4391_v59  ;;  %v4377_v60 = vpop.f32.mrf.mxu0 }
0x1d12   : > { %v4389_v62 = vmul.f32 0.35355338, %v4377_v60  ;;  %v6619_v60 = vld [vmem:[%s7988_s1 + $0x78] sm:$0xff]  }
0x1d13   : > { %v6417_v63 = vpop.f32.mrf.mxu0 }
0x1d14   : > { %v7694_v0 = vadd.f32 %v6417_v63, %v5744_v61  ;;  %v4394_v5 = vsel %vm1361_vm5, %v4389_v62, -inf }
0x1d15   : > { %4398 = vmax.xlane.f32.xlu0 %v4397_v4  ;;  %v4608_v6 = vpop.f32.mrf.mxu0  ;;  %4395 = vmax.xlane.f32.xlu1 %v4394_v5 }
0x1d16   : > { %v7701_v10 = vadd.f32 %v5744_v61, %v4608_v6 }
0x1d17   : > { %v6418_v7 = vpop.f32.mrf.mxu0 }
0x1d18   : > { %v6620_v7 = vld [vmem:[%s7988_s1 + $0x70] sm:$0xff]   ;;  %s848_s1 = scalar_lea.vmem [#allocation2], %s847_s4 }
0x1d19   : > { %v4611_v8 = vpop.f32.mrf.mxu0  ;;  %s5392_s10 = sshll.u32 %s848_s1, 4  ;;  %s7864_s10 = int_to_ptr.vmem [resolvable:$true] %s5392_s10 }
0x1d1a   : > { %v7703_v11 = vadd.f32 %v5744_v61, %v4611_v8  ;;  %v4100_v8 = vadd.f32 %v7608_v45, %v7658_v15  ;;  %s6767_s3 = scalar_lea.vmem %s7864_s10, 16  ;;  %p6774_p0 = scmp.lt.s32.totalorder %s7864_s10, %s6772_s12 }
0x1d1b   : > { %v6433_v12 = vpop.f32.mrf.mxu0  ;;  %p6768_p11 = scmp.ne.s32.totalorder %s7864_s10, %s6767_s3  ;;  %p6775_p1 = scmp.lt.s32.totalorder %s6773_s6, %s6767_s3 }
0x1d1c   : > { %v4768_v14 = vpack.c.bf16 %v7703_v11, %v7701_v10  ;;  %v4763_v17 = vadd.f32 %v6433_v12, %v5764_v9  ;;  %v4092_v12 = vadd.f32 %v7612_v16, %v7660_v31  ;;  %v5754_v10 = vld [vmem:[%s7916_s13 + $0x7] ss:$0 sm:$0xff] }
0x1d1d   : > { %v4754_v19 = vpop.f32.mrf.mxu0  ;;  %p6769_p12 = pnand %p6768_p11, %p7016_p5  ;;  %p6776_p2 = por %p6775_p1, %p6774_p0 }
0x1d1e   : > { %v4871_v22 = vpack.c.bf16 %v4763_v17, %v4763_v17  ;;  %v4755_v34 = vadd.f32 %v5764_v9, %v4754_v19 }
0x1d1f   : > { %v6434_v25 = vpop.f32.mrf.mxu0  ;;  %p6770_p13 = pneg %p6769_p12 }
0x1d20   : > { %v4879_v40 = vand.u32 %v4871_v22, %v7146_v44 }
0x1d21   : > { %v4757_v33 = vpop.f32.mrf.mxu0  ;;  %p6777_p3 = pnand %p6776_p2, %p6770_p13 }
0x1d22   : > { %v4758_v35 = vadd.f32 %v5764_v9, %v4757_v33  ;;  %6443 = vmatprep.subr.bf16.mxu0 %v4879_v40 }
0x1d23   : > { %6444 = vmatpush3.bf16.msra.mxu0 %v4879_v40 }
0x1d24   : > { %v4870_v26 = vpack.c.bf16 %v4758_v35, %v4755_v34 }
0x1d26   : > { %6445 = vmatprep.subr.bf16.mxu0 %v4870_v26 }
0x1d27   : > { %6446 = vmatpush3.bf16.msra.mxu0 %v4870_v26  ;;  %v4769_v26 = vpack.c.bf16 %v7694_v0, %v7694_v0 }
0x1d9a   : > { %v4393_v37 = vpop.xlane.xlu0 %4392 }
0x1d9b   : > { %v4400_v36 = vsub.f32 %v4388_v13, %v4393_v37 }
0x1d9d   : > { %v4403_v38 = vmul.f32 1.442695, %v4400_v36 }
0x1d9e   : > { %v4399_v41 = vpop.xlane.xlu0 %4398  ;;  %v4396_v42 = vpop.xlane.xlu1 %4395 }
0x1d9f   : > { %6729 = vpow2.f32 %v4403_v38  ;;  %v4402_v39 = vsub.f32 %v4390_v58, %v4399_v41  ;;  %v4401_v43 = vsub.f32 %v4389_v62, %v4396_v42  ;;  %v5736_v58 = vld [vmem:[%s7919_s16 + $0x18] sm:$0xf] }
0x1da0   : > { %6513 = vmatprep.subr.msk.bf16.mxu1 %vm1852_vm7, %v5736_v58  ;;  %v4496_v59 = vsel %vm1852_vm7, %v5736_v58, 0 }
0x1da1   : > { %v4407_v28 = vmul.f32 1.442695, %v4402_v39  ;;  %v4405_v29 = vmul.f32 1.442695, %v4401_v43 }
0x1da3   : > { %6731 = vpow2.f32 %v4407_v28 }
0x1da4   : > { %6733 = vpow2.f32 %v4405_v29 }
0x1dac   : > { %v6730_v44 = vpop.eup %6729 }
0x1dad   : > { %v4409_v20 = vsel %vm1361_vm5, %v6730_v44, 0.0 }
0x1dae   : > { %4410 = vadd.xlane.f32.xlu1 %v4409_v20 }
0x1db0   : > { %v6732_v46 = vpop.eup %6731 }
0x1db1   : > { %v6734_v47 = vpop.eup %6733  ;;  %v4415_v24 = vsel %vm1368_vm6, %v6732_v46, 0.0 }
0x1db2   : > { %4416 = vadd.xlane.f32.xlu1 %v4415_v24  ;;  %v4412_v48 = vsel %vm1361_vm5, %v6734_v47, 0.0 }
0x1db3   : > { %4413 = vadd.xlane.f32.xlu0 %v4412_v48 }
0x1e37   : > { %v4411_v49 = vpop.xlane.xlu1 %4410 }
0x1e38   : > { %6735 = vrcp.f32 %v4411_v49 }
0x1e3b   : > { %v4417_v32 = vpop.xlane.xlu1 %4416 }
0x1e3c   : > { %v4414_v50 = vpop.xlane.xlu0 %4413  ;;  %6737 = vrcp.f32 %v4417_v32 }
0x1e3d   : > { %6739 = vrcp.f32 %v4414_v50 }
0x1e45   : > { %v6736_v51 = vpop.eup %6735 }
0x1e46   : > { %v4421_v55 = vmul.f32 %v6736_v51, %v6730_v44 }
0x1e49   : > { %v6738_v52 = vpop.eup %6737 }
0x1e4a   : > { %v6740_v53 = vpop.eup %6739  ;;  %v4423_v54 = vmul.f32 %v6738_v52, %v6732_v46 }
0x1e4b   : > { %v4422_v56 = vmul.f32 %v6740_v53, %v6734_v47 }
0x1e4c   : > { %v4425_v13 = vpack.c.bf16 %v4423_v54, %v4423_v54 }
0x1e4d   : > { %v4424_v57 = vpack.c.bf16 %v4422_v56, %v4421_v55 }
0x1e4f   : > { %6401 = vmatprep.mubr.msk.bf16.mxu1 %vm1361_vm5, %v4424_v57 }
0x1e50   : > { %6402 = vmatmul.mubr.msk.bf16.vlgmr.msra.gmra.mxu1 %vm1361_vm5, %v4425_v13 }
0x1e51   : > { %6406 = vmatpush3.bf16.msra.mxu1 %v4496_v59 }
0x1e52   : > { %6419 = vmatprep.subr.bf16.mxu1 %v6619_v60 }
0x1f10   : > { %v6403_v61 = vpop.f32.mrf.mxu1 }
0x1f11   : > { %v4486_v6 = vpack.c.bf16 %v6403_v61, %v6403_v61 }
0x1f12   : > { %v4471_v62 = vpop.f32.mrf.mxu1 }
0x1f14   : > { %v6404_v63 = vpop.f32.mrf.mxu1 }
0x1f16   : > { %v4474_v4 = vpop.f32.mrf.mxu1 }
0x1f17   : > { %v4485_v5 = vpack.c.bf16 %v4474_v4, %v4471_v62 }
0x1f19   : > { %6407 = vmatprep.mubr.msk.bf16.mxu1 %vm1297_vm4, %v4485_v5 }
0x1f1a   : > { %6408 = vmatmul.mubr.msk.bf16.vlgmr.msra.gmra.mxu1 %vm1297_vm4, %v4486_v6 }
0x1f1b   : > { %6420 = vmatpush3.bf16.msra.mxu1 %v6619_v60  ;;  %6423 = vmatprep.mubr.msk.bf16.mxu1 %vm883_vm1, %v7495_v2 }
0x1f1c   : > { %6421 = vmatprep.subr.bf16.mxu1 %v6620_v7 }
0x1f1f   : > { %6422 = vmatpush3.bf16.msra.mxu1 %v6620_v7  ;;  %v5773_v7 = vld [vmem:[%s7919_s16 + $0x1c] sm:$0xf] }
0x1f20   : > { %6516 = vmatprep.subr.msk.bf16.mxu0 %vm1852_vm7, %v5773_v7 }
0x1f22   : > { %6424 = vmatmul.mubr.msk.bf16.vlgmr.msra.gmra.mxu1 %vm883_vm1, %v7497_v3  ;;  %v4095_v3 = vadd.f32 %v7614_v30, %v7662_v23 }
0x1f23   : > { %6439 = vmatprep.mubr.msk.bf16.mxu1 %vm1297_vm4, %v4768_v14 }
0x1fda   : > { %v6409_v9 = vpop.f32.mrf.mxu1 }
0x1fdb   : > { %v7738_v17 = vadd.f32 %v6409_v9, %v4100_v8  ;;  %v4940_v8 = vsel %vm1852_vm7, %v5773_v7, 0 }
0x1fdc   : > { %v4532_v2 = vpop.f32.mrf.mxu1 }
0x1fdd   : > { %v7740_v19 = vadd.f32 %v4532_v2, %v4092_v12 }
0x1fde   : > { %v6410_v22 = vpop.f32.mrf.mxu1 }
0x1fe0   : > { %v4535_v25 = vpop.f32.mrf.mxu1 }
0x1fe1   : > { %v7747_v11 = vadd.f32 %v4535_v25, %v4095_v3 }
0x1fe2   : > { %v6425_v45 = vpop.f32.mrf.mxu1 }
0x1fe3   : > { %v4690_v15 = vadd.f32 %v6425_v45, %v5754_v10 }
0x1fe4   : > { %v4681_v14 = vpop.f32.mrf.mxu1 }
0x1fe5   : > { %v4771_v16 = vpack.c.bf16 %v4690_v15, %v4690_v15  ;;  %v4682_v34 = vadd.f32 %v5754_v10, %v4681_v14 }
0x1fe6   : > { %v6426_v31 = vpop.f32.mrf.mxu1 }
0x1fe7   : > { %v4782_v40 = vsel %vm1297_vm4, %v4771_v16, 0  ;;  %6514 = vmatprep.subr.msk.bf16.mxu1 %vm1297_vm4, %v4771_v16 }
0x1fe8   : > { %v4684_v33 = vpop.f32.mrf.mxu1  ;;  %6436 = vmatpush3.bf16.xpose.msra.mxu1 %v4782_v40 }
0x1fe9   : > { %v4685_v30 = vadd.f32 %v5754_v10, %v4684_v33  ;;  %v5777_v33 = vld [vmem:[%s7920_s17 + $0x1] ss:$0 sm:$0xff] }
0x1feb   : > { %v4770_v23 = vpack.c.bf16 %v4685_v30, %v4682_v34 }
0x1fed   : > { %6515 = vmatprep.subr.msk.bf16.mxu1 %vm1297_vm4, %v4770_v23  ;;  %v4779_v35 = vsel %vm1297_vm4, %v4770_v23, 0 }
0x1ff0   : > { %6438 = vmatpush3.bf16.xpose.msra.mxu1 %v4779_v35 }
0x1ff7   : > { %6440 = vmatmul.mubr.msk.bf16.vlgmr.msra.gmra.mxu1 %vm1297_vm4, %v4769_v26 }
0x20b7   : > { %v6441_v37 = vpop.f32.mrf.mxu1 }
0x20b8   : > { %v4834_v42 = vmul.f32 0.35355338, %v6441_v37 }
0x20b9   : > { %v4818_v36 = vpop.f32.mrf.mxu1 }
0x20ba   : > { %v4832_v38 = vmul.f32 0.35355338, %v4818_v36  ;;  %v4841_v29 = vsel %vm1368_vm6, %v4834_v42, -inf }
0x20bb   : > { %v6442_v41 = vpop.f32.mrf.mxu1 }
0x20bc   : > { %v4835_v39 = vsel %vm1361_vm5, %v4832_v38, -inf }
0x20bd   : > { %4836 = vmax.xlane.f32.xlu0 %v4835_v39  ;;  %v4821_v43 = vpop.f32.mrf.mxu1 }
0x20be   : > { %v4833_v28 = vmul.f32 0.35355338, %v4821_v43 }
0x20c0   : > { %v4838_v44 = vsel %vm1361_vm5, %v4833_v28, -inf }
0x20c1   : > { %4842 = vmax.xlane.f32.xlu0 %v4841_v29  ;;  %4839 = vmax.xlane.f32.xlu1 %v4838_v44 }
0x2146   : > { %v4837_v20 = vpop.xlane.xlu0 %4836 }
0x2147   : > { %v4844_v0 = vsub.f32 %v4832_v38, %v4837_v20 }
0x2149   : > { %v4847_v46 = vmul.f32 1.442695, %v4844_v0 }
0x214a   : > { %v4843_v47 = vpop.xlane.xlu0 %4842  ;;  %v4840_v24 = vpop.xlane.xlu1 %4839 }
0x214b   : > { %6741 = vpow2.f32 %v4847_v46  ;;  %v4846_v48 = vsub.f32 %v4834_v42, %v4843_v47  ;;  %v4845_v49 = vsub.f32 %v4833_v28, %v4840_v24  ;;  %v6621_v47 = vld [vmem:[%s7923_s20 + $0x18] sm:$0xff]   ;;  %v6622_v24 = vld [vmem:[%s7923_s20 + $0x10] sm:$0xff]  }
0x214c   : > { %6457 = vmatprep.subr.bf16.mxu1 %v6621_v47 }
0x214d   : > { %v4851_v32 = vmul.f32 1.442695, %v4846_v48  ;;  %v4849_v50 = vmul.f32 1.442695, %v4845_v49  ;;  %6458 = vmatpush3.bf16.msra.mxu1 %v6621_v47 }
0x214e   : > { %6459 = vmatprep.subr.bf16.mxu1 %v6622_v24 }
0x214f   : > { %6743 = vpow2.f32 %v4851_v32 }
0x2150   : > { %6745 = vpow2.f32 %v4849_v50 }
0x2151   : > { %6460 = vmatpush3.bf16.msra.mxu1 %v6622_v24 }
0x2152   : > { %6485 = vmatprep.subr.bf16.mxu1 %v6829_v1 }
0x2158   : > { %v6742_v51 = vpop.eup %6741 }
0x2159   : > { %v4853_v52 = vsel %vm1361_vm5, %v6742_v51, 0.0 }
0x215a   : > { %4854 = vadd.xlane.f32.xlu1 %v4853_v52 }
0x215c   : > { %v6744_v53 = vpop.eup %6743 }
0x215d   : > { %v6746_v54 = vpop.eup %6745  ;;  %v4859_v55 = vsel %vm1368_vm6, %v6744_v53, 0.0 }
0x215e   : > { %4860 = vadd.xlane.f32.xlu1 %v4859_v55  ;;  %v4856_v56 = vsel %vm1361_vm5, %v6746_v54, 0.0 }
0x215f   : > { %4857 = vadd.xlane.f32.xlu0 %v4856_v56 }
0x21e3   : > { %v4855_v13 = vpop.xlane.xlu1 %4854 }
0x21e4   : > { %6747 = vrcp.f32 %v4855_v13 }
0x21e7   : > { %v4861_v57 = vpop.xlane.xlu1 %4860 }
0x21e8   : > { %v4858_v58 = vpop.xlane.xlu0 %4857  ;;  %6749 = vrcp.f32 %v4861_v57  ;;  %v5780_v57 = vld [vmem:[%s7921_s18 + $0x1] ss:$0 sm:$0xff] }
0x21e9   : > { %6751 = vrcp.f32 %v4858_v58 }
0x21f1   : > { %v6748_v59 = vpop.eup %6747 }
0x21f2   : > { %v4865_v63 = vmul.f32 %v6748_v59, %v6742_v51 }
0x21f5   : > { %v6750_v60 = vpop.eup %6749 }
0x21f6   : > { %v6752_v61 = vpop.eup %6751  ;;  %v4867_v62 = vmul.f32 %v6750_v60, %v6744_v53 }
0x21f7   : > { %v4866_v4 = vmul.f32 %v6752_v61, %v6746_v54 }
0x21f8   : > { %v4869_v5 = vpack.c.bf16 %v4867_v62, %v4867_v62 }
0x21f9   : > { %v4868_v6 = vpack.c.bf16 %v4866_v4, %v4865_v63  ;;  %v5781_v63 = vld [vmem:[%s7922_s19 + $0x1] ss:$0 sm:$0xff] }
0x21fb   : > { %6447 = vmatprep.mubr.msk.bf16.mxu0 %vm1361_vm5, %v4868_v6 }
0x21fc   : > { %6448 = vmatmul.mubr.msk.bf16.vlgmr.msra.gmra.mxu0 %vm1361_vm5, %v4869_v5 }
0x21fd   : > { %6452 = vmatpush3.bf16.msra.mxu0 %v4940_v8 }
0x22bc   : > { %v6449_v9 = vpop.f32.mrf.mxu0 }
0x22bd   : > { %v4930_v25 = vpack.c.bf16 %v6449_v9, %v6449_v9 }
0x22be   : > { %v4915_v12 = vpop.f32.mrf.mxu0 }
0x22c0   : > { %v6450_v2 = vpop.f32.mrf.mxu0 }
0x22c1   : > { %v6623_v2 = vld [vmem:[%s7925_s22 + $0x78] sm:$0xff]  }
0x22c2   : > { %v4918_v22 = vpop.f32.mrf.mxu0  ;;  %6465 = vmatprep.subr.bf16.mxu0 %v6623_v2 }
0x22c3   : > { %v4929_v3 = vpack.c.bf16 %v4918_v22, %v4915_v12  ;;  %v6624_v22 = vld [vmem:[%s7925_s22 + $0x70] sm:$0xff]  }
0x22c5   : > { %6453 = vmatprep.mubr.msk.bf16.mxu0 %vm1297_vm4, %v4929_v3  ;;  %v6625_v3 = vld [vmem:[%s7925_s22 + $0x68] sm:$0xff]  }
0x22c6   : > { %6454 = vmatmul.mubr.msk.bf16.vlgmr.msra.gmra.mxu0 %vm1297_vm4, %v4930_v25  ;;  %v6626_v25 = vld [vmem:[%s7925_s22 + $0x60] sm:$0xff]  }
0x22c7   : > { %6466 = vmatpush3.bf16.msra.mxu0 %v6623_v2 }
0x22c8   : > { %6467 = vmatprep.subr.bf16.mxu0 %v6624_v22 }
0x22cb   : > { %6468 = vmatpush3.bf16.msra.mxu0 %v6624_v22  ;;  %v5299_v22 = vld [vmem:[%s7927_s24] sm:$0x1] }
0x22cc   : > { %6469 = vmatprep.subr.bf16.mxu0 %v6625_v3 }
0x22cf   : > { %6470 = vmatpush3.bf16.msra.mxu0 %v6625_v3 }
0x22d0   : > { %6471 = vmatprep.subr.bf16.mxu0 %v6626_v25 }
0x22d3   : > { %6472 = vmatpush3.bf16.msra.mxu0 %v6626_v25  ;;  %v5300_v25 = vld [vmem:[%s7928_s25] sm:$0x1] }
0x2386   : > { %v6455_v10 = vpop.f32.mrf.mxu0 }
0x2387   : > { %v4992_v45 = vadd.f32 %v6455_v10, %v7738_v17  ;;  %v6627_v10 = vld [vmem:[%s7925_s22 + $0x58] sm:$0xff]  }
0x2388   : > { %v4976_v15 = vpop.f32.mrf.mxu0  ;;  %6473 = vmatprep.subr.bf16.mxu0 %v6627_v10 }
0x2389   : > { %v4990_v14 = vadd.f32 %v4976_v15, %v7740_v19  ;;  %v4995_v31 = vadd.f32 %v4992_v45, %v7463_v21  ;;  %v6628_v45 = vld [vmem:[%s7925_s22 + $0x50] sm:$0xff]   ;;  %6474 = vmatpush3.bf16.msra.mxu0 %v6627_v10  ;;  %v6629_v15 = vld [vmem:[%s7925_s22 + $0x48] sm:$0xff]  }
0x238a   : > { %v6456_v16 = vpop.f32.mrf.mxu0  ;;  %6475 = vmatprep.subr.bf16.mxu0 %v6628_v45 }
0x238b   : > { %v4993_v40 = vadd.f32 %v4990_v14, %v7461_v18  ;;  %v5006_v19 = vadd.f32 %v5777_v33, %v4995_v31  ;;  %v6630_v14 = vld [vmem:[%s7925_s22 + $0x40] sm:$0xff]  }
0x238c   : > { %v4979_v34 = vpop.f32.mrf.mxu0  ;;  %v5787_v16 = vld [vmem:[%s7924_s21 + $0x1] ss:$0 sm:$0xff] }
0x238d   : > { %v7778_v30 = vadd.f32 %v5777_v33, %v4993_v40  ;;  %v4991_v23 = vadd.f32 %v4979_v34, %v7747_v11  ;;  %v5017_v18 = vsel %vm1019_vm3, %v5006_v19, 0.0  ;;  %6476 = vmatpush3.bf16.msra.mxu0 %v6628_v45 }
0x238e   : > { %6477 = vmatprep.subr.bf16.mxu0 %v6629_v15 }
0x238f   : > { %v4994_v35 = vadd.f32 %v4991_v23, %v7468_v27  ;;  %v5011_v17 = vsel %vm883_vm1, %v7778_v30, 0.0 }
0x2390   : > { %5012 = vadd.xlane.f32.xlu0 %v5011_v17 }
0x2391   : > { %v5005_v26 = vadd.f32 %v5777_v33, %v4994_v35  ;;  %6478 = vmatpush3.bf16.msra.mxu0 %v6629_v15 }
0x2392   : > { %6479 = vmatprep.subr.bf16.mxu0 %v6630_v14 }
0x2393   : > { %v5014_v21 = vsel %vm883_vm1, %v5005_v26, 0.0 }
0x2394   : > { %5015 = vadd.xlane.f32.xlu1 %v5014_v21  ;;  %5018 = vadd.xlane.f32.xlu0 %v5017_v18 }
0x2395   : > { %6480 = vmatpush3.bf16.msra.mxu0 %v6630_v14 }
0x2419   : > { %v5013_v37 = vpop.xlane.xlu0 %5012 }
0x241a   : > { %v5020_v36 = vmul.f32 0.03125, %v5013_v37 }
0x241c   : > { %v5023_v38 = vsub.f32 %v7778_v30, %v5020_v36 }
0x241d   : > { %v5016_v41 = vpop.xlane.xlu1 %5015  ;;  %v5019_v11 = vpop.xlane.xlu0 %5018 }
0x241e   : > { %v5021_v42 = vmul.f32 0.03125, %v5016_v41  ;;  %v5022_v27 = vmul.f32 0.03125, %v5019_v11  ;;  %v5026_v39 = vmul.f32 %v5023_v38, %v5023_v38 }
0x2420   : > { %v5024_v43 = vsub.f32 %v5005_v26, %v5021_v42  ;;  %v5025_v28 = vsub.f32 %v5006_v19, %v5022_v27  ;;  %v5029_v29 = vsel %vm883_vm1, %v5026_v39, 0.0 }
0x2421   : > { %5030 = vadd.xlane.f32.xlu1 %v5029_v29 }
0x2422   : > { %v5027_v44 = vmul.f32 %v5024_v43, %v5024_v43  ;;  %v5028_v20 = vmul.f32 %v5025_v28, %v5025_v28 }
0x2424   : > { %v5032_v0 = vsel %vm883_vm1, %v5027_v44, 0.0  ;;  %v5035_v46 = vsel %vm1019_vm3, %v5028_v20, 0.0 }
0x2425   : > { %5033 = vadd.xlane.f32.xlu0 %v5032_v0  ;;  %5036 = vadd.xlane.f32.xlu1 %v5035_v46 }
0x24aa   : > { %v5031_v48 = vpop.xlane.xlu1 %5030 }
0x24ab   : > { %v5038_v49 = vmul.f32 0.03125, %v5031_v48 }
0x24ad   : > { %v5041_v32 = vadd.f32 1e-05, %v5038_v49 }
0x24ae   : > { %v5037_v50 = vpop.xlane.xlu1 %5036  ;;  %v5034_v51 = vpop.xlane.xlu0 %5033 }
0x24af   : > { %6753 = vrsqrt.f32 %v5041_v32  ;;  %v5040_v52 = vmul.f32 0.03125, %v5037_v50  ;;  %v5039_v53 = vmul.f32 0.03125, %v5034_v51 }
0x24b1   : > { %v5043_v54 = vadd.f32 1e-05, %v5040_v52  ;;  %v5042_v55 = vadd.f32 1e-05, %v5039_v53 }
0x24b3   : > { %6755 = vrsqrt.f32 %v5043_v54 }
0x24b4   : > { %6757 = vrsqrt.f32 %v5042_v55 }
0x24bc   : > { %v6754_v56 = vpop.eup %6753 }
0x24bd   : > { %v5047_v13 = vmul.f32 %v6754_v56, %v5023_v38 }
0x24bf   : > { %v5056_v62 = vmul.f32 %v5780_v57, %v5047_v13  ;;  %v5817_v13 = vld [vmem:[%s7926_s23 + $0x1] ss:$0 sm:$0xff] }
0x24c0   : > { %v6756_v58 = vpop.eup %6755 }
0x24c1   : > { %v6758_v59 = vpop.eup %6757  ;;  %v5049_v60 = vmul.f32 %v6756_v58, %v5025_v28  ;;  %v5065_v7 = vadd.f32 %v5781_v63, %v5056_v62 }
0x24c2   : > { %v5048_v61 = vmul.f32 %v6758_v59, %v5024_v43 }
0x24c3   : > { %v5058_v4 = vmul.f32 %v5780_v57, %v5049_v60 }
0x24c4   : > { %v5057_v5 = vmul.f32 %v5780_v57, %v5048_v61 }
0x24c5   : > { %v5067_v6 = vadd.f32 %v5781_v63, %v5058_v4 }
0x24c6   : > { %v5066_v8 = vadd.f32 %v5781_v63, %v5057_v5 }
0x24c7   : > { %v5069_v9 = vpack.c.bf16 %v5067_v6, %v5067_v6 }
0x24c8   : > { %v5068_v12 = vpack.c.bf16 %v5066_v8, %v5065_v7  ;;  %v6631_v7 = vld [vmem:[%s7929_s26 + $0x8] sm:$0xff]  }
0x24ca   : > { %6461 = vmatprep.mubr.msk.bf16.mxu1 %vm883_vm1, %v5068_v12 }
0x24cb   : > { %6462 = vmatmul.mubr.msk.bf16.vlgmr.msra.gmra.mxu1 %vm883_vm1, %v5069_v9 }
0x24cc   : > { %6489 = vmatprep.mubr.msk.bf16.mxu1 %vm6830_vm0, %v6829_v1  ;;  %6486 = vmatpush3.bf16.msra.mxu1 %v6631_v7 }
0x24cd   : > { %6487 = vmatprep.subr.bf16.mxu1 %v6829_v1  ;;  %v5321_v1 = vld [vmem:[%s7930_s27] sm:$0x1] }
0x258b   : > { %v6463_v31 = vpop.f32.mrf.mxu1 }
0x258c   : > { %v5144_v40 = vadd.f32 %v6463_v31, %v5787_v16 }
0x258d   : > { %v5135_v33 = vpop.f32.mrf.mxu1 }
0x258e   : > { %v5154_v34 = vmul.f32 0.044715, %v5144_v40  ;;  %v5136_v23 = vadd.f32 %v5787_v16, %v5135_v33  ;;  %v5151_v24 = vmul.f32 0.5, %v5144_v40 }
0x258f   : > { %v6464_v35 = vpop.f32.mrf.mxu1 }
0x2590   : > { %v5157_v17 = vmul.f32 %v5154_v34, %v5144_v40  ;;  %v5152_v19 = vmul.f32 0.044715, %v5136_v23  ;;  %v5149_v48 = vmul.f32 0.5, %v5136_v23 }
0x2591   : > { %v5138_v26 = vpop.f32.mrf.mxu1 }
0x2592   : > { %v5160_v21 = vmul.f32 %v5157_v17, %v5144_v40  ;;  %v5155_v18 = vmul.f32 %v5152_v19, %v5136_v23  ;;  %v5139_v37 = vadd.f32 %v5787_v16, %v5138_v26 }
0x2594   : > { %v5163_v36 = vadd.f32 %v5160_v21, %v5144_v40  ;;  %v5158_v38 = vmul.f32 %v5155_v18, %v5136_v23  ;;  %v5153_v41 = vmul.f32 0.044715, %v5139_v37  ;;  %v5150_v49 = vmul.f32 0.5, %v5139_v37 }
0x2596   : > { %v5166_v11 = vmul.f32 0.7978846, %v5163_v36  ;;  %v5156_v42 = vmul.f32 %v5153_v41, %v5139_v37  ;;  %v5161_v27 = vadd.f32 %v5158_v38, %v5136_v23 }
0x2598   : > { %v5159_v39 = vmul.f32 %v5156_v42, %v5139_v37  ;;  %v5164_v43 = vmul.f32 0.7978846, %v5161_v27  ;;  %6759 = vtanh.f32 %v5166_v11 }
0x259a   : > { %v5162_v28 = vadd.f32 %v5159_v39, %v5139_v37  ;;  %6761 = vtanh.f32 %v5164_v43 }
0x259c   : > { %v5165_v29 = vmul.f32 0.7978846, %v5162_v28 }
0x259e   : > { %6763 = vtanh.f32 %v5165_v29 }
0x25a5   : > { %v6760_v44 = vpop.eup %6759 }
0x25a6   : > { %v5172_v0 = vadd.f32 1.0, %v6760_v44 }
0x25a7   : > { %v6762_v20 = vpop.eup %6761 }
0x25a8   : > { %v5170_v46 = vadd.f32 1.0, %v6762_v20  ;;  %v5175_v50 = vmul.f32 %v5172_v0, %v5151_v24 }
0x25aa   : > { %v5173_v51 = vmul.f32 %v5170_v46, %v5149_v48  ;;  %v5177_v54 = vpack.c.bf16 %v5175_v50, %v5175_v50 }
0x25ab   : > { %v6764_v47 = vpop.eup %6763 }
0x25ac   : > { %v5171_v32 = vadd.f32 1.0, %v6764_v47 }
0x25ae   : > { %v5174_v52 = vmul.f32 %v5171_v32, %v5150_v49 }
0x25b0   : > { %v5176_v53 = vpack.c.bf16 %v5174_v52, %v5173_v51 }
0x25b2   : > { %6481 = vmatprep.mubr.bf16.mxu0 %v5176_v53 }
0x25b3   : > { %6482 = vmatmul.mubr.bf16.vlgmr.msra.gmra.mxu0 %v5177_v54 }
0x2673   : > { %v6483_v55 = vpop.f32.mrf.mxu0 }
0x2675   : > { %v5277_v56 = vpop.f32.mrf.mxu0 }
0x2676   : > { %v5289_v57 = vadd.f32 %v5277_v56, %v7778_v30  ;;  %v6632_v30 = vld [vmem:[%s7929_s26] sm:$0xff]  }
0x2677   : > { %v6484_v58 = vpop.f32.mrf.mxu0  ;;  %6488 = vmatpush3.bf16.msra.mxu1 %v6632_v30 }
0x2678   : > { %v5298_v59 = vadd.f32 %v5817_v13, %v5289_v57 }
0x2679   : > { %v5280_v60 = vpop.f32.mrf.mxu0 }
0x267a   : > { %v5301_v61 = vsel %vm1019_vm3, %v5298_v59, 0.0 }
0x267b   : > { %5302 = vadd.xlane.f32.xlu0 %v5301_v61 }
0x2704   : > { %v5303_v62 = vpop.xlane.xlu0 %5302 }
0x2705   : > { %v5304_v63 = vmul.f32 0.03125, %v5303_v62 }
0x2707   : > { %v5305_v4 = vsub.f32 %v5298_v59, %v5304_v63 }
0x2709   : > { %v5306_v5 = vmul.f32 %v5305_v4, %v5305_v4 }
0x270b   : > { %v5307_v6 = vsel %vm1019_vm3, %v5306_v5, 0.0 }
0x270c   : > { %5308 = vadd.xlane.f32.xlu1 %v5307_v6 }
0x2795   : > { %v5309_v8 = vpop.xlane.xlu1 %5308 }
0x2796   : > { %v5310_v9 = vmul.f32 0.03125, %v5309_v8 }
0x2798   : > { %v5311_v12 = vadd.f32 1e-05, %v5310_v9 }
0x279a   : > { %6765 = vrsqrt.f32 %v5311_v12 }
0x27a7   : > { %v6766_v2 = vpop.eup %6765 }
0x27a8   : > { %v5313_v3 = vmul.f32 %v6766_v2, %v5305_v4 }
0x27aa   : > { %v5314_v10 = vmul.f32 %v5313_v3, %v5299_v22 }
0x27ac   : > { %v5315_v45 = vadd.f32 %v5314_v10, %v5300_v25 }
0x27ae   : > { %v5316_v15 = vpack.c.bf16 %v5315_v45, %v5315_v45 }
0x27b0   : > { %6490 = vmatmul.mubr.msk.bf16.vlgmr.msra.gmra.mxu1 %vm883_vm1, %v5316_v15 }
0x2870   : > { %v5371_v14 = vpop.f32.mrf.mxu1 }
0x2871   : > { %v5372_v16 = vadd.f32 %v5371_v14, %v5321_v1 }
0x2872   : > { %v6491_v31 = vpop.f32.mrf.mxu1 }
0x2873   : > { %5378 = vst.msk [vmem:[%s848_s1] sm:$0x1] %vm5377_vm8, %v5372_v16 }
0x2874   : > { %v5374_v40 = vpop.f32.mrf.mxu1 }
0x2875   : > { %6780 = shalt.err (!%p6777_p3)
}
0x2876   : > { %s6781_s1 = scalar_lea.hbm %s7862_s7, 16  ;;  %s6785_s11 = scalar_lea.hbm %s7994_s2, 32 }
0x2877   : > { %p6782_p4 = scmp.ne.s32.totalorder %s7862_s7, %s6781_s1  ;;  %p6786_p9 = scmp.lt.s32.totalorder %s7862_s7, %s7994_s2 }
0x2878   : > { %p6787_p10 = scmp.lt.s32.totalorder %s6785_s11, %s6781_s1 }
0x2879   : > { %p6783_p7 = pnand %p6782_p4, %p7016_p5 }
0x287a   : > { %p6788_p11 = por %p6787_p10, %p6786_p9 }
0x287b   : > { %p6784_p8 = pneg %p6783_p7 }
0x287d   : > { %p6789_p12 = pnand %p6788_p11, %p6784_p8 }
0x287f   : > { %6792 = shalt.err (!%p6789_p12)
}
0x2880   : > { %6517 = dma.vmem_to_hbm [thread:$0]  (%p7016_p5), %s7864_s10, 16, %s7862_s7, %s5380_s9   ;;  %v6492_v33 = vpop.f32.mrf.mxu1 }
0x2881 PF: > { %s7995_s12 = sld [smem:[#allocation7_spill]] }
0x2882   : > { %s7996_s3 = sld [smem:[#allocation5_spill]] }
0x2887   : > { %p6523_p13 = scmp.ge.s32.totalorder %s7995_s12, 2 }
0x2888   : > { %s5404_s0 = sand.u32 1, %s7996_s3  }
0x2889   : > { %p6520_p0 = pnand %p6523_p13, %p7020_p6  ;;  %s5405_s4 = scalar_lea.sflag [#allocation3], %s5404_s0 }
0x288b   : > { %p6521_p1 = pneg %p6520_p0 }
0x288d   : > { %6810 = dma.done.wait (%p6521_p1), %s5405_s4, 16  }
0x288e   : > { %6812 = vsyncadd (%p6521_p1), %s5405_s4, 4294967280  ;;  %s7998_s30 = sld [smem:[#allocation8_spill]]  ;;  %s8001_s8 = smov %s6819_s5 }
0x288f   : > { %s7999_s1 = sld [smem:[#allocation6_spill]] }
0x2890   : > { %s8000_s9 = sld [smem:[#allocation9_spill]] }
0x2894   : > { %p38_p2 = scmp.ge.s32.totalorder %s7998_s30, 4  }
0x2895   : > { %s8002_s5 = smov %s7999_s1 }
0x2896   :  { %40 = sbr.rel (!%p38_p2) target bundleno = 18 (0x12), region = 228 }
0x289b   :  { %5409 = vsyncpa [#allocation3], 1 }
0x289c   :  { %5411 = vsyncpa [#allocation3 + $0x1], 1 }

</bundles_post_ra>
